<compile_context>
chip_gen: v5e
topology: v5e:2x2
jax: 0.10.0
libtpu: 0.0.40
codegen_flags: <defaults>
</compile_context>

<pallas_src>
import functools

import numpy as np
import jax
import jax.numpy as jnp
from jax import lax
from jax.experimental import pallas as pl
from jax.experimental.pallas import tpu as pltpu


# ---------------------------------------------------------------------------
# Kernel A: fused conv-leg + transformer + NetVLAD aggregation (grid over B)
# ---------------------------------------------------------------------------
def _fused_leg_vlad_kernel(*refs, n_conv, nhead, ln_eps):
    bf16, f32 = jnp.bfloat16, jnp.float32

    x_ref = refs[0]
    conv_refs = refs[1:1 + n_conv]
    (cl1_w, w_q, w_k, w_v, b_q, b_k, b_v, w_o, b_out,
     ln1_g, ln1_b, w_ff1, b_ff1, w_ff2, b_ff2, ln2_g, ln2_b,
     cl2_w1, cl2_w2, cw, cb, cw2_t) = refs[1 + n_conv:-1]
    o_ref = refs[-1]

    def mm(a, w, bias=None, relu=False):
        acc = jnp.dot(a.astype(bf16), w, preferred_element_type=f32)
        if bias is not None:
            acc = acc + bias
        if relu:
            acc = jnp.maximum(acc, 0.0)
        return acc

    def layer_norm(y, g, b):
        mu = jnp.mean(y, axis=-1, keepdims=True)
        var = jnp.mean(jnp.square(y - mu), axis=-1, keepdims=True)
        return (y - mu) * lax.rsqrt(var + ln_eps) * g + b

    # ---- conv leg: height convs unrolled into dense matmuls over (H*C) ----
    h = x_ref[0].astype(f32)                                # (W, H*C)
    for cr in conv_refs:
        h = mm(h, cr[...], relu=True)                       # (W, H_out*C_out)
    f1 = mm(h, cl1_w[...], relu=True)                       # (W, d)  == out_l_1

    d = f1.shape[-1]
    dh = d // nhead
    scale = 1.0 / float(dh) ** 0.5

    # ---- multi-head self-attention (all heads in-VMEM, static head loop) ----
    attn = None
    for hh in range(nhead):
        q = mm(f1, w_q[hh], bias=b_q[hh])                   # (W, dh)
        k = mm(f1, w_k[hh], bias=b_k[hh])
        v = mm(f1, w_v[hh], bias=b_v[hh])
        s = lax.dot_general(q.astype(bf16), k.astype(bf16),
                            (((1,), (1,)), ((), ())),
                            preferred_element_type=f32) * scale      # (W, W)
        s = s - jnp.max(s, axis=-1, keepdims=True)
        p = jnp.exp(s)
        p = p * pl.reciprocal(jnp.sum(p, axis=-1, keepdims=True), approx=True)
        o_h = jnp.dot(p.astype(bf16), v.astype(bf16),
                      preferred_element_type=f32)           # (W, dh)
        contrib = jnp.dot(o_h.astype(bf16), w_o[hh],
                          preferred_element_type=f32)       # (W, d)
        attn = contrib if attn is None else attn + contrib
    attn = attn + b_out[...]

    # ---- post-norm transformer encoder layer ----
    src = layer_norm(f1 + attn, ln1_g[...], ln1_b[...])
    ff = mm(src, w_ff1[...], bias=b_ff1[...], relu=True)
    ff = mm(ff, w_ff2[...], bias=b_ff2[...])
    src = layer_norm(src + ff, ln2_g[...], ln2_b[...])      # (W, d)

    # ---- concat + convLast2 (as split matmuls) + L2 normalize ----
    leg = jnp.maximum(mm(f1, cl2_w1[...]) + mm(src, cl2_w2[...]), 0.0)   # (W, F)
    nrm = jnp.sqrt(jnp.sum(leg * leg, axis=-1, keepdims=True))
    leg = leg * pl.reciprocal(jnp.maximum(nrm, 1e-12), approx=True)

    # ---- NetVLAD soft aggregation, lane-dense (K, F) output ----
    logits = mm(leg, cw[...], bias=cb[...])                 # (W, K)
    logits = logits - jnp.max(logits, axis=-1, keepdims=True)
    e = jnp.exp(logits)
    act = e * pl.reciprocal(jnp.sum(e, axis=-1, keepdims=True), approx=True)
    ones_w = jnp.ones((act.shape[0], 1), f32)
    a_sum = lax.dot_general(act, ones_w, (((0,), (0,)), ((), ())),
                            preferred_element_type=f32)     # (K, 1)
    vlad = lax.dot_general(act.astype(bf16), leg.astype(bf16),
                           (((0,), (0,)), ((), ())),
                           preferred_element_type=f32)      # (K, F)
    vlad = vlad - a_sum * cw2_t[...]
    # intra-normalization (torch: F.normalize(vlad, dim=1) on (B, F, K))
    n1 = jnp.sqrt(jnp.sum(vlad * vlad, axis=-1, keepdims=True))          # (K, 1)
    vlad = vlad * pl.reciprocal(jnp.maximum(n1, 1e-12), approx=True)
    # global L2 normalization of the flattened descriptor
    n2 = jnp.sqrt(jnp.sum(jnp.sum(vlad * vlad, axis=-1, keepdims=True),
                          axis=0, keepdims=True))                         # (1, 1)
    vlad = vlad * pl.reciprocal(jnp.maximum(n2, 1e-12), approx=True)
    o_ref[0] = vlad


def fused_leg_transformer_vlad(x_bwc, prep, cfg):
    """x: (B, W, H*C) -> normalized VLAD descriptors (B, K, F)."""
    B, W, HC = x_bwc.shape
    K, F = cfg["cluster_size"], cfg["feature_size"]
    n_conv = len(prep["conv_mats"])

    weight_order = ["cl1_w", "w_q", "w_k", "w_v", "b_q", "b_k", "b_v", "w_o",
                    "b_out", "ln1_g", "ln1_b", "w_ff1", "b_ff1", "w_ff2",
                    "b_ff2", "ln2_g", "ln2_b", "cl2_w1", "cl2_w2",
                    "cluster_w", "cluster_b", "cluster_w2_t"]
    weights = list(prep["conv_mats"]) + [prep[name] for name in weight_order]

    def full_spec(arr):
        nd = arr.ndim
        return pl.BlockSpec(arr.shape, lambda b, _nd=nd: (0,) * _nd)

    in_specs = [pl.BlockSpec((1, W, HC), lambda b: (b, 0, 0))]
    in_specs += [full_spec(w) for w in weights]

    kernel = functools.partial(_fused_leg_vlad_kernel, n_conv=n_conv,
                               nhead=cfg["nhead"], ln_eps=1e-5)
    return pl.pallas_call(
        kernel,
        out_shape=jax.ShapeDtypeStruct((B, K, F), jnp.float32),
        grid=(B,),
        in_specs=in_specs,
        out_specs=pl.BlockSpec((1, K, F), lambda b: (b, 0, 0)),
        compiler_params=pltpu.CompilerParams(dimension_semantics=("parallel",)),
    )(x_bwc, *weights)


# ---------------------------------------------------------------------------
# Kernel B: K-tiled hidden projection + BatchNorm(eval) + context gating
# ---------------------------------------------------------------------------
def _hidden_gating_kernel(flat_ref, w_ref, bns_ref, bnb_ref, gw_ref, gb_ref,
                          o_ref, acc_ref):
    k = pl.program_id(0)

    @pl.when(k == 0)
    def _():
        acc_ref[...] = jnp.zeros_like(acc_ref)

    acc_ref[...] += jnp.dot(flat_ref[...].astype(jnp.bfloat16), w_ref[...],
                            preferred_element_type=jnp.float32)

    @pl.when(k == pl.num_programs(0) - 1)
    def _():
        h = acc_ref[...] * bns_ref[...] + bnb_ref[...]        # BatchNorm1d (eval)
        z = jnp.dot(h.astype(jnp.bfloat16), gw_ref[...],
                    preferred_element_type=jnp.float32) + gb_ref[...]
        gates = 1.0 / (1.0 + jnp.exp(-z))                     # sigmoid gating
        o_ref[...] = h * gates


def _pick_k_tile(total, cap=4096):
    for cand in (4096, 2048, 1024, 512, 256, 128):
        if cand <= cap and total % cand == 0 and cand < total:
            return cand
    return total


def hidden_bn_gating(flat, prep):
    """flat: (B, K*F) -> (B, output_dim). Streams the big weight in K tiles."""
    B, KF = flat.shape
    out = prep["hidden1_w"].shape[1]
    tk = _pick_k_tile(KF)
    nk = KF // tk
    return pl.pallas_call(
        _hidden_gating_kernel,
        out_shape=jax.ShapeDtypeStruct((B, out), jnp.float32),
        grid=(nk,),
        in_specs=[
            pl.BlockSpec((B, tk), lambda k: (0, k)),
            pl.BlockSpec((tk, out), lambda k: (k, 0)),
            pl.BlockSpec((1, out), lambda k: (0, 0)),
            pl.BlockSpec((1, out), lambda k: (0, 0)),
            pl.BlockSpec((out, out), lambda k: (0, 0)),
            pl.BlockSpec((1, out), lambda k: (0, 0)),
        ],
        out_specs=pl.BlockSpec((B, out), lambda k: (0, 0)),
        scratch_shapes=[pltpu.VMEM((B, out), jnp.float32)],
        compiler_params=pltpu.CompilerParams(dimension_semantics=("arbitrary",)),
    )(flat, prep["hidden1_w"], prep["bn_scale"], prep["bn_shift"],
      prep["gating_w"], prep["gating_b"])


# ---------------------------------------------------------------------------
# Model config / parameters
# ---------------------------------------------------------------------------
def make_config(width=16, submap_size=2, channels=1, scale=8):
    # Real module: scale=1 (conv channels 16..128, d_model=256, feature 1024,
    # cluster 64, output 256, width 512).  Demo uses a scaled-down but
    # structurally identical configuration.
    return dict(
        height=32,
        width=width,
        channels=channels,
        submap_size=submap_size,
        conv_specs=[(5, 1), (3, 2), (3, 2), (3, 2), (2, 2), (1, 2)],  # H: 32->1
        conv_channels=[channels, 16 // scale, 32 // scale, 64 // scale,
                       64 // scale, 128 // scale, 128 // scale],
        d_model=256 // scale,
        nhead=4,
        dff=1024 // scale,
        feature_size=1024 // scale,
        cluster_size=64 // scale,
        output_dim=256 // scale,
    )


def init_params(key, cfg):
    ks = iter(jax.random.split(key, 32))
    p = {}
    conv_w = []
    chans = cfg["conv_channels"]
    for i, (kh, _) in enumerate(cfg["conv_specs"]):
        cin, cout = chans[i], chans[i + 1]
        conv_w.append(jax.random.normal(next(ks), (kh * cin, cout), jnp.float32)
                      * (1.0 / (kh * cin) ** 0.5))
    p["conv_w"] = conv_w
    d, dff = cfg["d_model"], cfg["dff"]
    F_, K_, out = cfg["feature_size"], cfg["cluster_size"], cfg["output_dim"]
    clast = chans[-1]
    p["convLast1_w"] = jax.random.normal(next(ks), (clast, d)) * (1.0 / clast ** 0.5)
    p["w_in"] = jax.random.normal(next(ks), (d, 3 * d)) * (1.0 / d ** 0.5)
    p["b_in"] = jnp.zeros((3 * d,), jnp.float32)
    p["w_out"] = jax.random.normal(next(ks), (d, d)) * (1.0 / d ** 0.5)
    p["b_out"] = jnp.zeros((d,), jnp.float32)
    p["ln1_g"], p["ln1_b"] = jnp.ones((d,)), jnp.zeros((d,))
    p["ln2_g"], p["ln2_b"] = jnp.ones((d,)), jnp.zeros((d,))
    p["w_ff1"] = jax.random.normal(next(ks), (d, dff)) * (1.0 / d ** 0.5)
    p["b_ff1"] = jnp.zeros((dff,), jnp.float32)
    p["w_ff2"] = jax.random.normal(next(ks), (dff, d)) * (1.0 / dff ** 0.5)
    p["b_ff2"] = jnp.zeros((d,), jnp.float32)
    p["convLast2_w"] = jax.random.normal(next(ks), (2 * d, F_)) * (1.0 / (2 * d) ** 0.5)
    # NetVLADLoupe (add_batch_norm=False -> cluster biases are used)
    p["cluster_w"] = jax.random.normal(next(ks), (F_, K_)) * (1.0 / F_ ** 0.5)
    p["cluster_b"] = jax.random.normal(next(ks), (K_,)) * (1.0 / F_ ** 0.5)
    p["cluster_w2"] = jax.random.normal(next(ks), (F_, K_)) * (1.0 / F_ ** 0.5)
    p["hidden1_w"] = jax.random.normal(next(ks), (K_ * F_, out)) * (1.0 / F_ ** 0.5)
    p["bn2_g"], p["bn2_b"] = jnp.ones((out,)), jnp.zeros((out,))
    p["bn2_rm"], p["bn2_rv"] = jnp.zeros((out,)), jnp.ones((out,))
    p["gating_w"] = jax.random.normal(next(ks), (out, out)) * (1.0 / out ** 0.5)
    p["gating_b"] = jax.random.normal(next(ks), (out,)) * (1.0 / out ** 0.5)
    return p


def prepare_params(params, cfg):
    """One-time host-side prep: unroll height convs into dense matrices, split
    attention heads, fold BN stats, permute hidden1 rows to (k, f) order, and
    cast matmul weights to bf16 (f32 accumulation stays in-kernel)."""
    bf16, f32 = jnp.bfloat16, jnp.float32
    prep = {}
    chans = cfg["conv_channels"]
    H = cfg["height"]
    conv_mats = []
    Hin = H
    for i, (kh, sh) in enumerate(cfg["conv_specs"]):
        cin, cout = chans[i], chans[i + 1]
        Hout = (Hin - kh) // sh + 1
        w = np.asarray(params["conv_w"][i], np.float32)          # (kh*cin, cout)
        M = np.zeros((Hin * cin, Hout * cout), np.float32)
        for ho in range(Hout):
            for j in range(kh):
                r0 = (ho * sh + j) * cin
                M[r0:r0 + cin, ho * cout:(ho + 1) * cout] = w[j * cin:(j + 1) * cin, :]
        conv_mats.append(jnp.asarray(M, bf16))
        Hin = Hout
    assert Hin == 1, "conv stack must collapse the height axis"
    prep["conv_mats"] = conv_mats

    d, nh = cfg["d_model"], cfg["nhead"]
    dh = d // nh
    F_, K_ = cfg["feature_size"], cfg["cluster_size"]
    out = cfg["output_dim"]

    prep["cl1_w"] = params["convLast1_w"].astype(bf16)
    w_in, b_in = params["w_in"], params["b_in"]

    def split_cols(mat):          # (d, d) -> (nh, d, dh)
        return jnp.transpose(mat.reshape(d, nh, dh), (1, 0, 2))

    prep["w_q"] = split_cols(w_in[:, :d]).astype(bf16)
    prep["w_k"] = split_cols(w_in[:, d:2 * d]).astype(bf16)
    prep["w_v"] = split_cols(w_in[:, 2 * d:]).astype(bf16)
    prep["b_q"] = b_in[:d].reshape(nh, 1, dh).astype(f32)
    prep["b_k"] = b_in[d:2 * d].reshape(nh, 1, dh).astype(f32)
    prep["b_v"] = b_in[2 * d:].reshape(nh, 1, dh).astype(f32)
    prep["w_o"] = params["w_out"].reshape(nh, dh, d).astype(bf16)
    prep["b_out"] = params["b_out"].reshape(1, d).astype(f32)
    prep["ln1_g"] = params["ln1_g"].reshape(1, d).astype(f32)
    prep["ln1_b"] = params["ln1_b"].reshape(1, d).astype(f32)
    prep["ln2_g"] = params["ln2_g"].reshape(1, d).astype(f32)
    prep["ln2_b"] = params["ln2_b"].reshape(1, d).astype(f32)
    prep["w_ff1"] = params["w_ff1"].astype(bf16)
    prep["b_ff1"] = params["b_ff1"].reshape(1, -1).astype(f32)
    prep["w_ff2"] = params["w_ff2"].astype(bf16)
    prep["b_ff2"] = params["b_ff2"].reshape(1, d).astype(f32)
    prep["cl2_w1"] = params["convLast2_w"][:d, :].astype(bf16)
    prep["cl2_w2"] = params["convLast2_w"][d:, :].astype(bf16)
    prep["cluster_w"] = params["cluster_w"].astype(bf16)
    prep["cluster_b"] = params["cluster_b"].reshape(1, K_).astype(f32)
    prep["cluster_w2_t"] = jnp.transpose(params["cluster_w2"]).astype(f32)   # (K, F)
    # hidden1 weights: torch flattens vlad as (F, K) row-major; our lane-dense
    # kernel flattens as (K, F) -> permute rows once here.
    prep["hidden1_w"] = (params["hidden1_w"].reshape(F_, K_, out)
                         .transpose(1, 0, 2).reshape(K_ * F_, out).astype(bf16))
    eps = 1e-5
    bn_scale = params["bn2_g"] * lax.rsqrt(params["bn2_rv"] + eps)
    prep["bn_scale"] = bn_scale.reshape(1, out).astype(f32)
    prep["bn_shift"] = (params["bn2_b"] - params["bn2_rm"] * bn_scale).reshape(1, out).astype(f32)
    prep["gating_w"] = params["gating_w"].astype(bf16)
    prep["gating_b"] = params["gating_b"].reshape(1, out).astype(f32)
    return prep


# ---------------------------------------------------------------------------
# Forward pass
# ---------------------------------------------------------------------------
def overlap_transformer_forward(prep, x_nchw, cfg):
    B, C, H, W = x_nchw.shape
    # NCHW -> column-token layout (B, W, H*C); row index matches the unrolled
    # conv matrices (h * C + c).
    x = jnp.transpose(x_nchw, (0, 3, 2, 1)).reshape(B, W, H * C).astype(jnp.float32)
    vlad = fused_leg_transformer_vlad(x, prep, cfg)          # (B, K, F), normalized
    flat = vlad.reshape(B, cfg["cluster_size"] * cfg["feature_size"])
    return hidden_bn_gating(flat, prep)                      # (B, output_dim)


if __name__ == "__main__":
    cfg = make_config(width=16, submap_size=2, channels=1, scale=8)
    key = jax.random.PRNGKey(0)
    pkey, xkey = jax.random.split(key)
    params = init_params(pkey, cfg)
    prep = prepare_params(params, cfg)

    B = 2
    W_total = cfg["width"] * (cfg["submap_size"] + 1)        # 48 columns
    x = jax.random.normal(xkey, (B, cfg["channels"], cfg["height"], W_total),
                          jnp.float32)

    fwd = jax.jit(lambda p, xin: overlap_transformer_forward(p, xin, cfg))
    out = jax.block_until_ready(fwd(prep, x))
    assert out.shape == (B, cfg["output_dim"])
    assert bool(jnp.all(jnp.isfinite(out)))
    print("KERNEL_OK")
</pallas_src>

<mosaic_0001>
module attributes {stable_mosaic.version = 11 : i64} {
  func.func @_hidden_gating_kernel(%arg0: i32, %arg1: memref<2x512xf32, #tpu.memory_space<vmem>>, %arg2: memref<512x32xbf16, #tpu.memory_space<vmem>>, %arg3: memref<1x32xf32, #tpu.memory_space<vmem>>, %arg4: memref<1x32xf32, #tpu.memory_space<vmem>>, %arg5: memref<32x32xbf16, #tpu.memory_space<vmem>>, %arg6: memref<1x32xf32, #tpu.memory_space<vmem>>, %arg7: memref<2x32xf32, #tpu.memory_space<vmem>>, %arg8: memref<2x32xf32, #tpu.memory_space<vmem>>) attributes {dimension_semantics = [#tpu.dimension_semantics<arbitrary>], iteration_bounds = array<i64: 2>, scalar_prefetch = 0 : i64, scratch_operands = 1 : i64, tpu.core_type = #tpu.core_type<tc>, window_params = [{transform_indices = @transform_0, window_bounds = array<i64: 2, 512>}, {transform_indices = @transform_1, window_bounds = array<i64: 512, 32>}, {pipeline_mode = #tpu.pipeline_mode<synchronous>, transform_indices = @transform_2, window_bounds = array<i64: 1, 32>}, {pipeline_mode = #tpu.pipeline_mode<synchronous>, transform_indices = @transform_3, window_bounds = array<i64: 1, 32>}, {pipeline_mode = #tpu.pipeline_mode<synchronous>, transform_indices = @transform_4, window_bounds = array<i64: 32, 32>}, {pipeline_mode = #tpu.pipeline_mode<synchronous>, transform_indices = @transform_5, window_bounds = array<i64: 1, 32>}, {pipeline_mode = #tpu.pipeline_mode<synchronous>, transform_indices = @transform_6, window_bounds = array<i64: 2, 32>}]} {
    %c0_i32 = arith.constant 0 : i32
    %0 = arith.cmpi eq, %arg0, %c0_i32 : i32
    %1 = arith.extui %0 : i1 to i32
    %c0_i32_0 = arith.constant 0 : i32
    %2 = arith.cmpi ne, %1, %c0_i32_0 : i32
    scf.if %2 {
      %cst_9 = arith.constant 0.000000e+00 : f32
      %13 = vector.broadcast %cst_9 : f32 to vector<2x32xf32>
      %c0_10 = arith.constant 0 : index
      %c0_11 = arith.constant 0 : index
      %14 = vector.load %arg8[%c0_10, %c0_11] : memref<2x32xf32, #tpu.memory_space<vmem>>, vector<2x32xf32>
      tpu.vector_store %arg8[%c0_10, %c0_11], %13 {strides = array<i32>} : memref<2x32xf32, #tpu.memory_space<vmem>>, vector<2x32xf32>,
    } else {
    }
    %c0 = arith.constant 0 : index
    %c0_1 = arith.constant 0 : index
    %3 = vector.load %arg8[%c0, %c0_1] : memref<2x32xf32, #tpu.memory_space<vmem>>, vector<2x32xf32>
    %c0_2 = arith.constant 0 : index
    %c0_3 = arith.constant 0 : index
    %4 = vector.load %arg1[%c0_2, %c0_3] : memref<2x512xf32, #tpu.memory_space<vmem>>, vector<2x512xf32>
    %5 = arith.truncf %4 : vector<2x512xf32> to vector<2x512xbf16>
    %c0_4 = arith.constant 0 : index
    %c0_5 = arith.constant 0 : index
    %6 = vector.load %arg2[%c0_4, %c0_5] : memref<512x32xbf16, #tpu.memory_space<vmem>>, vector<512x32xbf16>
    %cst = arith.constant dense<0.000000e+00> : vector<2x32xf32>
    %7 = tpu.matmul %5, %6, %cst {dimension_numbers = #tpu.dot_dimension_numbers<[1], [0], [0], [1], [0, 0, 1, 1], [], []>} : vector<2x512xbf16>, vector<512x32xbf16>, vector<2x32xf32> -> vector<2x32xf32>
    %8 = arith.addf %3, %7 : vector<2x32xf32>
    %c0_6 = arith.constant 0 : index
    %c0_7 = arith.constant 0 : index
    %9 = vector.load %arg8[%c0_6, %c0_7] : memref<2x32xf32, #tpu.memory_space<vmem>>, vector<2x32xf32>
    tpu.vector_store %arg8[%c0_6, %c0_7], %8 {strides = array<i32>} : memref<2x32xf32, #tpu.memory_space<vmem>>, vector<2x32xf32>,
    %c1_i32 = arith.constant 1 : i32
    %10 = arith.cmpi eq, %arg0, %c1_i32 : i32
    %11 = arith.extui %10 : i1 to i32
    %c0_i32_8 = arith.constant 0 : i32
    %12 = arith.cmpi ne, %11, %c0_i32_8 : i32
    scf.if %12 {
      %c0_9 = arith.constant 0 : index
      %c0_10 = arith.constant 0 : index
      %13 = vector.load %arg8[%c0_9, %c0_10] : memref<2x32xf32, #tpu.memory_space<vmem>>, vector<2x32xf32>
      %c0_11 = arith.constant 0 : index
      %c0_12 = arith.constant 0 : index
      %14 = vector.load %arg3[%c0_11, %c0_12] : memref<1x32xf32, #tpu.memory_space<vmem>>, vector<1x32xf32>
      %15 = vector.broadcast %14 : vector<1x32xf32> to vector<2x32xf32>
      %16 = arith.mulf %13, %15 : vector<2x32xf32>
      %c0_13 = arith.constant 0 : index
      %c0_14 = arith.constant 0 : index
      %17 = vector.load %arg4[%c0_13, %c0_14] : memref<1x32xf32, #tpu.memory_space<vmem>>, vector<1x32xf32>
      %18 = vector.broadcast %17 : vector<1x32xf32> to vector<2x32xf32>
      %19 = arith.addf %16, %18 : vector<2x32xf32>
      %20 = arith.truncf %19 : vector<2x32xf32> to vector<2x32xbf16>
      %c0_15 = arith.constant 0 : index
      %c0_16 = arith.constant 0 : index
      %21 = vector.load %arg5[%c0_15, %c0_16] : memref<32x32xbf16, #tpu.memory_space<vmem>>, vector<32x32xbf16>
      %cst_17 = arith.constant dense<0.000000e+00> : vector<2x32xf32>
      %22 = tpu.matmul %20, %21, %cst_17 {dimension_numbers = #tpu.dot_dimension_numbers<[1], [0], [0], [1], [0, 0, 1, 1], [], []>} : vector<2x32xbf16>, vector<32x32xbf16>, vector<2x32xf32> -> vector<2x32xf32>
      %c0_18 = arith.constant 0 : index
      %c0_19 = arith.constant 0 : index
      %23 = vector.load %arg6[%c0_18, %c0_19] : memref<1x32xf32, #tpu.memory_space<vmem>>, vector<1x32xf32>
      %24 = vector.broadcast %23 : vector<1x32xf32> to vector<2x32xf32>
      %25 = arith.addf %22, %24 : vector<2x32xf32>
      %cst_20 = arith.constant 0.000000e+00 : f32
      %26 = vector.broadcast %cst_20 : f32 to vector<2x32xf32>
      %27 = arith.subf %26, %25 : vector<2x32xf32>
      %28 = math.exp %27 : vector<2x32xf32>
      %cst_21 = arith.constant 1.000000e+00 : f32
      %29 = vector.broadcast %cst_21 : f32 to vector<2x32xf32>
      %30 = arith.addf %29, %28 : vector<2x32xf32>
      %cst_22 = arith.constant 1.000000e+00 : f32
      %31 = vector.broadcast %cst_22 : f32 to vector<2x32xf32>
      %32 = arith.divf %31, %30 : vector<2x32xf32>
      %33 = arith.mulf %19, %32 : vector<2x32xf32>
      %c0_23 = arith.constant 0 : index
      %c0_24 = arith.constant 0 : index
      %34 = vector.load %arg7[%c0_23, %c0_24] : memref<2x32xf32, #tpu.memory_space<vmem>>, vector<2x32xf32>
      tpu.vector_store %arg7[%c0_23, %c0_24], %33 {strides = array<i32>} : memref<2x32xf32, #tpu.memory_space<vmem>>, vector<2x32xf32>,
    } else {
    }
    return
  }
  func.func @transform_0(%arg0: i32) -> (i32, i32) {
    %c0_i32 = arith.constant 0 : i32
    %c0_i32_0 = arith.constant 0 : i32
    return %c0_i32, %arg0 : i32, i32
  }
  func.func @transform_1(%arg0: i32) -> (i32, i32) {
    %c0_i32 = arith.constant 0 : i32
    %c0_i32_0 = arith.constant 0 : i32
    return %arg0, %c0_i32 : i32, i32
  }
  func.func @transform_2(%arg0: i32) -> (i32, i32) {
    %c0_i32 = arith.constant 0 : i32
    %c0_i32_0 = arith.constant 0 : i32
    %c0_i32_1 = arith.constant 0 : i32
    return %c0_i32, %c0_i32_0 : i32, i32
  }
  func.func @transform_3(%arg0: i32) -> (i32, i32) {
    %c0_i32 = arith.constant 0 : i32
    %c0_i32_0 = arith.constant 0 : i32
    %c0_i32_1 = arith.constant 0 : i32
    return %c0_i32, %c0_i32_0 : i32, i32
  }
  func.func @transform_4(%arg0: i32) -> (i32, i32) {
    %c0_i32 = arith.constant 0 : i32
    %c0_i32_0 = arith.constant 0 : i32
    %c0_i32_1 = arith.constant 0 : i32
    return %c0_i32, %c0_i32_0 : i32, i32
  }
  func.func @transform_5(%arg0: i32) -> (i32, i32) {
    %c0_i32 = arith.constant 0 : i32
    %c0_i32_0 = arith.constant 0 : i32
    %c0_i32_1 = arith.constant 0 : i32
    return %c0_i32, %c0_i32_0 : i32, i32
  }
  func.func @transform_6(%arg0: i32) -> (i32, i32) {
    %c0_i32 = arith.constant 0 : i32
    %c0_i32_0 = arith.constant 0 : i32
    %c0_i32_1 = arith.constant 0 : i32
    return %c0_i32, %c0_i32_0 : i32, i32
  }
}

module attributes {stable_mosaic.version = 11 : i64} {
  func.func @_fused_leg_vlad_kernel(%arg0: i32, %arg1: memref<1x48x32xf32, #tpu.memory_space<vmem>>, %arg2: memref<32x56xbf16, #tpu.memory_space<vmem>>, %arg3: memref<56x52xbf16, #tpu.memory_space<vmem>>, %arg4: memref<52x48xbf16, #tpu.memory_space<vmem>>, %arg5: memref<48x16xbf16, #tpu.memory_space<vmem>>, %arg6: memref<16x16xbf16, #tpu.memory_space<vmem>>, %arg7: memref<16x16xbf16, #tpu.memory_space<vmem>>, %arg8: memref<16x32xbf16, #tpu.memory_space<vmem>>, %arg9: memref<4x32x8xbf16, #tpu.memory_space<vmem>>, %arg10: memref<4x32x8xbf16, #tpu.memory_space<vmem>>, %arg11: memref<4x32x8xbf16, #tpu.memory_space<vmem>>, %arg12: memref<4x1x8xf32, #tpu.memory_space<vmem>>, %arg13: memref<4x1x8xf32, #tpu.memory_space<vmem>>, %arg14: memref<4x1x8xf32, #tpu.memory_space<vmem>>, %arg15: memref<4x8x32xbf16, #tpu.memory_space<vmem>>, %arg16: memref<1x32xf32, #tpu.memory_space<vmem>>, %arg17: memref<1x32xf32, #tpu.memory_space<vmem>>, %arg18: memref<1x32xf32, #tpu.memory_space<vmem>>, %arg19: memref<32x128xbf16, #tpu.memory_space<vmem>>, %arg20: memref<1x128xf32, #tpu.memory_space<vmem>>, %arg21: memref<128x32xbf16, #tpu.memory_space<vmem>>, %arg22: memref<1x32xf32, #tpu.memory_space<vmem>>, %arg23: memref<1x32xf32, #tpu.memory_space<vmem>>, %arg24: memref<1x32xf32, #tpu.memory_space<vmem>>, %arg25: memref<32x128xbf16, #tpu.memory_space<vmem>>, %arg26: memref<32x128xbf16, #tpu.memory_space<vmem>>, %arg27: memref<128x8xbf16, #tpu.memory_space<vmem>>, %arg28: memref<1x8xf32, #tpu.memory_space<vmem>>, %arg29: memref<8x128xf32, #tpu.memory_space<vmem>>, %arg30: memref<1x8x128xf32, #tpu.memory_space<vmem>>) attributes {dimension_semantics = [#tpu.dimension_semantics<parallel>], iteration_bounds = array<i64: 2>, scalar_prefetch = 0 : i64, scratch_operands = 0 : i64, tpu.core_type = #tpu.core_type<tc>, window_params = [{transform_indices = @transform_0, window_bounds = array<i64: 1, 48, 32>}, {pipeline_mode = #tpu.pipeline_mode<synchronous>, transform_indices = @transform_1, window_bounds = array<i64: 32, 56>}, {pipeline_mode = #tpu.pipeline_mode<synchronous>, transform_indices = @transform_2, window_bounds = array<i64: 56, 52>}, {pipeline_mode = #tpu.pipeline_mode<synchronous>, transform_indices = @transform_3, window_bounds = array<i64: 52, 48>}, {pipeline_mode = #tpu.pipeline_mode<synchronous>, transform_indices = @transform_4, window_bounds = array<i64: 48, 16>}, {pipeline_mode = #tpu.pipeline_mode<synchronous>, transform_indices = @transform_5, window_bounds = array<i64: 16, 16>}, {pipeline_mode = #tpu.pipeline_mode<synchronous>, transform_indices = @transform_6, window_bounds = array<i64: 16, 16>}, {pipeline_mode = #tpu.pipeline_mode<synchronous>, transform_indices = @transform_7, window_bounds = array<i64: 16, 32>}, {pipeline_mode = #tpu.pipeline_mode<synchronous>, transform_indices = @transform_8, window_bounds = array<i64: 4, 32, 8>}, {pipeline_mode = #tpu.pipeline_mode<synchronous>, transform_indices = @transform_9, window_bounds = array<i64: 4, 32, 8>}, {pipeline_mode = #tpu.pipeline_mode<synchronous>, transform_indices = @transform_10, window_bounds = array<i64: 4, 32, 8>}, {pipeline_mode = #tpu.pipeline_mode<synchronous>, transform_indices = @transform_11, window_bounds = array<i64: 4, 1, 8>}, {pipeline_mode = #tpu.pipeline_mode<synchronous>, transform_indices = @transform_12, window_bounds = array<i64: 4, 1, 8>}, {pipeline_mode = #tpu.pipeline_mode<synchronous>, transform_indices = @transform_13, window_bounds = array<i64: 4, 1, 8>}, {pipeline_mode = #tpu.pipeline_mode<synchronous>, transform_indices = @transform_14, window_bounds = array<i64: 4, 8, 32>}, {pipeline_mode = #tpu.pipeline_mode<synchronous>, transform_indices = @transform_15, window_bounds = array<i64: 1, 32>}, {pipeline_mode = #tpu.pipeline_mode<synchronous>, transform_indices = @transform_16, window_bounds = array<i64: 1, 32>}, {pipeline_mode = #tpu.pipeline_mode<synchronous>, transform_indices = @transform_17, window_bounds = array<i64: 1, 32>}, {pipeline_mode = #tpu.pipeline_mode<synchronous>, transform_indices = @transform_18, window_bounds = array<i64: 32, 128>}, {pipeline_mode = #tpu.pipeline_mode<synchronous>, transform_indices = @transform_19, window_bounds = array<i64: 1, 128>}, {pipeline_mode = #tpu.pipeline_mode<synchronous>, transform_indices = @transform_20, window_bounds = array<i64: 128, 32>}, {pipeline_mode = #tpu.pipeline_mode<synchronous>, transform_indices = @transform_21, window_bounds = array<i64: 1, 32>}, {pipeline_mode = #tpu.pipeline_mode<synchronous>, transform_indices = @transform_22, window_bounds = array<i64: 1, 32>}, {pipeline_mode = #tpu.pipeline_mode<synchronous>, transform_indices = @transform_23, window_bounds = array<i64: 1, 32>}, {pipeline_mode = #tpu.pipeline_mode<synchronous>, transform_indices = @transform_24, window_bounds = array<i64: 32, 128>}, {pipeline_mode = #tpu.pipeline_mode<synchronous>, transform_indices = @transform_25, window_bounds = array<i64: 32, 128>}, {pipeline_mode = #tpu.pipeline_mode<synchronous>, transform_indices = @transform_26, window_bounds = array<i64: 128, 8>}, {pipeline_mode = #tpu.pipeline_mode<synchronous>, transform_indices = @transform_27, window_bounds = array<i64: 1, 8>}, {pipeline_mode = #tpu.pipeline_mode<synchronous>, transform_indices = @transform_28, window_bounds = array<i64: 8, 128>}, {transform_indices = @transform_29, window_bounds = array<i64: 1, 8, 128>}]} {
    %c0 = arith.constant 0 : index
    %c0_0 = arith.constant 0 : index
    %c0_1 = arith.constant 0 : index
    %0 = vector.load %arg1[%c0, %c0_0, %c0_1] : memref<1x48x32xf32, #tpu.memory_space<vmem>>, vector<1x48x32xf32>
    %1 = vector.shape_cast %0 : vector<1x48x32xf32> to vector<48x32xf32>
    %c0_2 = arith.constant 0 : index
    %c0_3 = arith.constant 0 : index
    %2 = vector.load %arg2[%c0_2, %c0_3] : memref<32x56xbf16, #tpu.memory_space<vmem>>, vector<32x56xbf16>
    %3 = arith.truncf %1 : vector<48x32xf32> to vector<48x32xbf16>
    %cst = arith.constant dense<0.000000e+00> : vector<48x56xf32>
    %4 = tpu.matmul %3, %2, %cst {dimension_numbers = #tpu.dot_dimension_numbers<[1], [0], [0], [1], [0, 0, 1, 1], [], []>} : vector<48x32xbf16>, vector<32x56xbf16>, vector<48x56xf32> -> vector<48x56xf32>
    %cst_4 = arith.constant 0.000000e+00 : f32
    %5 = vector.broadcast %cst_4 : f32 to vector<48x56xf32>
    %6 = arith.maximumf %4, %5 : vector<48x56xf32>
    %c0_5 = arith.constant 0 : index
    %c0_6 = arith.constant 0 : index
    %7 = vector.load %arg3[%c0_5, %c0_6] : memref<56x52xbf16, #tpu.memory_space<vmem>>, vector<56x52xbf16>
    %8 = arith.truncf %6 : vector<48x56xf32> to vector<48x56xbf16>
    %cst_7 = arith.constant dense<0.000000e+00> : vector<48x52xf32>
    %9 = tpu.matmul %8, %7, %cst_7 {dimension_numbers = #tpu.dot_dimension_numbers<[1], [0], [0], [1], [0, 0, 1, 1], [], []>} : vector<48x56xbf16>, vector<56x52xbf16>, vector<48x52xf32> -> vector<48x52xf32>
    %cst_8 = arith.constant 0.000000e+00 : f32
    %10 = vector.broadcast %cst_8 : f32 to vector<48x52xf32>
    %11 = arith.maximumf %9, %10 : vector<48x52xf32>
    %c0_9 = arith.constant 0 : index
    %c0_10 = arith.constant 0 : index
    %12 = vector.load %arg4[%c0_9, %c0_10] : memref<52x48xbf16, #tpu.memory_space<vmem>>, vector<52x48xbf16>
    %13 = arith.truncf %11 : vector<48x52xf32> to vector<48x52xbf16>
    %cst_11 = arith.constant dense<0.000000e+00> : vector<48x48xf32>
    %14 = tpu.matmul %13, %12, %cst_11 {dimension_numbers = #tpu.dot_dimension_numbers<[1], [0], [0], [1], [0, 0, 1, 1], [], []>} : vector<48x52xbf16>, vector<52x48xbf16>, vector<48x48xf32> -> vector<48x48xf32>
    %cst_12 = arith.constant 0.000000e+00 : f32
    %15 = vector.broadcast %cst_12 : f32 to vector<48x48xf32>
    %16 = arith.maximumf %14, %15 : vector<48x48xf32>
    %c0_13 = arith.constant 0 : index
    %c0_14 = arith.constant 0 : index
    %17 = vector.load %arg5[%c0_13, %c0_14] : memref<48x16xbf16, #tpu.memory_space<vmem>>, vector<48x16xbf16>
    %18 = arith.truncf %16 : vector<48x48xf32> to vector<48x48xbf16>
    %cst_15 = arith.constant dense<0.000000e+00> : vector<48x16xf32>
    %19 = tpu.matmul %18, %17, %cst_15 {dimension_numbers = #tpu.dot_dimension_numbers<[1], [0], [0], [1], [0, 0, 1, 1], [], []>} : vector<48x48xbf16>, vector<48x16xbf16>, vector<48x16xf32> -> vector<48x16xf32>
    %cst_16 = arith.constant 0.000000e+00 : f32
    %20 = vector.broadcast %cst_16 : f32 to vector<48x16xf32>
    %21 = arith.maximumf %19, %20 : vector<48x16xf32>
    %c0_17 = arith.constant 0 : index
    %c0_18 = arith.constant 0 : index
    %22 = vector.load %arg6[%c0_17, %c0_18] : memref<16x16xbf16, #tpu.memory_space<vmem>>, vector<16x16xbf16>
    %23 = arith.truncf %21 : vector<48x16xf32> to vector<48x16xbf16>
    %cst_19 = arith.constant dense<0.000000e+00> : vector<48x16xf32>
    %24 = tpu.matmul %23, %22, %cst_19 {dimension_numbers = #tpu.dot_dimension_numbers<[1], [0], [0], [1], [0, 0, 1, 1], [], []>} : vector<48x16xbf16>, vector<16x16xbf16>, vector<48x16xf32> -> vector<48x16xf32>
    %cst_20 = arith.constant 0.000000e+00 : f32
    %25 = vector.broadcast %cst_20 : f32 to vector<48x16xf32>
    %26 = arith.maximumf %24, %25 : vector<48x16xf32>
    %c0_21 = arith.constant 0 : index
    %c0_22 = arith.constant 0 : index
    %27 = vector.load %arg7[%c0_21, %c0_22] : memref<16x16xbf16, #tpu.memory_space<vmem>>, vector<16x16xbf16>
    %28 = arith.truncf %26 : vector<48x16xf32> to vector<48x16xbf16>
    %cst_23 = arith.constant dense<0.000000e+00> : vector<48x16xf32>
    %29 = tpu.matmul %28, %27, %cst_23 {dimension_numbers = #tpu.dot_dimension_numbers<[1], [0], [0], [1], [0, 0, 1, 1], [], []>} : vector<48x16xbf16>, vector<16x16xbf16>, vector<48x16xf32> -> vector<48x16xf32>
    %cst_24 = arith.constant 0.000000e+00 : f32
    %30 = vector.broadcast %cst_24 : f32 to vector<48x16xf32>
    %31 = arith.maximumf %29, %30 : vector<48x16xf32>
    %c0_25 = arith.constant 0 : index
    %c0_26 = arith.constant 0 : index
    %32 = vector.load %arg8[%c0_25, %c0_26] : memref<16x32xbf16, #tpu.memory_space<vmem>>, vector<16x32xbf16>
    %33 = arith.truncf %31 : vector<48x16xf32> to vector<48x16xbf16>
    %cst_27 = arith.constant dense<0.000000e+00> : vector<48x32xf32>
    %34 = tpu.matmul %33, %32, %cst_27 {dimension_numbers = #tpu.dot_dimension_numbers<[1], [0], [0], [1], [0, 0, 1, 1], [], []>} : vector<48x16xbf16>, vector<16x32xbf16>, vector<48x32xf32> -> vector<48x32xf32>
    %cst_28 = arith.constant 0.000000e+00 : f32
    %35 = vector.broadcast %cst_28 : f32 to vector<48x32xf32>
    %36 = arith.maximumf %34, %35 : vector<48x32xf32>
    %c0_29 = arith.constant 0 : index
    %c0_30 = arith.constant 0 : index
    %c0_31 = arith.constant 0 : index
    %37 = vector.load %arg9[%c0_29, %c0_30, %c0_31] : memref<4x32x8xbf16, #tpu.memory_space<vmem>>, vector<1x32x8xbf16>
    %38 = vector.shape_cast %37 : vector<1x32x8xbf16> to vector<32x8xbf16>
    %c0_32 = arith.constant 0 : index
    %c0_33 = arith.constant 0 : index
    %c0_34 = arith.constant 0 : index
    %39 = vector.load %arg12[%c0_32, %c0_33, %c0_34] : memref<4x1x8xf32, #tpu.memory_space<vmem>>, vector<1x1x8xf32>
    %40 = vector.shape_cast %39 : vector<1x1x8xf32> to vector<1x8xf32>
    %41 = arith.truncf %36 : vector<48x32xf32> to vector<48x32xbf16>
    %cst_35 = arith.constant dense<0.000000e+00> : vector<48x8xf32>
    %42 = tpu.matmul %41, %38, %cst_35 {dimension_numbers = #tpu.dot_dimension_numbers<[1], [0], [0], [1], [0, 0, 1, 1], [], []>} : vector<48x32xbf16>, vector<32x8xbf16>, vector<48x8xf32> -> vector<48x8xf32>
    %43 = vector.broadcast %40 : vector<1x8xf32> to vector<48x8xf32>
    %44 = arith.addf %42, %43 : vector<48x8xf32>
    %c0_36 = arith.constant 0 : index
    %c0_37 = arith.constant 0 : index
    %c0_38 = arith.constant 0 : index
    %45 = vector.load %arg10[%c0_36, %c0_37, %c0_38] : memref<4x32x8xbf16, #tpu.memory_space<vmem>>, vector<1x32x8xbf16>
    %46 = vector.shape_cast %45 : vector<1x32x8xbf16> to vector<32x8xbf16>
    %c0_39 = arith.constant 0 : index
    %c0_40 = arith.constant 0 : index
    %c0_41 = arith.constant 0 : index
    %47 = vector.load %arg13[%c0_39, %c0_40, %c0_41] : memref<4x1x8xf32, #tpu.memory_space<vmem>>, vector<1x1x8xf32>
    %48 = vector.shape_cast %47 : vector<1x1x8xf32> to vector<1x8xf32>
    %49 = arith.truncf %36 : vector<48x32xf32> to vector<48x32xbf16>
    %cst_42 = arith.constant dense<0.000000e+00> : vector<48x8xf32>
    %50 = tpu.matmul %49, %46, %cst_42 {dimension_numbers = #tpu.dot_dimension_numbers<[1], [0], [0], [1], [0, 0, 1, 1], [], []>} : vector<48x32xbf16>, vector<32x8xbf16>, vector<48x8xf32> -> vector<48x8xf32>
    %51 = vector.broadcast %48 : vector<1x8xf32> to vector<48x8xf32>
    %52 = arith.addf %50, %51 : vector<48x8xf32>
    %c0_43 = arith.constant 0 : index
    %c0_44 = arith.constant 0 : index
    %c0_45 = arith.constant 0 : index
    %53 = vector.load %arg11[%c0_43, %c0_44, %c0_45] : memref<4x32x8xbf16, #tpu.memory_space<vmem>>, vector<1x32x8xbf16>
    %54 = vector.shape_cast %53 : vector<1x32x8xbf16> to vector<32x8xbf16>
    %c0_46 = arith.constant 0 : index
    %c0_47 = arith.constant 0 : index
    %c0_48 = arith.constant 0 : index
    %55 = vector.load %arg14[%c0_46, %c0_47, %c0_48] : memref<4x1x8xf32, #tpu.memory_space<vmem>>, vector<1x1x8xf32>
    %56 = vector.shape_cast %55 : vector<1x1x8xf32> to vector<1x8xf32>
    %57 = arith.truncf %36 : vector<48x32xf32> to vector<48x32xbf16>
    %cst_49 = arith.constant dense<0.000000e+00> : vector<48x8xf32>
    %58 = tpu.matmul %57, %54, %cst_49 {dimension_numbers = #tpu.dot_dimension_numbers<[1], [0], [0], [1], [0, 0, 1, 1], [], []>} : vector<48x32xbf16>, vector<32x8xbf16>, vector<48x8xf32> -> vector<48x8xf32>
    %59 = vector.broadcast %56 : vector<1x8xf32> to vector<48x8xf32>
    %60 = arith.addf %58, %59 : vector<48x8xf32>
    %61 = arith.truncf %44 : vector<48x8xf32> to vector<48x8xbf16>
    %62 = arith.truncf %52 : vector<48x8xf32> to vector<48x8xbf16>
    %cst_50 = arith.constant dense<0.000000e+00> : vector<48x48xf32>
    %63 = tpu.matmul %61, %62, %cst_50 {dimension_numbers = #tpu.dot_dimension_numbers<[1], [1], [0], [0], [0, 0, 1, 0], [], []>} : vector<48x8xbf16>, vector<48x8xbf16>, vector<48x48xf32> -> vector<48x48xf32>
    %cst_51 = arith.constant 0.353553385 : f32
    %64 = vector.broadcast %cst_51 : f32 to vector<48x48xf32>
    %65 = arith.mulf %63, %64 : vector<48x48xf32>
    %cst_52 = arith.constant dense<0xFF800000> : vector<48xf32>
    %66 = vector.multi_reduction <maximumf>, %65, %cst_52 [1] : vector<48x48xf32> to vector<48xf32>
    %67 = vector.shape_cast %66 : vector<48xf32> to vector<48x1xf32>
    %68 = vector.broadcast %67 : vector<48x1xf32> to vector<48x48xf32>
    %69 = arith.subf %65, %68 : vector<48x48xf32>
    %70 = math.exp %69 : vector<48x48xf32>
    %cst_53 = arith.constant dense<0.000000e+00> : vector<48xf32>
    %71 = vector.multi_reduction <add>, %70, %cst_53 [1] : vector<48x48xf32> to vector<48xf32>
    %72 = vector.shape_cast %71 : vector<48xf32> to vector<48x1xf32>
    %73 = tpu.reciprocal %72 {approx = true} : vector<48x1xf32> -> vector<48x1xf32>
    %74 = vector.broadcast %73 : vector<48x1xf32> to vector<48x48xf32>
    %75 = arith.mulf %70, %74 : vector<48x48xf32>
    %76 = arith.truncf %75 : vector<48x48xf32> to vector<48x48xbf16>
    %77 = arith.truncf %60 : vector<48x8xf32> to vector<48x8xbf16>
    %cst_54 = arith.constant dense<0.000000e+00> : vector<48x8xf32>
    %78 = tpu.matmul %76, %77, %cst_54 {dimension_numbers = #tpu.dot_dimension_numbers<[1], [0], [0], [1], [0, 0, 1, 1], [], []>} : vector<48x48xbf16>, vector<48x8xbf16>, vector<48x8xf32> -> vector<48x8xf32>
    %79 = arith.truncf %78 : vector<48x8xf32> to vector<48x8xbf16>
    %c0_55 = arith.constant 0 : index
    %c0_56 = arith.constant 0 : index
    %c0_57 = arith.constant 0 : index
    %80 = vector.load %arg15[%c0_55, %c0_56, %c0_57] : memref<4x8x32xbf16, #tpu.memory_space<vmem>>, vector<1x8x32xbf16>
    %81 = vector.shape_cast %80 : vector<1x8x32xbf16> to vector<8x32xbf16>
    %cst_58 = arith.constant dense<0.000000e+00> : vector<48x32xf32>
    %82 = tpu.matmul %79, %81, %cst_58 {dimension_numbers = #tpu.dot_dimension_numbers<[1], [0], [0], [1], [0, 0, 1, 1], [], []>} : vector<48x8xbf16>, vector<8x32xbf16>, vector<48x32xf32> -> vector<48x32xf32>
    %c1 = arith.constant 1 : index
    %c0_59 = arith.constant 0 : index
    %c0_60 = arith.constant 0 : index
    %83 = vector.load %arg9[%c1, %c0_59, %c0_60] : memref<4x32x8xbf16, #tpu.memory_space<vmem>>, vector<1x32x8xbf16>
    %84 = vector.shape_cast %83 : vector<1x32x8xbf16> to vector<32x8xbf16>
    %c1_61 = arith.constant 1 : index
    %c0_62 = arith.constant 0 : index
    %c0_63 = arith.constant 0 : index
    %85 = vector.load %arg12[%c1_61, %c0_62, %c0_63] : memref<4x1x8xf32, #tpu.memory_space<vmem>>, vector<1x1x8xf32>
    %86 = vector.shape_cast %85 : vector<1x1x8xf32> to vector<1x8xf32>
    %87 = arith.truncf %36 : vector<48x32xf32> to vector<48x32xbf16>
    %cst_64 = arith.constant dense<0.000000e+00> : vector<48x8xf32>
    %88 = tpu.matmul %87, %84, %cst_64 {dimension_numbers = #tpu.dot_dimension_numbers<[1], [0], [0], [1], [0, 0, 1, 1], [], []>} : vector<48x32xbf16>, vector<32x8xbf16>, vector<48x8xf32> -> vector<48x8xf32>
    %89 = vector.broadcast %86 : vector<1x8xf32> to vector<48x8xf32>
    %90 = arith.addf %88, %89 : vector<48x8xf32>
    %c1_65 = arith.constant 1 : index
    %c0_66 = arith.constant 0 : index
    %c0_67 = arith.constant 0 : index
    %91 = vector.load %arg10[%c1_65, %c0_66, %c0_67] : memref<4x32x8xbf16, #tpu.memory_space<vmem>>, vector<1x32x8xbf16>
    %92 = vector.shape_cast %91 : vector<1x32x8xbf16> to vector<32x8xbf16>
    %c1_68 = arith.constant 1 : index
    %c0_69 = arith.constant 0 : index
    %c0_70 = arith.constant 0 : index
    %93 = vector.load %arg13[%c1_68, %c0_69, %c0_70] : memref<4x1x8xf32, #tpu.memory_space<vmem>>, vector<1x1x8xf32>
    %94 = vector.shape_cast %93 : vector<1x1x8xf32> to vector<1x8xf32>
    %95 = arith.truncf %36 : vector<48x32xf32> to vector<48x32xbf16>
    %cst_71 = arith.constant dense<0.000000e+00> : vector<48x8xf32>
    %96 = tpu.matmul %95, %92, %cst_71 {dimension_numbers = #tpu.dot_dimension_numbers<[1], [0], [0], [1], [0, 0, 1, 1], [], []>} : vector<48x32xbf16>, vector<32x8xbf16>, vector<48x8xf32> -> vector<48x8xf32>
    %97 = vector.broadcast %94 : vector<1x8xf32> to vector<48x8xf32>
    %98 = arith.addf %96, %97 : vector<48x8xf32>
    %c1_72 = arith.constant 1 : index
    %c0_73 = arith.constant 0 : index
    %c0_74 = arith.constant 0 : index
    %99 = vector.load %arg11[%c1_72, %c0_73, %c0_74] : memref<4x32x8xbf16, #tpu.memory_space<vmem>>, vector<1x32x8xbf16>
    %100 = vector.shape_cast %99 : vector<1x32x8xbf16> to vector<32x8xbf16>
    %c1_75 = arith.constant 1 : index
    %c0_76 = arith.constant 0 : index
    %c0_77 = arith.constant 0 : index
    %101 = vector.load %arg14[%c1_75, %c0_76, %c0_77] : memref<4x1x8xf32, #tpu.memory_space<vmem>>, vector<1x1x8xf32>
    %102 = vector.shape_cast %101 : vector<1x1x8xf32> to vector<1x8xf32>
    %103 = arith.truncf %36 : vector<48x32xf32> to vector<48x32xbf16>
    %cst_78 = arith.constant dense<0.000000e+00> : vector<48x8xf32>
    %104 = tpu.matmul %103, %100, %cst_78 {dimension_numbers = #tpu.dot_dimension_numbers<[1], [0], [0], [1], [0, 0, 1, 1], [], []>} : vector<48x32xbf16>, vector<32x8xbf16>, vector<48x8xf32> -> vector<48x8xf32>
    %105 = vector.broadcast %102 : vector<1x8xf32> to vector<48x8xf32>
    %106 = arith.addf %104, %105 : vector<48x8xf32>
    %107 = arith.truncf %90 : vector<48x8xf32> to vector<48x8xbf16>
    %108 = arith.truncf %98 : vector<48x8xf32> to vector<48x8xbf16>
    %cst_79 = arith.constant dense<0.000000e+00> : vector<48x48xf32>
    %109 = tpu.matmul %107, %108, %cst_79 {dimension_numbers = #tpu.dot_dimension_numbers<[1], [1], [0], [0], [0, 0, 1, 0], [], []>} : vector<48x8xbf16>, vector<48x8xbf16>, vector<48x48xf32> -> vector<48x48xf32>
    %cst_80 = arith.constant 0.353553385 : f32
    %110 = vector.broadcast %cst_80 : f32 to vector<48x48xf32>
    %111 = arith.mulf %109, %110 : vector<48x48xf32>
    %cst_81 = arith.constant dense<0xFF800000> : vector<48xf32>
    %112 = vector.multi_reduction <maximumf>, %111, %cst_81 [1] : vector<48x48xf32> to vector<48xf32>
    %113 = vector.shape_cast %112 : vector<48xf32> to vector<48x1xf32>
    %114 = vector.broadcast %113 : vector<48x1xf32> to vector<48x48xf32>
    %115 = arith.subf %111, %114 : vector<48x48xf32>
    %116 = math.exp %115 : vector<48x48xf32>
    %cst_82 = arith.constant dense<0.000000e+00> : vector<48xf32>
    %117 = vector.multi_reduction <add>, %116, %cst_82 [1] : vector<48x48xf32> to vector<48xf32>
    %118 = vector.shape_cast %117 : vector<48xf32> to vector<48x1xf32>
    %119 = tpu.reciprocal %118 {approx = true} : vector<48x1xf32> -> vector<48x1xf32>
    %120 = vector.broadcast %119 : vector<48x1xf32> to vector<48x48xf32>
    %121 = arith.mulf %116, %120 : vector<48x48xf32>
    %122 = arith.truncf %121 : vector<48x48xf32> to vector<48x48xbf16>
    %123 = arith.truncf %106 : vector<48x8xf32> to vector<48x8xbf16>
    %cst_83 = arith.constant dense<0.000000e+00> : vector<48x8xf32>
    %124 = tpu.matmul %122, %123, %cst_83 {dimension_numbers = #tpu.dot_dimension_numbers<[1], [0], [0], [1], [0, 0, 1, 1], [], []>} : vector<48x48xbf16>, vector<48x8xbf16>, vector<48x8xf32> -> vector<48x8xf32>
    %125 = arith.truncf %124 : vector<48x8xf32> to vector<48x8xbf16>
    %c1_84 = arith.constant 1 : index
    %c0_85 = arith.constant 0 : index
    %c0_86 = arith.constant 0 : index
    %126 = vector.load %arg15[%c1_84, %c0_85, %c0_86] : memref<4x8x32xbf16, #tpu.memory_space<vmem>>, vector<1x8x32xbf16>
    %127 = vector.shape_cast %126 : vector<1x8x32xbf16> to vector<8x32xbf16>
    %cst_87 = arith.constant dense<0.000000e+00> : vector<48x32xf32>
    %128 = tpu.matmul %125, %127, %cst_87 {dimension_numbers = #tpu.dot_dimension_numbers<[1], [0], [0], [1], [0, 0, 1, 1], [], []>} : vector<48x8xbf16>, vector<8x32xbf16>, vector<48x32xf32> -> vector<48x32xf32>
    %129 = arith.addf %82, %128 : vector<48x32xf32>
    %c2 = arith.constant 2 : index
    %c0_88 = arith.constant 0 : index
    %c0_89 = arith.constant 0 : index
    %130 = vector.load %arg9[%c2, %c0_88, %c0_89] : memref<4x32x8xbf16, #tpu.memory_space<vmem>>, vector<1x32x8xbf16>
    %131 = vector.shape_cast %130 : vector<1x32x8xbf16> to vector<32x8xbf16>
    %c2_90 = arith.constant 2 : index
    %c0_91 = arith.constant 0 : index
    %c0_92 = arith.constant 0 : index
    %132 = vector.load %arg12[%c2_90, %c0_91, %c0_92] : memref<4x1x8xf32, #tpu.memory_space<vmem>>, vector<1x1x8xf32>
    %133 = vector.shape_cast %132 : vector<1x1x8xf32> to vector<1x8xf32>
    %134 = arith.truncf %36 : vector<48x32xf32> to vector<48x32xbf16>
    %cst_93 = arith.constant dense<0.000000e+00> : vector<48x8xf32>
    %135 = tpu.matmul %134, %131, %cst_93 {dimension_numbers = #tpu.dot_dimension_numbers<[1], [0], [0], [1], [0, 0, 1, 1], [], []>} : vector<48x32xbf16>, vector<32x8xbf16>, vector<48x8xf32> -> vector<48x8xf32>
    %136 = vector.broadcast %133 : vector<1x8xf32> to vector<48x8xf32>
    %137 = arith.addf %135, %136 : vector<48x8xf32>
    %c2_94 = arith.constant 2 : index
    %c0_95 = arith.constant 0 : index
    %c0_96 = arith.constant 0 : index
    %138 = vector.load %arg10[%c2_94, %c0_95, %c0_96] : memref<4x32x8xbf16, #tpu.memory_space<vmem>>, vector<1x32x8xbf16>
    %139 = vector.shape_cast %138 : vector<1x32x8xbf16> to vector<32x8xbf16>
    %c2_97 = arith.constant 2 : index
    %c0_98 = arith.constant 0 : index
    %c0_99 = arith.constant 0 : index
    %140 = vector.load %arg13[%c2_97, %c0_98, %c0_99] : memref<4x1x8xf32, #tpu.memory_space<vmem>>, vector<1x1x8xf32>
    %141 = vector.shape_cast %140 : vector<1x1x8xf32> to vector<1x8xf32>
    %142 = arith.truncf %36 : vector<48x32xf32> to vector<48x32xbf16>
    %cst_100 = arith.constant dense<0.000000e+00> : vector<48x8xf32>
    %143 = tpu.matmul %142, %139, %cst_100 {dimension_numbers = #tpu.dot_dimension_numbers<[1], [0], [0], [1], [0, 0, 1, 1], [], []>} : vector<48x32xbf16>, vector<32x8xbf16>, vector<48x8xf32> -> vector<48x8xf32>
    %144 = vector.broadcast %141 : vector<1x8xf32> to vector<48x8xf32>
    %145 = arith.addf %143, %144 : vector<48x8xf32>
    %c2_101 = arith.constant 2 : index
    %c0_102 = arith.constant 0 : index
    %c0_103 = arith.constant 0 : index
    %146 = vector.load %arg11[%c2_101, %c0_102, %c0_103] : memref<4x32x8xbf16, #tpu.memory_space<vmem>>, vector<1x32x8xbf16>
    %147 = vector.shape_cast %146 : vector<1x32x8xbf16> to vector<32x8xbf16>
    %c2_104 = arith.constant 2 : index
    %c0_105 = arith.constant 0 : index
    %c0_106 = arith.constant 0 : index
    %148 = vector.load %arg14[%c2_104, %c0_105, %c0_106] : memref<4x1x8xf32, #tpu.memory_space<vmem>>, vector<1x1x8xf32>
    %149 = vector.shape_cast %148 : vector<1x1x8xf32> to vector<1x8xf32>
    %150 = arith.truncf %36 : vector<48x32xf32> to vector<48x32xbf16>
    %cst_107 = arith.constant dense<0.000000e+00> : vector<48x8xf32>
    %151 = tpu.matmul %150, %147, %cst_107 {dimension_numbers = #tpu.dot_dimension_numbers<[1], [0], [0], [1], [0, 0, 1, 1], [], []>} : vector<48x32xbf16>, vector<32x8xbf16>, vector<48x8xf32> -> vector<48x8xf32>
    %152 = vector.broadcast %149 : vector<1x8xf32> to vector<48x8xf32>
    %153 = arith.addf %151, %152 : vector<48x8xf32>
    %154 = arith.truncf %137 : vector<48x8xf32> to vector<48x8xbf16>
    %155 = arith.truncf %145 : vector<48x8xf32> to vector<48x8xbf16>
    %cst_108 = arith.constant dense<0.000000e+00> : vector<48x48xf32>
    %156 = tpu.matmul %154, %155, %cst_108 {dimension_numbers = #tpu.dot_dimension_numbers<[1], [1], [0], [0], [0, 0, 1, 0], [], []>} : vector<48x8xbf16>, vector<48x8xbf16>, vector<48x48xf32> -> vector<48x48xf32>
    %cst_109 = arith.constant 0.353553385 : f32
    %157 = vector.broadcast %cst_109 : f32 to vector<48x48xf32>
    %158 = arith.mulf %156, %157 : vector<48x48xf32>
    %cst_110 = arith.constant dense<0xFF800000> : vector<48xf32>
    %159 = vector.multi_reduction <maximumf>, %158, %cst_110 [1] : vector<48x48xf32> to vector<48xf32>
    %160 = vector.shape_cast %159 : vector<48xf32> to vector<48x1xf32>
    %161 = vector.broadcast %160 : vector<48x1xf32> to vector<48x48xf32>
    %162 = arith.subf %158, %161 : vector<48x48xf32>
    %163 = math.exp %162 : vector<48x48xf32>
    %cst_111 = arith.constant dense<0.000000e+00> : vector<48xf32>
    %164 = vector.multi_reduction <add>, %163, %cst_111 [1] : vector<48x48xf32> to vector<48xf32>
    %165 = vector.shape_cast %164 : vector<48xf32> to vector<48x1xf32>
    %166 = tpu.reciprocal %165 {approx = true} : vector<48x1xf32> -> vector<48x1xf32>
    %167 = vector.broadcast %166 : vector<48x1xf32> to vector<48x48xf32>
    %168 = arith.mulf %163, %167 : vector<48x48xf32>
    %169 = arith.truncf %168 : vector<48x48xf32> to vector<48x48xbf16>
    %170 = arith.truncf %153 : vector<48x8xf32> to vector<48x8xbf16>
    %cst_112 = arith.constant dense<0.000000e+00> : vector<48x8xf32>
    %171 = tpu.matmul %169, %170, %cst_112 {dimension_numbers = #tpu.dot_dimension_numbers<[1], [0], [0], [1], [0, 0, 1, 1], [], []>} : vector<48x48xbf16>, vector<48x8xbf16>, vector<48x8xf32> -> vector<48x8xf32>
    %172 = arith.truncf %171 : vector<48x8xf32> to vector<48x8xbf16>
    %c2_113 = arith.constant 2 : index
    %c0_114 = arith.constant 0 : index
    %c0_115 = arith.constant 0 : index
    %173 = vector.load %arg15[%c2_113, %c0_114, %c0_115] : memref<4x8x32xbf16, #tpu.memory_space<vmem>>, vector<1x8x32xbf16>
    %174 = vector.shape_cast %173 : vector<1x8x32xbf16> to vector<8x32xbf16>
    %cst_116 = arith.constant dense<0.000000e+00> : vector<48x32xf32>
    %175 = tpu.matmul %172, %174, %cst_116 {dimension_numbers = #tpu.dot_dimension_numbers<[1], [0], [0], [1], [0, 0, 1, 1], [], []>} : vector<48x8xbf16>, vector<8x32xbf16>, vector<48x32xf32> -> vector<48x32xf32>
    %176 = arith.addf %129, %175 : vector<48x32xf32>
    %c3 = arith.constant 3 : index
    %c0_117 = arith.constant 0 : index
    %c0_118 = arith.constant 0 : index
    %177 = vector.load %arg9[%c3, %c0_117, %c0_118] : memref<4x32x8xbf16, #tpu.memory_space<vmem>>, vector<1x32x8xbf16>
    %178 = vector.shape_cast %177 : vector<1x32x8xbf16> to vector<32x8xbf16>
    %c3_119 = arith.constant 3 : index
    %c0_120 = arith.constant 0 : index
    %c0_121 = arith.constant 0 : index
    %179 = vector.load %arg12[%c3_119, %c0_120, %c0_121] : memref<4x1x8xf32, #tpu.memory_space<vmem>>, vector<1x1x8xf32>
    %180 = vector.shape_cast %179 : vector<1x1x8xf32> to vector<1x8xf32>
    %181 = arith.truncf %36 : vector<48x32xf32> to vector<48x32xbf16>
    %cst_122 = arith.constant dense<0.000000e+00> : vector<48x8xf32>
    %182 = tpu.matmul %181, %178, %cst_122 {dimension_numbers = #tpu.dot_dimension_numbers<[1], [0], [0], [1], [0, 0, 1, 1], [], []>} : vector<48x32xbf16>, vector<32x8xbf16>, vector<48x8xf32> -> vector<48x8xf32>
    %183 = vector.broadcast %180 : vector<1x8xf32> to vector<48x8xf32>
    %184 = arith.addf %182, %183 : vector<48x8xf32>
    %c3_123 = arith.constant 3 : index
    %c0_124 = arith.constant 0 : index
    %c0_125 = arith.constant 0 : index
    %185 = vector.load %arg10[%c3_123, %c0_124, %c0_125] : memref<4x32x8xbf16, #tpu.memory_space<vmem>>, vector<1x32x8xbf16>
    %186 = vector.shape_cast %185 : vector<1x32x8xbf16> to vector<32x8xbf16>
    %c3_126 = arith.constant 3 : index
    %c0_127 = arith.constant 0 : index
    %c0_128 = arith.constant 0 : index
    %187 = vector.load %arg13[%c3_126, %c0_127, %c0_128] : memref<4x1x8xf32, #tpu.memory_space<vmem>>, vector<1x1x8xf32>
    %188 = vector.shape_cast %187 : vector<1x1x8xf32> to vector<1x8xf32>
    %189 = arith.truncf %36 : vector<48x32xf32> to vector<48x32xbf16>
    %cst_129 = arith.constant dense<0.000000e+00> : vector<48x8xf32>
    %190 = tpu.matmul %189, %186, %cst_129 {dimension_numbers = #tpu.dot_dimension_numbers<[1], [0], [0], [1], [0, 0, 1, 1], [], []>} : vector<48x32xbf16>, vector<32x8xbf16>, vector<48x8xf32> -> vector<48x8xf32>
    %191 = vector.broadcast %188 : vector<1x8xf32> to vector<48x8xf32>
    %192 = arith.addf %190, %191 : vector<48x8xf32>
    %c3_130 = arith.constant 3 : index
    %c0_131 = arith.constant 0 : index
    %c0_132 = arith.constant 0 : index
    %193 = vector.load %arg11[%c3_130, %c0_131, %c0_132] : memref<4x32x8xbf16, #tpu.memory_space<vmem>>, vector<1x32x8xbf16>
    %194 = vector.shape_cast %193 : vector<1x32x8xbf16> to vector<32x8xbf16>
    %c3_133 = arith.constant 3 : index
    %c0_134 = arith.constant 0 : index
    %c0_135 = arith.constant 0 : index
    %195 = vector.load %arg14[%c3_133, %c0_134, %c0_135] : memref<4x1x8xf32, #tpu.memory_space<vmem>>, vector<1x1x8xf32>
    %196 = vector.shape_cast %195 : vector<1x1x8xf32> to vector<1x8xf32>
    %197 = arith.truncf %36 : vector<48x32xf32> to vector<48x32xbf16>
    %cst_136 = arith.constant dense<0.000000e+00> : vector<48x8xf32>
    %198 = tpu.matmul %197, %194, %cst_136 {dimension_numbers = #tpu.dot_dimension_numbers<[1], [0], [0], [1], [0, 0, 1, 1], [], []>} : vector<48x32xbf16>, vector<32x8xbf16>, vector<48x8xf32> -> vector<48x8xf32>
    %199 = vector.broadcast %196 : vector<1x8xf32> to vector<48x8xf32>
    %200 = arith.addf %198, %199 : vector<48x8xf32>
    %201 = arith.truncf %184 : vector<48x8xf32> to vector<48x8xbf16>
    %202 = arith.truncf %192 : vector<48x8xf32> to vector<48x8xbf16>
    %cst_137 = arith.constant dense<0.000000e+00> : vector<48x48xf32>
    %203 = tpu.matmul %201, %202, %cst_137 {dimension_numbers = #tpu.dot_dimension_numbers<[1], [1], [0], [0], [0, 0, 1, 0], [], []>} : vector<48x8xbf16>, vector<48x8xbf16>, vector<48x48xf32> -> vector<48x48xf32>
    %cst_138 = arith.constant 0.353553385 : f32
    %204 = vector.broadcast %cst_138 : f32 to vector<48x48xf32>
    %205 = arith.mulf %203, %204 : vector<48x48xf32>
    %cst_139 = arith.constant dense<0xFF800000> : vector<48xf32>
    %206 = vector.multi_reduction <maximumf>, %205, %cst_139 [1] : vector<48x48xf32> to vector<48xf32>
    %207 = vector.shape_cast %206 : vector<48xf32> to vector<48x1xf32>
    %208 = vector.broadcast %207 : vector<48x1xf32> to vector<48x48xf32>
    %209 = arith.subf %205, %208 : vector<48x48xf32>
    %210 = math.exp %209 : vector<48x48xf32>
    %cst_140 = arith.constant dense<0.000000e+00> : vector<48xf32>
    %211 = vector.multi_reduction <add>, %210, %cst_140 [1] : vector<48x48xf32> to vector<48xf32>
    %212 = vector.shape_cast %211 : vector<48xf32> to vector<48x1xf32>
    %213 = tpu.reciprocal %212 {approx = true} : vector<48x1xf32> -> vector<48x1xf32>
    %214 = vector.broadcast %213 : vector<48x1xf32> to vector<48x48xf32>
    %215 = arith.mulf %210, %214 : vector<48x48xf32>
    %216 = arith.truncf %215 : vector<48x48xf32> to vector<48x48xbf16>
    %217 = arith.truncf %200 : vector<48x8xf32> to vector<48x8xbf16>
    %cst_141 = arith.constant dense<0.000000e+00> : vector<48x8xf32>
    %218 = tpu.matmul %216, %217, %cst_141 {dimension_numbers = #tpu.dot_dimension_numbers<[1], [0], [0], [1], [0, 0, 1, 1], [], []>} : vector<48x48xbf16>, vector<48x8xbf16>, vector<48x8xf32> -> vector<48x8xf32>
    %219 = arith.truncf %218 : vector<48x8xf32> to vector<48x8xbf16>
    %c3_142 = arith.constant 3 : index
    %c0_143 = arith.constant 0 : index
    %c0_144 = arith.constant 0 : index
    %220 = vector.load %arg15[%c3_142, %c0_143, %c0_144] : memref<4x8x32xbf16, #tpu.memory_space<vmem>>, vector<1x8x32xbf16>
    %221 = vector.shape_cast %220 : vector<1x8x32xbf16> to vector<8x32xbf16>
    %cst_145 = arith.constant dense<0.000000e+00> : vector<48x32xf32>
    %222 = tpu.matmul %219, %221, %cst_145 {dimension_numbers = #tpu.dot_dimension_numbers<[1], [0], [0], [1], [0, 0, 1, 1], [], []>} : vector<48x8xbf16>, vector<8x32xbf16>, vector<48x32xf32> -> vector<48x32xf32>
    %223 = arith.addf %176, %222 : vector<48x32xf32>
    %c0_146 = arith.constant 0 : index
    %c0_147 = arith.constant 0 : index
    %224 = vector.load %arg16[%c0_146, %c0_147] : memref<1x32xf32, #tpu.memory_space<vmem>>, vector<1x32xf32>
    %225 = vector.broadcast %224 : vector<1x32xf32> to vector<48x32xf32>
    %226 = arith.addf %223, %225 : vector<48x32xf32>
    %227 = arith.addf %36, %226 : vector<48x32xf32>
    %c0_148 = arith.constant 0 : index
    %c0_149 = arith.constant 0 : index
    %228 = vector.load %arg17[%c0_148, %c0_149] : memref<1x32xf32, #tpu.memory_space<vmem>>, vector<1x32xf32>
    %c0_150 = arith.constant 0 : index
    %c0_151 = arith.constant 0 : index
    %229 = vector.load %arg18[%c0_150, %c0_151] : memref<1x32xf32, #tpu.memory_space<vmem>>, vector<1x32xf32>
    %cst_152 = arith.constant dense<0.000000e+00> : vector<48xf32>
    %230 = vector.multi_reduction <add>, %227, %cst_152 [1] : vector<48x32xf32> to vector<48xf32>
    %231 = vector.shape_cast %230 : vector<48xf32> to vector<48x1xf32>
    %cst_153 = arith.constant 3.200000e+01 : f32
    %232 = vector.broadcast %cst_153 : f32 to vector<48x1xf32>
    %233 = arith.divf %231, %232 : vector<48x1xf32>
    %234 = vector.broadcast %233 : vector<48x1xf32> to vector<48x32xf32>
    %235 = arith.subf %227, %234 : vector<48x32xf32>
    %236 = arith.mulf %235, %235 : vector<48x32xf32>
    %cst_154 = arith.constant dense<0.000000e+00> : vector<48xf32>
    %237 = vector.multi_reduction <add>, %236, %cst_154 [1] : vector<48x32xf32> to vector<48xf32>
    %238 = vector.shape_cast %237 : vector<48xf32> to vector<48x1xf32>
    %cst_155 = arith.constant 3.200000e+01 : f32
    %239 = vector.broadcast %cst_155 : f32 to vector<48x1xf32>
    %240 = arith.divf %238, %239 : vector<48x1xf32>
    %241 = vector.broadcast %233 : vector<48x1xf32> to vector<48x32xf32>
    %242 = arith.subf %227, %241 : vector<48x32xf32>
    %cst_156 = arith.constant 9.99999974E-6 : f32
    %243 = vector.broadcast %cst_156 : f32 to vector<48x1xf32>
    %244 = arith.addf %240, %243 : vector<48x1xf32>
    %245 = math.rsqrt %244 : vector<48x1xf32>
    %246 = vector.broadcast %245 : vector<48x1xf32> to vector<48x32xf32>
    %247 = arith.mulf %242, %246 : vector<48x32xf32>
    %248 = vector.broadcast %228 : vector<1x32xf32> to vector<48x32xf32>
    %249 = arith.mulf %247, %248 : vector<48x32xf32>
    %250 = vector.broadcast %229 : vector<1x32xf32> to vector<48x32xf32>
    %251 = arith.addf %249, %250 : vector<48x32xf32>
    %c0_157 = arith.constant 0 : index
    %c0_158 = arith.constant 0 : index
    %252 = vector.load %arg19[%c0_157, %c0_158] : memref<32x128xbf16, #tpu.memory_space<vmem>>, vector<32x128xbf16>
    %c0_159 = arith.constant 0 : index
    %c0_160 = arith.constant 0 : index
    %253 = vector.load %arg20[%c0_159, %c0_160] : memref<1x128xf32, #tpu.memory_space<vmem>>, vector<1x128xf32>
    %254 = arith.truncf %251 : vector<48x32xf32> to vector<48x32xbf16>
    %cst_161 = arith.constant dense<0.000000e+00> : vector<48x128xf32>
    %255 = tpu.matmul %254, %252, %cst_161 {dimension_numbers = #tpu.dot_dimension_numbers<[1], [0], [0], [1], [0, 0, 1, 1], [], []>} : vector<48x32xbf16>, vector<32x128xbf16>, vector<48x128xf32> -> vector<48x128xf32>
    %256 = vector.broadcast %253 : vector<1x128xf32> to vector<48x128xf32>
    %257 = arith.addf %255, %256 : vector<48x128xf32>
    %cst_162 = arith.constant 0.000000e+00 : f32
    %258 = vector.broadcast %cst_162 : f32 to vector<48x128xf32>
    %259 = arith.maximumf %257, %258 : vector<48x128xf32>
    %c0_163 = arith.constant 0 : index
    %c0_164 = arith.constant 0 : index
    %260 = vector.load %arg21[%c0_163, %c0_164] : memref<128x32xbf16, #tpu.memory_space<vmem>>, vector<128x32xbf16>
    %c0_165 = arith.constant 0 : index
    %c0_166 = arith.constant 0 : index
    %261 = vector.load %arg22[%c0_165, %c0_166] : memref<1x32xf32, #tpu.memory_space<vmem>>, vector<1x32xf32>
    %262 = arith.truncf %259 : vector<48x128xf32> to vector<48x128xbf16>
    %cst_167 = arith.constant dense<0.000000e+00> : vector<48x32xf32>
    %263 = tpu.matmul %262, %260, %cst_167 {dimension_numbers = #tpu.dot_dimension_numbers<[1], [0], [0], [1], [0, 0, 1, 1], [], []>} : vector<48x128xbf16>, vector<128x32xbf16>, vector<48x32xf32> -> vector<48x32xf32>
    %264 = vector.broadcast %261 : vector<1x32xf32> to vector<48x32xf32>
    %265 = arith.addf %263, %264 : vector<48x32xf32>
    %266 = arith.addf %251, %265 : vector<48x32xf32>
    %c0_168 = arith.constant 0 : index
    %c0_169 = arith.constant 0 : index
    %267 = vector.load %arg23[%c0_168, %c0_169] : memref<1x32xf32, #tpu.memory_space<vmem>>, vector<1x32xf32>
    %c0_170 = arith.constant 0 : index
    %c0_171 = arith.constant 0 : index
    %268 = vector.load %arg24[%c0_170, %c0_171] : memref<1x32xf32, #tpu.memory_space<vmem>>, vector<1x32xf32>
    %cst_172 = arith.constant dense<0.000000e+00> : vector<48xf32>
    %269 = vector.multi_reduction <add>, %266, %cst_172 [1] : vector<48x32xf32> to vector<48xf32>
    %270 = vector.shape_cast %269 : vector<48xf32> to vector<48x1xf32>
    %cst_173 = arith.constant 3.200000e+01 : f32
    %271 = vector.broadcast %cst_173 : f32 to vector<48x1xf32>
    %272 = arith.divf %270, %271 : vector<48x1xf32>
    %273 = vector.broadcast %272 : vector<48x1xf32> to vector<48x32xf32>
    %274 = arith.subf %266, %273 : vector<48x32xf32>
    %275 = arith.mulf %274, %274 : vector<48x32xf32>
    %cst_174 = arith.constant dense<0.000000e+00> : vector<48xf32>
    %276 = vector.multi_reduction <add>, %275, %cst_174 [1] : vector<48x32xf32> to vector<48xf32>
    %277 = vector.shape_cast %276 : vector<48xf32> to vector<48x1xf32>
    %cst_175 = arith.constant 3.200000e+01 : f32
    %278 = vector.broadcast %cst_175 : f32 to vector<48x1xf32>
    %279 = arith.divf %277, %278 : vector<48x1xf32>
    %280 = vector.broadcast %272 : vector<48x1xf32> to vector<48x32xf32>
    %281 = arith.subf %266, %280 : vector<48x32xf32>
    %cst_176 = arith.constant 9.99999974E-6 : f32
    %282 = vector.broadcast %cst_176 : f32 to vector<48x1xf32>
    %283 = arith.addf %279, %282 : vector<48x1xf32>
    %284 = math.rsqrt %283 : vector<48x1xf32>
    %285 = vector.broadcast %284 : vector<48x1xf32> to vector<48x32xf32>
    %286 = arith.mulf %281, %285 : vector<48x32xf32>
    %287 = vector.broadcast %267 : vector<1x32xf32> to vector<48x32xf32>
    %288 = arith.mulf %286, %287 : vector<48x32xf32>
    %289 = vector.broadcast %268 : vector<1x32xf32> to vector<48x32xf32>
    %290 = arith.addf %288, %289 : vector<48x32xf32>
    %c0_177 = arith.constant 0 : index
    %c0_178 = arith.constant 0 : index
    %291 = vector.load %arg25[%c0_177, %c0_178] : memref<32x128xbf16, #tpu.memory_space<vmem>>, vector<32x128xbf16>
    %292 = arith.truncf %36 : vector<48x32xf32> to vector<48x32xbf16>
    %cst_179 = arith.constant dense<0.000000e+00> : vector<48x128xf32>
    %293 = tpu.matmul %292, %291, %cst_179 {dimension_numbers = #tpu.dot_dimension_numbers<[1], [0], [0], [1], [0, 0, 1, 1], [], []>} : vector<48x32xbf16>, vector<32x128xbf16>, vector<48x128xf32> -> vector<48x128xf32>
    %c0_180 = arith.constant 0 : index
    %c0_181 = arith.constant 0 : index
    %294 = vector.load %arg26[%c0_180, %c0_181] : memref<32x128xbf16, #tpu.memory_space<vmem>>, vector<32x128xbf16>
    %295 = arith.truncf %290 : vector<48x32xf32> to vector<48x32xbf16>
    %cst_182 = arith.constant dense<0.000000e+00> : vector<48x128xf32>
    %296 = tpu.matmul %295, %294, %cst_182 {dimension_numbers = #tpu.dot_dimension_numbers<[1], [0], [0], [1], [0, 0, 1, 1], [], []>} : vector<48x32xbf16>, vector<32x128xbf16>, vector<48x128xf32> -> vector<48x128xf32>
    %297 = arith.addf %293, %296 : vector<48x128xf32>
    %cst_183 = arith.constant 0.000000e+00 : f32
    %298 = vector.broadcast %cst_183 : f32 to vector<48x128xf32>
    %299 = arith.maximumf %297, %298 : vector<48x128xf32>
    %300 = arith.mulf %299, %299 : vector<48x128xf32>
    %cst_184 = arith.constant dense<0.000000e+00> : vector<48xf32>
    %301 = vector.multi_reduction <add>, %300, %cst_184 [1] : vector<48x128xf32> to vector<48xf32>
    %302 = vector.shape_cast %301 : vector<48xf32> to vector<48x1xf32>
    %303 = math.sqrt %302 : vector<48x1xf32>
    %cst_185 = arith.constant 9.99999996E-13 : f32
    %304 = vector.broadcast %cst_185 : f32 to vector<48x1xf32>
    %305 = arith.maximumf %303, %304 : vector<48x1xf32>
    %306 = tpu.reciprocal %305 {approx = true} : vector<48x1xf32> -> vector<48x1xf32>
    %307 = vector.broadcast %306 : vector<48x1xf32> to vector<48x128xf32>
    %308 = arith.mulf %299, %307 : vector<48x128xf32>
    %c0_186 = arith.constant 0 : index
    %c0_187 = arith.constant 0 : index
    %309 = vector.load %arg27[%c0_186, %c0_187] : memref<128x8xbf16, #tpu.memory_space<vmem>>, vector<128x8xbf16>
    %c0_188 = arith.constant 0 : index
    %c0_189 = arith.constant 0 : index
    %310 = vector.load %arg28[%c0_188, %c0_189] : memref<1x8xf32, #tpu.memory_space<vmem>>, vector<1x8xf32>
    %311 = arith.truncf %308 : vector<48x128xf32> to vector<48x128xbf16>
    %cst_190 = arith.constant dense<0.000000e+00> : vector<48x8xf32>
    %312 = tpu.matmul %311, %309, %cst_190 {dimension_numbers = #tpu.dot_dimension_numbers<[1], [0], [0], [1], [0, 0, 1, 1], [], []>} : vector<48x128xbf16>, vector<128x8xbf16>, vector<48x8xf32> -> vector<48x8xf32>
    %313 = vector.broadcast %310 : vector<1x8xf32> to vector<48x8xf32>
    %314 = arith.addf %312, %313 : vector<48x8xf32>
    %cst_191 = arith.constant dense<0xFF800000> : vector<48xf32>
    %315 = vector.multi_reduction <maximumf>, %314, %cst_191 [1] : vector<48x8xf32> to vector<48xf32>
    %316 = vector.shape_cast %315 : vector<48xf32> to vector<48x1xf32>
    %317 = vector.broadcast %316 : vector<48x1xf32> to vector<48x8xf32>
    %318 = arith.subf %314, %317 : vector<48x8xf32>
    %319 = math.exp %318 : vector<48x8xf32>
    %cst_192 = arith.constant dense<0.000000e+00> : vector<48xf32>
    %320 = vector.multi_reduction <add>, %319, %cst_192 [1] : vector<48x8xf32> to vector<48xf32>
    %321 = vector.shape_cast %320 : vector<48xf32> to vector<48x1xf32>
    %322 = tpu.reciprocal %321 {approx = true} : vector<48x1xf32> -> vector<48x1xf32>
    %323 = vector.broadcast %322 : vector<48x1xf32> to vector<48x8xf32>
    %324 = arith.mulf %319, %323 : vector<48x8xf32>
    %cst_193 = arith.constant 1.000000e+00 : f32
    %325 = vector.broadcast %cst_193 : f32 to vector<48x1xf32>
    %cst_194 = arith.constant dense<0.000000e+00> : vector<8x1xf32>
    %326 = tpu.matmul %324, %325, %cst_194 {dimension_numbers = #tpu.dot_dimension_numbers<[0], [0], [1], [1], [0, 1, 1, 1], [], []>} : vector<48x8xf32>, vector<48x1xf32>, vector<8x1xf32> -> vector<8x1xf32>
    %327 = arith.truncf %324 : vector<48x8xf32> to vector<48x8xbf16>
    %328 = arith.truncf %308 : vector<48x128xf32> to vector<48x128xbf16>
    %cst_195 = arith.constant dense<0.000000e+00> : vector<8x128xf32>
    %329 = tpu.matmul %327, %328, %cst_195 {dimension_numbers = #tpu.dot_dimension_numbers<[0], [0], [1], [1], [0, 1, 1, 1], [], []>} : vector<48x8xbf16>, vector<48x128xbf16>, vector<8x128xf32> -> vector<8x128xf32>
    %c0_196 = arith.constant 0 : index
    %c0_197 = arith.constant 0 : index
    %330 = vector.load %arg29[%c0_196, %c0_197] : memref<8x128xf32, #tpu.memory_space<vmem>>, vector<8x128xf32>
    %331 = vector.broadcast %326 : vector<8x1xf32> to vector<8x128xf32>
    %332 = arith.mulf %331, %330 : vector<8x128xf32>
    %333 = arith.subf %329, %332 : vector<8x128xf32>
    %334 = arith.mulf %333, %333 : vector<8x128xf32>
    %cst_198 = arith.constant dense<0.000000e+00> : vector<8xf32>
    %335 = vector.multi_reduction <add>, %334, %cst_198 [1] : vector<8x128xf32> to vector<8xf32>
    %336 = vector.shape_cast %335 : vector<8xf32> to vector<8x1xf32>
    %337 = math.sqrt %336 : vector<8x1xf32>
    %cst_199 = arith.constant 9.99999996E-13 : f32
    %338 = vector.broadcast %cst_199 : f32 to vector<8x1xf32>
    %339 = arith.maximumf %337, %338 : vector<8x1xf32>
    %340 = tpu.reciprocal %339 {approx = true} : vector<8x1xf32> -> vector<8x1xf32>
    %341 = vector.broadcast %340 : vector<8x1xf32> to vector<8x128xf32>
    %342 = arith.mulf %333, %341 : vector<8x128xf32>
    %343 = arith.mulf %342, %342 : vector<8x128xf32>
    %cst_200 = arith.constant dense<0.000000e+00> : vector<8xf32>
    %344 = vector.multi_reduction <add>, %343, %cst_200 [1] : vector<8x128xf32> to vector<8xf32>
    %345 = vector.shape_cast %344 : vector<8xf32> to vector<8x1xf32>
    %cst_201 = arith.constant dense<0.000000e+00> : vector<1xf32>
    %346 = vector.multi_reduction <add>, %345, %cst_201 [0] : vector<8x1xf32> to vector<1xf32>
    %347 = vector.shape_cast %346 : vector<1xf32> to vector<1x1xf32>
    %348 = math.sqrt %347 : vector<1x1xf32>
    %cst_202 = arith.constant 9.99999996E-13 : f32
    %349 = vector.broadcast %cst_202 : f32 to vector<1x1xf32>
    %350 = arith.maximumf %348, %349 : vector<1x1xf32>
    %351 = tpu.reciprocal %350 {approx = true} : vector<1x1xf32> -> vector<1x1xf32>
    %352 = vector.broadcast %351 : vector<1x1xf32> to vector<8x128xf32>
    %353 = arith.mulf %342, %352 : vector<8x128xf32>
    %c0_203 = arith.constant 0 : index
    %c0_204 = arith.constant 0 : index
    %c0_205 = arith.constant 0 : index
    %354 = vector.load %arg30[%c0_203, %c0_204, %c0_205] : memref<1x8x128xf32, #tpu.memory_space<vmem>>, vector<1x8x128xf32>
    %355 = vector.shape_cast %354 : vector<1x8x128xf32> to vector<8x128xf32>
    %356 = vector.shape_cast %353 : vector<8x128xf32> to vector<1x8x128xf32>
    tpu.vector_store %arg30[%c0_203, %c0_204, %c0_205], %356 {strides = array<i32>} : memref<1x8x128xf32, #tpu.memory_space<vmem>>, vector<1x8x128xf32>,
    return
  }
  func.func @transform_0(%arg0: i32) -> (i32, i32, i32) {
    %c0_i32 = arith.constant 0 : i32
    %c0_i32_0 = arith.constant 0 : i32
    %c0_i32_1 = arith.constant 0 : i32
    return %arg0, %c0_i32, %c0_i32_0 : i32, i32, i32
  }
  func.func @transform_1(%arg0: i32) -> (i32, i32) {
    %c0_i32 = arith.constant 0 : i32
    %c0_i32_0 = arith.constant 0 : i32
    %c0_i32_1 = arith.constant 0 : i32
    return %c0_i32, %c0_i32_0 : i32, i32
  }
  func.func @transform_2(%arg0: i32) -> (i32, i32) {
    %c0_i32 = arith.constant 0 : i32
    %c0_i32_0 = arith.constant 0 : i32
    %c0_i32_1 = arith.constant 0 : i32
    return %c0_i32, %c0_i32_0 : i32, i32
  }
  func.func @transform_3(%arg0: i32) -> (i32, i32) {
    %c0_i32 = arith.constant 0 : i32
    %c0_i32_0 = arith.constant 0 : i32
    %c0_i32_1 = arith.constant 0 : i32
    return %c0_i32, %c0_i32_0 : i32, i32
  }
  func.func @transform_4(%arg0: i32) -> (i32, i32) {
    %c0_i32 = arith.constant 0 : i32
    %c0_i32_0 = arith.constant 0 : i32
    %c0_i32_1 = arith.constant 0 : i32
    return %c0_i32, %c0_i32_0 : i32, i32
  }
  func.func @transform_5(%arg0: i32) -> (i32, i32) {
    %c0_i32 = arith.constant 0 : i32
    %c0_i32_0 = arith.constant 0 : i32
    %c0_i32_1 = arith.constant 0 : i32
    return %c0_i32, %c0_i32_0 : i32, i32
  }
  func.func @transform_6(%arg0: i32) -> (i32, i32) {
    %c0_i32 = arith.constant 0 : i32
    %c0_i32_0 = arith.constant 0 : i32
    %c0_i32_1 = arith.constant 0 : i32
    return %c0_i32, %c0_i32_0 : i32, i32
  }
  func.func @transform_7(%arg0: i32) -> (i32, i32) {
    %c0_i32 = arith.constant 0 : i32
    %c0_i32_0 = arith.constant 0 : i32
    %c0_i32_1 = arith.constant 0 : i32
    return %c0_i32, %c0_i32_0 : i32, i32
  }
  func.func @transform_8(%arg0: i32) -> (i32, i32, i32) {
    %c0_i32 = arith.constant 0 : i32
    %c0_i32_0 = arith.constant 0 : i32
    %c0_i32_1 = arith.constant 0 : i32
    %c0_i32_2 = arith.constant 0 : i32
    return %c0_i32, %c0_i32_0, %c0_i32_1 : i32, i32, i32
  }
  func.func @transform_9(%arg0: i32) -> (i32, i32, i32) {
    %c0_i32 = arith.constant 0 : i32
    %c0_i32_0 = arith.constant 0 : i32
    %c0_i32_1 = arith.constant 0 : i32
    %c0_i32_2 = arith.constant 0 : i32
    return %c0_i32, %c0_i32_0, %c0_i32_1 : i32, i32, i32
  }
  func.func @transform_10(%arg0: i32) -> (i32, i32, i32) {
    %c0_i32 = arith.constant 0 : i32
    %c0_i32_0 = arith.constant 0 : i32
    %c0_i32_1 = arith.constant 0 : i32
    %c0_i32_2 = arith.constant 0 : i32
    return %c0_i32, %c0_i32_0, %c0_i32_1 : i32, i32, i32
  }
  func.func @transform_11(%arg0: i32) -> (i32, i32, i32) {
    %c0_i32 = arith.constant 0 : i32
    %c0_i32_0 = arith.constant 0 : i32
    %c0_i32_1 = arith.constant 0 : i32
    %c0_i32_2 = arith.constant 0 : i32
    return %c0_i32, %c0_i32_0, %c0_i32_1 : i32, i32, i32
  }
  func.func @transform_12(%arg0: i32) -> (i32, i32, i32) {
    %c0_i32 = arith.constant 0 : i32
    %c0_i32_0 = arith.constant 0 : i32
    %c0_i32_1 = arith.constant 0 : i32
    %c0_i32_2 = arith.constant 0 : i32
    return %c0_i32, %c0_i32_0, %c0_i32_1 : i32, i32, i32
  }
  func.func @transform_13(%arg0: i32) -> (i32, i32, i32) {
    %c0_i32 = arith.constant 0 : i32
    %c0_i32_0 = arith.constant 0 : i32
    %c0_i32_1 = arith.constant 0 : i32
    %c0_i32_2 = arith.constant 0 : i32
    return %c0_i32, %c0_i32_0, %c0_i32_1 : i32, i32, i32
  }
  func.func @transform_14(%arg0: i32) -> (i32, i32, i32) {
    %c0_i32 = arith.constant 0 : i32
    %c0_i32_0 = arith.constant 0 : i32
    %c0_i32_1 = arith.constant 0 : i32
    %c0_i32_2 = arith.constant 0 : i32
    return %c0_i32, %c0_i32_0, %c0_i32_1 : i32, i32, i32
  }
  func.func @transform_15(%arg0: i32) -> (i32, i32) {
    %c0_i32 = arith.constant 0 : i32
    %c0_i32_0 = arith.constant 0 : i32
    %c0_i32_1 = arith.constant 0 : i32
    return %c0_i32, %c0_i32_0 : i32, i32
  }
  func.func @transform_16(%arg0: i32) -> (i32, i32) {
    %c0_i32 = arith.constant 0 : i32
    %c0_i32_0 = arith.constant 0 : i32
    %c0_i32_1 = arith.constant 0 : i32
    return %c0_i32, %c0_i32_0 : i32, i32
  }
  func.func @transform_17(%arg0: i32) -> (i32, i32) {
    %c0_i32 = arith.constant 0 : i32
    %c0_i32_0 = arith.constant 0 : i32
    %c0_i32_1 = arith.constant 0 : i32
    return %c0_i32, %c0_i32_0 : i32, i32
  }
  func.func @transform_18(%arg0: i32) -> (i32, i32) {
    %c0_i32 = arith.constant 0 : i32
    %c0_i32_0 = arith.constant 0 : i32
    %c0_i32_1 = arith.constant 0 : i32
    return %c0_i32, %c0_i32_0 : i32, i32
  }
  func.func @transform_19(%arg0: i32) -> (i32, i32) {
    %c0_i32 = arith.constant 0 : i32
    %c0_i32_0 = arith.constant 0 : i32
    %c0_i32_1 = arith.constant 0 : i32
    return %c0_i32, %c0_i32_0 : i32, i32
  }
  func.func @transform_20(%arg0: i32) -> (i32, i32) {
    %c0_i32 = arith.constant 0 : i32
    %c0_i32_0 = arith.constant 0 : i32
    %c0_i32_1 = arith.constant 0 : i32
    return %c0_i32, %c0_i32_0 : i32, i32
  }
  func.func @transform_21(%arg0: i32) -> (i32, i32) {
    %c0_i32 = arith.constant 0 : i32
    %c0_i32_0 = arith.constant 0 : i32
    %c0_i32_1 = arith.constant 0 : i32
    return %c0_i32, %c0_i32_0 : i32, i32
  }
  func.func @transform_22(%arg0: i32) -> (i32, i32) {
    %c0_i32 = arith.constant 0 : i32
    %c0_i32_0 = arith.constant 0 : i32
    %c0_i32_1 = arith.constant 0 : i32
    return %c0_i32, %c0_i32_0 : i32, i32
  }
  func.func @transform_23(%arg0: i32) -> (i32, i32) {
    %c0_i32 = arith.constant 0 : i32
    %c0_i32_0 = arith.constant 0 : i32
    %c0_i32_1 = arith.constant 0 : i32
    return %c0_i32, %c0_i32_0 : i32, i32
  }
  func.func @transform_24(%arg0: i32) -> (i32, i32) {
    %c0_i32 = arith.constant 0 : i32
    %c0_i32_0 = arith.constant 0 : i32
    %c0_i32_1 = arith.constant 0 : i32
    return %c0_i32, %c0_i32_0 : i32, i32
  }
  func.func @transform_25(%arg0: i32) -> (i32, i32) {
    %c0_i32 = arith.constant 0 : i32
    %c0_i32_0 = arith.constant 0 : i32
    %c0_i32_1 = arith.constant 0 : i32
    return %c0_i32, %c0_i32_0 : i32, i32
  }
  func.func @transform_26(%arg0: i32) -> (i32, i32) {
    %c0_i32 = arith.constant 0 : i32
    %c0_i32_0 = arith.constant 0 : i32
    %c0_i32_1 = arith.constant 0 : i32
    return %c0_i32, %c0_i32_0 : i32, i32
  }
  func.func @transform_27(%arg0: i32) -> (i32, i32) {
    %c0_i32 = arith.constant 0 : i32
    %c0_i32_0 = arith.constant 0 : i32
    %c0_i32_1 = arith.constant 0 : i32
    return %c0_i32, %c0_i32_0 : i32, i32
  }
  func.func @transform_28(%arg0: i32) -> (i32, i32) {
    %c0_i32 = arith.constant 0 : i32
    %c0_i32_0 = arith.constant 0 : i32
    %c0_i32_1 = arith.constant 0 : i32
    return %c0_i32, %c0_i32_0 : i32, i32
  }
  func.func @transform_29(%arg0: i32) -> (i32, i32, i32) {
    %c0_i32 = arith.constant 0 : i32
    %c0_i32_0 = arith.constant 0 : i32
    %c0_i32_1 = arith.constant 0 : i32
    return %arg0, %c0_i32, %c0_i32_0 : i32, i32, i32
  }
}

</mosaic_0001>

<bundles_post_ra>
// kernel: _lambda_.3
= control target key start
LH: loop header
LB: loop body
LE: loop exit
PB: predicated region body
PF: predicated region fallthrough
CT: control target
= control target key end

     0   :  { %11 = vsyncpa [#allocation4], 0  ;;  %s1015_s21 = smov 0   ;;  %s1096_s0 = inlined_call_operand.vmem [shape: f32[2,1024], index: 0, kind: input, shape index: {}]   ;;  %s1097_s1 = inlined_call_operand.vmem [shape: bf16[1024,32], index: 1, kind: input, shape index: {}]   ;;  %s1098_s2 = inlined_call_operand.vmem [shape: f32[1,32], index: 2, kind: input, shape index: {}]   ;;  %s1099_s3 = inlined_call_operand.vmem [shape: f32[1,32], index: 3, kind: input, shape index: {}]   ;;  %s1100_s4 = inlined_call_operand.vmem [shape: bf16[32,32], index: 4, kind: input, shape index: {}]   ;;  %s1101_s5 = inlined_call_operand.vmem [shape: f32[1,32], index: 5, kind: input, shape index: {}]   ;;  %s1102_s6 = inlined_call_operand.hbm [shape: f32[2,32], index: 6, kind: output, shape index: {}]  }
   0x1 LB: > { %s1021_s22 = sadd.s32 4294967295, %s976_s21   ;;  %p733_p0 = scmp.ge.s32.totalorder %s976_s21, 1  ;;  %s976_s21 = sphi %s1015_s21, %s17_s21  }
   0x2   : > { %p220_p1 = scmp.lt.s32.totalorder %s976_s21, 3 }
   0x4   : > { %p221_p2 = pnand %p733_p0, %p220_p1 }
   0x5   : > { %s734_s23 = sshll.u32 (!%p221_p2), %s1021_s22, 2  ;;  %s736_s24 = sshll.u32 (!%p221_p2), %s1021_s22, 6 }
   0x6   : > { %224 = sbr.rel (%p221_p2) target bundleno = 373 (0x175), region = 44  ;;  %p251_p3 = scmp.lt.s32.totalorder (!%p221_p2), %s734_s23, 7 }
   0x7   : > { %p257_p4 = scmp.lt.s32.totalorder (!%p221_p2), %s736_s24, 127  ;;  %p738_p5 = scmp.ne.s32.totalorder (!%p221_p2), %s1021_s22, 0 }
   0xb   : > { %s1104_s23 = smov (!%p251_p3, %s734_s23), 7  ;;  %s1106_s24 = smov (!%p257_p4, %s736_s24), 127 }
   0xc   : > { %s735_s25 = sshll.u32 %s1104_s23, 1  ;;  %s737_s29 = sshll.u32 %s1106_s24, 2 }
   0xd   : > { %s1030_s28 = scalar_lea.vmem %s1096_s0, %s735_s25  ;;  %s1035_s8 = scalar_lea.vmem %s1097_s1, %s737_s29 }
   0xe   : > { %266 = sbr.rel (%p738_p5) target bundleno = 21 (0x15), region = 48 }
  0x13   : > { %vm267_vm0 = vcmask 254976   ;;  %v978_v0 = vmov 0.0  }
  0x14   : > { %268 = vst.msk [vmem:[#allocation2] sm:$0x3] %vm267_vm0, %v978_v0 }
  0x15 PF: > { %v888_v1 = vld [vmem:[%s1035_s8 + $0x38] sm:$0xff]  ;;  %v887_v5 = vld [vmem:[%s1035_s8 + $0x30] sm:$0xff]  ;;  %v886_v9 = vld [vmem:[%s1035_s8 + $0x28] sm:$0xff]  ;;  %vm594_vm1 = vcmask 254976   ;;  %p867_p6 = scmp.ne.s32.totalorder %s1021_s22, 1 }
  0x16   : > { %v896_v2 = vld [vmem:[%s1035_s8 + $0x78] sm:$0xff]  ;;  %541 = vmatpush.bf16.msra.mxu0 %v888_v1  ;;  %v895_v6 = vld [vmem:[%s1035_s8 + $0x70] sm:$0xff]  ;;  %v894_v10 = vld [vmem:[%s1035_s8 + $0x68] sm:$0xff] }
  0x17   : > { %v904_v3 = vld [vmem:[%s1035_s8 + $0xb8] sm:$0xff]  ;;  %554 = vmatpush.bf16.msra.mxu1 %v896_v2  ;;  %v903_v7 = vld [vmem:[%s1035_s8 + $0xb0] sm:$0xff]  ;;  %v902_v11 = vld [vmem:[%s1035_s8 + $0xa8] sm:$0xff] }
  0x18   : > { %v912_v4 = vld [vmem:[%s1035_s8 + $0xf8] sm:$0xff]  ;;  %567 = vmatpush.bf16.msra.mxu2 %v904_v3  ;;  %v911_v8 = vld [vmem:[%s1035_s8 + $0xf0] sm:$0xff]  ;;  %v910_v12 = vld [vmem:[%s1035_s8 + $0xe8] sm:$0xff] }
  0x19   : > { %580 = vmatpush.bf16.msra.mxu3 %v912_v4  ;;  %v885_v13 = vld [vmem:[%s1035_s8 + $0x20] sm:$0xff]  ;;  %v884_v18 = vld [vmem:[%s1035_s8 + $0x18] sm:$0xff]  ;;  %v883_v22 = vld [vmem:[%s1035_s8 + $0x10] sm:$0xff] }
  0x1a   : > { %542 = vmatpush.bf16.msra.mxu0 %v887_v5  ;;  %v893_v14 = vld [vmem:[%s1035_s8 + $0x60] sm:$0xff]  ;;  %v892_v19 = vld [vmem:[%s1035_s8 + $0x58] sm:$0xff]  ;;  %v891_v23 = vld [vmem:[%s1035_s8 + $0x50] sm:$0xff] }
  0x1b   : > { %555 = vmatpush.bf16.msra.mxu1 %v895_v6  ;;  %v270_v15 = vld [vmem:[%s1030_s28] sm:$0xff]  ;;  %v900_v20 = vld [vmem:[%s1035_s8 + $0x98] sm:$0xff]  ;;  %v899_v24 = vld [vmem:[%s1035_s8 + $0x90] sm:$0xff] }
  0x1c   : > { %568 = vmatpush.bf16.msra.mxu2 %v903_v7  ;;  %v901_v16 = vld [vmem:[%s1035_s8 + $0xa0] sm:$0xff]  ;;  %272 = vst [vmem:[#allocation1] ss:$4 sm:$0xff] %v270_v15  ;;  %v908_v21 = vld [vmem:[%s1035_s8 + $0xd8] sm:$0xff]  ;;  %v907_v25 = vld [vmem:[%s1035_s8 + $0xd0] sm:$0xff] }
  0x1d   : > { %581 = vmatpush.bf16.msra.mxu3 %v911_v8  ;;  %v909_v17 = vld [vmem:[%s1035_s8 + $0xe0] sm:$0xff]  ;;  %v882_v26 = vld [vmem:[%s1035_s8 + $0x8] sm:$0xff] }
  0x1e   : > { %543 = vmatpush.bf16.msra.mxu0 %v886_v9  ;;  %v890_v27 = vld [vmem:[%s1035_s8 + $0x48] sm:$0xff]  ;;  %v881_v30 = vld [vmem:[%s1035_s8] sm:$0xff] }
  0x1f   : > { %556 = vmatpush.bf16.msra.mxu1 %v894_v10  ;;  %v898_v28 = vld [vmem:[%s1035_s8 + $0x88] sm:$0xff]  ;;  %v889_v31 = vld [vmem:[%s1035_s8 + $0x40] sm:$0xff] }
  0x20   : > { %569 = vmatpush.bf16.msra.mxu2 %v902_v11  ;;  %v906_v29 = vld [vmem:[%s1035_s8 + $0xc8] sm:$0xff]  ;;  %v897_v32 = vld [vmem:[%s1035_s8 + $0x80] sm:$0xff] }
  0x21   : > { %582 = vmatpush.bf16.msra.mxu3 %v910_v12  ;;  %v905_v33 = vld [vmem:[%s1035_s8 + $0xc0] sm:$0xff]  ;;  %v269_v50 = vld [vmem:[#allocation2] sm:$0x3] }
  0x22   : > { %544 = vmatpush.bf16.msra.mxu0 %v885_v13 }
  0x23   : > { %557 = vmatpush.bf16.msra.mxu1 %v893_v14  ;;  %v273_v34 = vld.sshfl [vmem:[#allocation1] sm:$0xff pattern:$0x73625140]  ;;  %v274_v35 = vld.sshfl [vmem:[#allocation1 + $0x8] sm:$0xff pattern:$0x73625140] }
  0x24   : > { %570 = vmatpush.bf16.msra.mxu2 %v901_v16  ;;  %v275_v36 = vld.sshfl [vmem:[#allocation1 + $0x10] sm:$0xff pattern:$0x73625140]  ;;  %v276_v37 = vld.sshfl [vmem:[#allocation1 + $0x18] sm:$0xff pattern:$0x73625140]  ;;  %v281_v38 = vpack.c.bf16 %v273_v34, %v273_v34  ;;  %v282_v39 = vpack.c.bf16 %v274_v35, %v274_v35 }
  0x25   : > { %583 = vmatpush.bf16.msra.mxu3 %v909_v17  ;;  %v283_v40 = vpack.c.bf16 %v275_v36, %v275_v36  ;;  %v284_v41 = vpack.c.bf16 %v276_v37, %v276_v37 }
  0x26   : > { %545 = vmatpush.bf16.msra.mxu0 %v884_v18 }
  0x27   : > { %558 = vmatpush.bf16.msra.mxu1 %v892_v19 }
  0x28   : > { %571 = vmatpush.bf16.msra.mxu2 %v900_v20 }
  0x29   : > { %584 = vmatpush.bf16.msra.mxu3 %v908_v21 }
  0x2a   : > { %546 = vmatpush.bf16.msra.mxu0 %v883_v22 }
  0x2b   : > { %559 = vmatpush.bf16.msra.mxu1 %v891_v23 }
  0x2c   : > { %572 = vmatpush.bf16.msra.mxu2 %v899_v24 }
  0x2d   : > { %585 = vmatpush.bf16.msra.mxu3 %v907_v25 }
  0x2e   : > { %547 = vmatpush.bf16.msra.mxu0 %v882_v26 }
  0x2f   : > { %560 = vmatpush.bf16.msra.mxu1 %v890_v27 }
  0x30   : > { %573 = vmatpush.bf16.msra.mxu2 %v898_v28 }
  0x31   : > { %586 = vmatpush.bf16.msra.mxu3 %v906_v29 }
  0x32   : > { %548 = vmatpush.bf16.msra.mxu0 %v881_v30 }
  0x33   : > { %561 = vmatpush.bf16.msra.mxu1 %v889_v31 }
  0x34   : > { %574 = vmatpush.bf16.msra.mxu2 %v897_v32 }
  0x35   : > { %587 = vmatpush.bf16.msra.mxu3 %v905_v33  ;;  %549 = vmatmul.bf16.vlgmr.msra.gmra.mxu0 %v281_v38 }
  0x36   : > { %562 = vmatmul.bf16.vlgmr.msra.gmra.mxu1 %v282_v39 }
  0x37   : > { %575 = vmatmul.bf16.vlgmr.msra.gmra.mxu2 %v283_v40 }
  0x38   : > { %588 = vmatmul.bf16.vlgmr.msra.gmra.mxu3 %v284_v41 }
  0xb2   : > { %v550_v42 = vpop.f32.mrf.mxu0 }
  0xb3   : > { %v563_v43 = vpop.f32.mrf.mxu1 }
  0xb4   : > { %v564_v44 = vadd.f32 %v563_v43, %v550_v42 }
  0xba   : > { %v576_v45 = vpop.f32.mrf.mxu2  ;;  %v552_v48 = vpop.f32.mrf.mxu0 }
  0xbb   : > { %v589_v46 = vpop.f32.mrf.mxu3  ;;  %v577_v47 = vadd.f32 %v576_v45, %v564_v44  ;;  %v565_v49 = vpop.f32.mrf.mxu1 }
  0xbd   : > { %v590_v51 = vadd.f32 %v589_v46, %v577_v47 }
  0xbf   : > { %v593_v52 = vadd.f32 %v590_v51, %v269_v50  ;;  %599 = sbr.rel (%p867_p6) target bundleno = 368 (0x170), region = 52 }
  0xc1   : > { %595 = vst.msk [vmem:[#allocation2] sm:$0x3] %vm594_vm1, %v593_v52 }
  0xc2   : > { %v578_v53 = vpop.f32.mrf.mxu2 }
  0xc3   : > { %v591_v54 = vpop.f32.mrf.mxu3 }
  0xc4   : > { %v914_v55 = vld [vmem:[%s1100_s4 + $0x8] sm:$0xff]  ;;  %v931_v57 = vld [vmem:[%s1098_s2] ss:$0 sm:$0xff]  ;;  %vm632_vm2 = vcmask 261120  }
  0xc5   : > { %642 = vmatpush.bf16.msra.mxu0 %v914_v55  ;;  %v913_v58 = vld [vmem:[%s1100_s4] sm:$0xff] }
  0xc6   : > { %v932_v59 = vld [vmem:[%s1099_s3] ss:$0 sm:$0xff] }
  0xc7   : > { %v933_v63 = vld [vmem:[%s1101_s5] ss:$0 sm:$0xff] }
  0xc8   : > { %v600_v56 = vld [vmem:[#allocation2] sm:$0x3] }
  0xc9   : > { %v605_v60 = vmul.f32 %v931_v57, %v600_v56  ;;  %643 = vmatpush.bf16.msra.mxu0 %v913_v58 }
  0xcb   : > { %v610_v61 = vadd.f32 %v932_v59, %v605_v60 }
  0xcd   : > { %v611_v62 = vpack.c.bf16 %v610_v61, %v610_v61 }
  0xcf   : > { %876 = vmatmul.msk.bf16.vlgmr.msra.gmra.mxu0 %vm632_vm2, %v611_v62 }
 0x14c   : > { %v645_v0 = vpop.f32.mrf.mxu0 }
 0x14d   : > { %v646_v1 = vadd.f32 %v933_v63, %v645_v0 }
 0x14f   : > { %v649_v2 = vsub.f32 0.0, %v646_v1 }
 0x151   : > { %v650_v3 = vmul.f32 1.442695, %v649_v2 }
 0x153   : > { %934 = vpow2.f32 %v650_v3 }
 0x154   : > { %v647_v4 = vpop.f32.mrf.mxu0 }
 0x159   : > { %v935_v5 = vpop.eup %934 }
 0x15a   : > { %v652_v6 = vadd.f32 1.0, %v935_v5 }
 0x15c   : > { %936 = vrcp.f32 %v652_v6  ;;  %v664_v10 = vand.u32 2147483648, %v652_v6  ;;  %v662_v12 = vand.u32 2147483647, %v652_v6  ;;  %vm658_vm4 = vweird.f32 %v652_v6 }
 0x15e   : > { %v665_v14 = vor.u32 1.1754944e-38, %v664_v10  ;;  %vm663_vm6 = vcmp.eq.f32.partialorder %v662_v12, 8.507059e+37 }
 0x162   : > { %v937_v7 = vpop.eup %936 }
 0x163   : > { %v654_v8 = vmul.f32 %v937_v7, %v652_v6  ;;  %vm659_vm3 = vweird.f32 %v937_v7 }
 0x164   : > { %vm660_vm5 = vmor %vm658_vm4, %vm659_vm3 }
 0x165   : > { %v655_v9 = vsub.f32 1.0, %v654_v8 }
 0x167   : > { %v656_v11 = vmul.f32 %v937_v7, %v655_v9 }
 0x169   : > { %v657_v13 = vadd.f32 %v937_v7, %v656_v11 }
 0x16b   : > { %v661_v15 = vsel %vm660_vm5, %v937_v7, %v657_v13 }
 0x16c   : > { %v666_v16 = vsel %vm663_vm6, %v665_v14, %v661_v15 }
 0x16d   : > { %v668_v17 = vmul.f32 %v666_v16, %v610_v61 }
 0x16f   : > { %669 = vst.msk [vmem:[#allocation3] sm:$0x3] %vm594_vm1, %v668_v17 }
 0x170 PF: > { %p919_p7 = scmp.eq.s32.totalorder %s1021_s22, 1  ;;  %s979_s19 = smov [#allocation3]  }
 0x171   : > { %s676_s20 = sshll.u32 %s979_s19, 4  ;;  %s678_s25 = sshll.u32 %s1102_s6, 4  ;;  %s677_s20 = int_to_ptr.vmem [resolvable:$true] %s676_s20  ;;  %s679_s25 = int_to_ptr.hbm [resolvable:$true] %s678_s25 }
 0x172   : > { %916 = dma.vmem_to_hbm [thread:$0]  (%p919_p7), %s677_s20, 32, %s679_s25, [#allocation4]  }
 0x173   : > { %971 = dma.done.wait (%p919_p7), [#allocation4], 32  }
 0x174   : > { %973 = vsyncadd (%p919_p7), [#allocation4], 4294967264 }
 0x175 PF: > { %s17_s21 = sadd.s32 1, %s976_s21  }
 0x176   : > { %p14_p8 = scmp.ge.s32.totalorder %s17_s21, 4  }
 0x178   :  { %16 = sbr.rel (!%p14_p8) target bundleno = 1 (0x1), region = 82 }
 0x17d   :  { %692 = vsyncpa [#allocation4], 1 }
 0x17e   :  { %694 = vsyncpa [#allocation4 + $0x1], 1 }

// kernel: _lambda_.2
= control target key start
LH: loop header
LB: loop body
LE: loop exit
PB: predicated region body
PF: predicated region fallthrough
CT: control target
= control target key end

     0   :  { %s4496_s6 = smov 1   ;;  %s4497_s10 = smov 2   ;;  %s5302_s0 = inlined_call_operand.smem [shape: u32[30], index: -1, kind: input, shape index: {}] }
   0x1   :  { %s4536_s5 = sld [smem:[%s5302_s0]]   ;;  %s4498_s14 = smov 3  }
   0x2   :  { %s4541_s9 = sld [smem:[%s5302_s0 + %s4496_s6]]   ;;  %s4499_s18 = smov 4  }
   0x3   :  { %s4546_s13 = sld [smem:[%s5302_s0 + %s4497_s10]]   ;;  %s4500_s22 = smov 5  }
   0x4   :  { %s4551_s17 = sld [smem:[%s5302_s0 + %s4498_s14]]   ;;  %s4501_s26 = smov 6  }
   0x5   :  { %s4556_s21 = sld [smem:[%s5302_s0 + %s4499_s18]]   ;;  %s4502_s30 = smov 7  }
   0x6   :  { %s4561_s25 = sld [smem:[%s5302_s0 + %s4500_s22]]   ;;  %s4503_s4 = smov 8  }
   0x7   :  { %s4566_s29 = sld [smem:[%s5302_s0 + %s4501_s26]]   ;;  %s4504_s10 = smov 9  }
   0x8   :  { %s4571_s3 = sld [smem:[%s5302_s0 + %s4502_s30]]   ;;  %s4505_s15 = smov 10  }
   0x9   :  { %s4576_s8 = sld [smem:[%s5302_s0 + %s4503_s4]]   ;;  %s4506_s20 = smov 11  }
   0xa   :  { %s4581_s14 = sld [smem:[%s5302_s0 + %s4504_s10]]   ;;  %s4507_s26 = smov 12  }
   0xb   :  { %s4586_s19 = sld [smem:[%s5302_s0 + %s4505_s15]]   ;;  %s4508_s1 = smov 13  }
   0xc   :  { %s4591_s24 = sld [smem:[%s5302_s0 + %s4506_s20]]   ;;  %s4509_s7 = smov 14  }
   0xd   :  { %s4596_s30 = sld [smem:[%s5302_s0 + %s4507_s26]]   ;;  %s4510_s15 = smov 15  }
   0xe   :  { %s4601_s6 = sld [smem:[%s5302_s0 + %s4508_s1]]   ;;  %s4511_s22 = smov 16  }
   0xf   :  { %s4606_s12 = sld [smem:[%s5302_s0 + %s4509_s7]]   ;;  %s4512_s28 = smov 17  }
  0x10   :  { %s4611_s20 = sld [smem:[%s5302_s0 + %s4510_s15]]   ;;  %s4513_s7 = smov 18  }
  0x11   :  { %s4616_s27 = sld [smem:[%s5302_s0 + %s4511_s22]]   ;;  %s4514_s15 = smov 19  }
  0x12   :  { %s4621_s4 = sld [smem:[%s5302_s0 + %s4512_s28]]   ;;  %s4515_s22 = smov 20  }
  0x13   :  { %s4516_s28 = smov 21  }
  0x15   :  { %5308 = sst [smem:[#allocation2_spill]] %s4606_s12 }
  0x16   :  { %5309 = sst [smem:[#allocation3_spill]] %s4611_s20 }
  0x17   :  { %5310 = sst [smem:[#allocation4_spill]] %s4616_s27 }
  0x18   :  { %5311 = sst [smem:[#allocation5_spill]] %s4621_s4 }
  0x19   :  { %s4626_s12 = sld [smem:[%s5302_s0 + %s4513_s7]]   ;;  %s4517_s7 = smov 22  }
  0x1a   :  { %s4631_s20 = sld [smem:[%s5302_s0 + %s4514_s15]]   ;;  %s4518_s15 = smov 23  }
  0x1b   :  { %s4636_s27 = sld [smem:[%s5302_s0 + %s4515_s22]]   ;;  %s4519_s22 = smov 24  }
  0x1c   :  { %s4641_s4 = sld [smem:[%s5302_s0 + %s4516_s28]]   ;;  %s4520_s28 = smov 25  }
  0x1f   :  { %5312 = sst [smem:[#allocation6_spill]] %s4626_s12 }
  0x20   :  { %5313 = sst [smem:[#allocation7_spill]] %s4631_s20 }
  0x21   :  { %5314 = sst [smem:[#allocation8_spill]] %s4636_s27 }
  0x22   :  { %5315 = sst [smem:[#allocation9_spill]] %s4641_s4 }
  0x23   :  { %s4646_s12 = sld [smem:[%s5302_s0 + %s4517_s7]]   ;;  %s4521_s7 = smov 26  }
  0x24   :  { %s4651_s20 = sld [smem:[%s5302_s0 + %s4518_s15]]   ;;  %s4522_s15 = smov 27  }
  0x25   :  { %s4656_s27 = sld [smem:[%s5302_s0 + %s4519_s22]]   ;;  %s4523_s22 = smov 28  }
  0x26   :  { %s4661_s4 = sld [smem:[%s5302_s0 + %s4520_s28]]   ;;  %s4524_s28 = smov 29  }
  0x29   :  { %5316 = sst [smem:[#allocation10_spill]] %s4646_s12 }
  0x2a   :  { %5317 = sst [smem:[#allocation11_spill]] %s4651_s20 }
  0x2b   :  { %5318 = sst [smem:[#allocation12_spill]] %s4656_s27 }
  0x2c   :  { %5319 = sst [smem:[#allocation13_spill]] %s4661_s4 }
  0x2d   :  { %s4666_s12 = sld [smem:[%s5302_s0 + %s4521_s7]]   ;;  %s4683_s7 = smov 0  }
  0x2e   :  { %s4671_s20 = sld [smem:[%s5302_s0 + %s4522_s15]]  }
  0x2f   :  { %s4676_s27 = sld [smem:[%s5302_s0 + %s4523_s22]]  }
  0x30   :  { %s4681_s4 = sld [smem:[%s5302_s0 + %s4524_s28]]  }
  0x31 LB: > { %s3785_s10 = sadd.s32 4294967295, %s4494_s7   ;;  %p3789_p0 = scmp.ge.s32.totalorder %s4494_s7, 1  ;;  %s4494_s7 = sphi %s4683_s7, %s69_s7  }
  0x32   : > { %p817_p1 = scmp.lt.s32.totalorder %s4494_s7, 3 }
  0x34   : > { %p818_p2 = pnand %p3789_p0, %p817_p1 }
  0x35   : > { %p892_p3 = scmp.lt.s32.totalorder (!%p818_p2), %s3785_s10, 1  ;;  %s5320_s15 = sld [smem:[#allocation2_spill]] (!%p818_p2) }
  0x36   : > { %821 = sbr.rel (%p818_p2) target bundleno = 5788 (0x169c), region = 136  ;;  %s5321_s16 = sld [smem:[#allocation12_spill]] (!%p818_p2) }
  0x37   : > { %s5322_s18 = sld [smem:[#allocation3_spill]] (!%p818_p2) }
  0x38   : > { %s5323_s22 = sld [smem:[#allocation6_spill]] (!%p818_p2) }
  0x39   : > { %s5324_s23 = sld [smem:[#allocation4_spill]] (!%p818_p2) }
  0x3a   : > { %s5325_s26 = sld [smem:[#allocation5_spill]] (!%p818_p2) }
  0x3b   : > { %v4187_v0 = vld [vmem:[%s4541_s9 + $0x8] sm:$0xff]  ;;  %v4186_v1 = vld [vmem:[%s4541_s9] sm:$0xff]  ;;  %s5333_s10 = smov (!%p892_p3, %s3785_s10), 1  ;;  %vm927_vm0 = vcmask 261120   ;;  %v973_v5 = vld [vmem:[%s4546_s13 + $0x18] sm:$0xf] }
  0x3c   : > { %943 = vmatpush.bf16.msra.mxu0 %v4187_v0  ;;  %s4246_s0 = smul.u32 48, %s5333_s10  ;;  %v990_v6 = vunpack.c.l.b16 %v973_v5  ;;  %vm1008_vm1 = vcmask 1043456   ;;  %v4190_v15 = vld [vmem:[%s4546_s13 + $0x10] sm:$0xff]  ;;  %v4189_v16 = vld [vmem:[%s4546_s13 + $0x8] sm:$0xff]  ;;  %v4188_v17 = vld [vmem:[%s4546_s13] sm:$0xff]  ;;  %vm998_vm2 = vcmask 457728  }
  0x3d   : > { %v1048_v23 = vld [vmem:[%s4551_s17 + $0x18] sm:$0x3]  ;;  %vm1083_vm3 = vcmask 1041408   ;;  %v4193_v37 = vld [vmem:[%s4551_s17 + $0x10] sm:$0xff]  ;;  %v4192_v38 = vld [vmem:[%s4551_s17 + $0x8] sm:$0xff]  ;;  %vm1073_vm4 = vcmask 424960  }
  0x3e   : > { %s896_s11 = scalar_lea.vmem %s4536_s5, %s4246_s0  ;;  %v994_v7 = vpack.c.b16 %v990_v6, %v990_v6  ;;  %v1065_v24 = vunpack.c.l.b16 %v1048_v23  ;;  %v4191_v39 = vld [vmem:[%s4551_s17] sm:$0xff]  ;;  %v4196_v55 = vld [vmem:[%s4556_s21 + $0x10] sm:$0xff]  ;;  %v4195_v56 = vld [vmem:[%s4556_s21 + $0x8] sm:$0xff]  ;;  %vm1144_vm5 = vcmask 392192   ;;  %vm1195_vm6 = vcmask 130048   ;;  %s5326_s28 = sld [smem:[#allocation8_spill]] }
  0x3f   : > { %v902_v2 = vld [vmem:[%s896_s11] sm:$0xff]  ;;  %v903_v3 = vld [vmem:[%s896_s11 + $0x8] sm:$0xff]  ;;  %v904_v9 = vld [vmem:[%s896_s11 + $0x10] sm:$0xff]  ;;  %1159 = vmatpush.bf16.msra.mxu3 %v4196_v55  ;;  %vm1485_vm7 = vcmask 64512   ;;  %s5327_s1 = sld [smem:[#allocation7_spill]] }
  0x40   : > { %944 = vmatpush.bf16.msra.mxu0 %v4186_v1  ;;  %v912_v4 = vpack.c.bf16 %v903_v3, %v902_v2  ;;  %v1010_v8 = vsel %vm1008_vm1, %v994_v7, 0  ;;  %v905_v10 = vld [vmem:[%s896_s11 + $0x18] sm:$0xff]  ;;  %v906_v12 = vld [vmem:[%s896_s11 + $0x20] sm:$0xff]  ;;  %v907_v13 = vld [vmem:[%s896_s11 + $0x28] sm:$0xff]  ;;  %v1069_v26 = vpack.c.b16 %v1065_v24, %v1065_v24  ;;  %s5328_s2 = sld [smem:[#allocation9_spill]] }
  0x41   : > { %1016 = vmatpush.bf16.msra.mxu1 %v1010_v8  ;;  %v913_v11 = vpack.c.bf16 %v905_v10, %v904_v9  ;;  %v914_v14 = vpack.c.bf16 %v907_v13, %v906_v12  ;;  %v4194_v57 = vld [vmem:[%s4556_s21] sm:$0xff]  ;;  %s5329_s0 = sld [smem:[#allocation13_spill]] }
  0x42   : > { %v1085_v27 = vsel %vm1083_vm3, %v1069_v26, 0  ;;  %v4197_v63 = vld [vmem:[%s4561_s25] sm:$0xff]  ;;  %s5330_s11 = sld [smem:[#allocation10_spill]] }
  0x43   : > { %3800 = vmatmul.msk.bf16.vlgmr.msra.gmra.mxu0 %vm927_vm0, %v912_v4  ;;  %1091 = vmatpush.bf16.msra.mxu2 %v1085_v27 }
  0x44   : > { %1160 = vmatpush.bf16.msra.mxu3 %v4195_v56  ;;  %1212 = vmatpush.bf16.msrb.mxu0 %v4197_v63 }
  0x45   : > { %1017 = vmatpush.bf16.msra.mxu1 %v4190_v15  ;;  %v4198_v15 = vld [vmem:[%s4566_s29] sm:$0xff] }
  0x47   : > { %1092 = vmatpush.bf16.msra.mxu2 %v4193_v37 }
  0x48   : > { %1161 = vmatpush.bf16.msra.mxu3 %v4194_v57 }
  0x49   : > { %1018 = vmatpush.bf16.msra.mxu1 %v4189_v16 }
  0x4b   : > { %1093 = vmatpush.bf16.msra.mxu2 %v4192_v38 }
  0x4c   : > { %1262 = vmatpush.bf16.msrb.mxu3 %v4198_v15 }
  0x4d   : > { %1019 = vmatpush.bf16.msra.mxu1 %v4188_v17 }
  0x4f   : > { %1094 = vmatpush.bf16.msra.mxu2 %v4191_v39 }
  0x53   : > { %3801 = vmatmul.msk.bf16.gmra.mxu0 %vm927_vm0, %v913_v11 }
  0x63   : > { %3802 = vmatmul.msk.bf16.gmra.mxu0 %vm927_vm0, %v914_v14 }
  0xc0   : > { %v946_v18 = vpop.f32.mrf.mxu0 }
  0xc1   : > { %v961_v20 = vmax.f32 %v946_v18, 0.0 }
  0xc8   : > { %v948_v19 = vpop.f32.mrf.mxu0 }
  0xc9   : > { %v962_v21 = vmax.f32 %v948_v19, 0.0 }
  0xcb   : > { %v974_v22 = vpack.c.bf16 %v962_v21, %v961_v20 }
  0xcd   : > { %3815 = vmatmul.msk.bf16.vlgmr.msra.gmra.mxu1 %vm998_vm2, %v974_v22 }
  0xd0   : > { %v951_v25 = vpop.f32.mrf.mxu0 }
  0xd1   : > { %v963_v29 = vmax.f32 %v951_v25, 0.0 }
  0xd8   : > { %v953_v28 = vpop.f32.mrf.mxu0 }
  0xd9   : > { %v964_v30 = vmax.f32 %v953_v28, 0.0 }
  0xdb   : > { %v975_v31 = vpack.c.bf16 %v964_v30, %v963_v29 }
  0xdd   : > { %3816 = vmatmul.msk.bf16.gmra.mxu1 %vm998_vm2, %v975_v31  ;;  %v4199_v31 = vld [vmem:[%s4571_s3] sm:$0xff] }
  0xde   : > { %1312 = vmatpush.bf16.msrb.mxu1 %v4199_v31 }
  0xe0   : > { %v956_v32 = vpop.f32.mrf.mxu0 }
  0xe1   : > { %v965_v34 = vmax.f32 %v956_v32, 0.0 }
  0xe8   : > { %v958_v33 = vpop.f32.mrf.mxu0 }
  0xe9   : > { %v966_v35 = vmax.f32 %v958_v33, 0.0 }
  0xeb   : > { %v976_v36 = vpack.c.bf16 %v966_v35, %v965_v34 }
  0xed   : > { %3817 = vmatmul.msk.bf16.gmra.mxu1 %vm998_vm2, %v976_v36 }
 0x14a   : > { %v1021_v40 = vpop.f32.mrf.mxu1 }
 0x14b   : > { %v1036_v42 = vmax.f32 %v1021_v40, 0.0 }
 0x152   : > { %v1023_v41 = vpop.f32.mrf.mxu1 }
 0x153   : > { %v1037_v43 = vmax.f32 %v1023_v41, 0.0 }
 0x155   : > { %v1049_v44 = vpack.c.bf16 %v1037_v43, %v1036_v42 }
 0x157   : > { %3830 = vmatmul.msk.bf16.vlgmr.msra.gmra.mxu2 %vm1073_vm4, %v1049_v44 }
 0x15a   : > { %v1026_v45 = vpop.f32.mrf.mxu1 }
 0x15b   : > { %v1038_v47 = vmax.f32 %v1026_v45, 0.0 }
 0x162   : > { %v1028_v46 = vpop.f32.mrf.mxu1 }
 0x163   : > { %v1039_v48 = vmax.f32 %v1028_v46, 0.0 }
 0x165   : > { %v1050_v49 = vpack.c.bf16 %v1039_v48, %v1038_v47  ;;  %v4203_v47 = vld [vmem:[%s4581_s14 + $0x8] sm:$0xff] }
 0x166   : > { %1417 = vmatpush.bf16.msra.mxu0 %v4203_v47 }
 0x167   : > { %3831 = vmatmul.msk.bf16.gmra.mxu2 %vm1073_vm4, %v1050_v49 }
 0x16a   : > { %v1031_v50 = vpop.f32.mrf.mxu1 }
 0x16b   : > { %v1040_v52 = vmax.f32 %v1031_v50, 0.0 }
 0x172   : > { %v1033_v51 = vpop.f32.mrf.mxu1 }
 0x173   : > { %v1041_v53 = vmax.f32 %v1033_v51, 0.0 }
 0x175   : > { %v1051_v54 = vpack.c.bf16 %v1041_v53, %v1040_v52 }
 0x177   : > { %3832 = vmatmul.msk.bf16.gmra.mxu2 %vm1073_vm4, %v1051_v54 }
 0x1da   : > { %v1096_v58 = vpop.f32.mrf.mxu2 }
 0x1db   : > { %v1111_v60 = vmax.f32 %v1096_v58, 0.0  ;;  %v4201_v58 = vld [vmem:[%s4576_s8 + $0x8] sm:$0xff] }
 0x1dc   : > { %1373 = vmatpush.bf16.msrb.mxu2 %v4201_v58 }
 0x1e2   : > { %v1098_v59 = vpop.f32.mrf.mxu2 }
 0x1e3   : > { %v1112_v61 = vmax.f32 %v1098_v59, 0.0  ;;  %v4205_v59 = vld [vmem:[%s4586_s19 + $0x8] sm:$0xff] }
 0x1e5   : > { %v1123_v62 = vpack.c.bf16 %v1112_v61, %v1111_v60  ;;  %v4200_v60 = vld [vmem:[%s4576_s8] sm:$0xff] }
 0x1e6   : > { %v4202_v61 = vld [vmem:[%s4581_s14] sm:$0xff]  ;;  %1374 = vmatpush.bf16.msrb.mxu2 %v4200_v60 }
 0x1e7   : > { %3845 = vmatmul.msk.bf16.vlgmr.msra.gmra.mxu3 %vm1144_vm5, %v1123_v62  ;;  %v4204_v62 = vld [vmem:[%s4586_s19] sm:$0xff]  ;;  %1418 = vmatpush.bf16.msra.mxu0 %v4202_v61 }
 0x1e8   : > { %1461 = vmatpush.bf16.msra.mxu3 %v4205_v59 }
 0x1ea   : > { %v1101_v0 = vpop.f32.mrf.mxu2 }
 0x1eb   : > { %v1113_v2 = vmax.f32 %v1101_v0, 0.0 }
 0x1ec   : > { %1462 = vmatpush.bf16.msra.mxu3 %v4204_v62 }
 0x1f2   : > { %v1103_v1 = vpop.f32.mrf.mxu2 }
 0x1f3   : > { %v1114_v3 = vmax.f32 %v1103_v1, 0.0 }
 0x1f5   : > { %v1124_v4 = vpack.c.bf16 %v1114_v3, %v1113_v2 }
 0x1f7   : > { %3846 = vmatmul.msk.bf16.gmra.mxu3 %vm1144_vm5, %v1124_v4  ;;  %v4207_v4 = vld [vmem:[%s4576_s8 + $0x18] sm:$0xff] }
 0x1fa   : > { %v1106_v5 = vpop.f32.mrf.mxu2 }
 0x1fb   : > { %v1115_v7 = vmax.f32 %v1106_v5, 0.0  ;;  %v4209_v5 = vld [vmem:[%s4581_s14 + $0x18] sm:$0xff] }
 0x202   : > { %v1108_v6 = vpop.f32.mrf.mxu2 }
 0x203   : > { %v1116_v8 = vmax.f32 %v1108_v6, 0.0 }
 0x205   : > { %v1125_v9 = vpack.c.bf16 %v1116_v8, %v1115_v7  ;;  %v4206_v7 = vld [vmem:[%s4576_s8 + $0x10] sm:$0xff] }
 0x206   : > { %v4208_v8 = vld [vmem:[%s4581_s14 + $0x10] sm:$0xff] }
 0x207   : > { %3847 = vmatmul.msk.bf16.gmra.mxu3 %vm1144_vm5, %v1125_v9 }
 0x26a   : > { %v1163_v10 = vpop.f32.mrf.mxu3 }
 0x26b   : > { %v1178_v12 = vmax.f32 %v1163_v10, 0.0 }
 0x272   : > { %v1165_v11 = vpop.f32.mrf.mxu3 }
 0x273   : > { %v1179_v13 = vmax.f32 %v1165_v11, 0.0 }
 0x275   : > { %v1186_v14 = vpack.c.bf16 %v1179_v13, %v1178_v12 }
 0x277   : > { %3852 = vmatmul.msk.bf16.vlgmr.msrb.gmra.mxu0 %vm1195_vm6, %v1186_v14 }
 0x278   : > { %1671 = vmatpush.bf16.msrb.mxu0 %v4207_v4 }
 0x27a   : > { %v1168_v16 = vpop.f32.mrf.mxu3 }
 0x27b   : > { %v1180_v18 = vmax.f32 %v1168_v16, 0.0 }
 0x27c   : > { %1672 = vmatpush.bf16.msrb.mxu0 %v4206_v7 }
 0x282   : > { %v1170_v17 = vpop.f32.mrf.mxu3 }
 0x283   : > { %v1181_v19 = vmax.f32 %v1170_v17, 0.0 }
 0x285   : > { %v1187_v20 = vpack.c.bf16 %v1181_v19, %v1180_v18 }
 0x287   : > { %3853 = vmatmul.msk.bf16.gmra.mxu0 %vm1195_vm6, %v1187_v20 }
 0x28a   : > { %v1173_v21 = vpop.f32.mrf.mxu3 }
 0x28b   : > { %v1182_v23 = vmax.f32 %v1173_v21, 0.0 }
 0x292   : > { %v1175_v22 = vpop.f32.mrf.mxu3 }
 0x293   : > { %v1183_v24 = vmax.f32 %v1175_v22, 0.0 }
 0x295   : > { %v1188_v25 = vpack.c.bf16 %v1183_v24, %v1182_v23 }
 0x297   : > { %3854 = vmatmul.msk.bf16.gmra.mxu0 %vm1195_vm6, %v1188_v25 }
 0x2f4   : > { %v1214_v26 = vpop.f32.mrf.mxu0 }
 0x2f5   : > { %v1229_v28 = vmax.f32 %v1214_v26, 0.0 }
 0x2fc   : > { %v1216_v27 = vpop.f32.mrf.mxu0 }
 0x2fd   : > { %v1230_v29 = vmax.f32 %v1216_v27, 0.0  ;;  %v4290_v27 = vld [vmem:[%s4596_s30] ss:$0 sm:$0xff] }
 0x2ff   : > { %v1237_v30 = vpack.c.bf16 %v1230_v29, %v1229_v28 }
 0x301   : > { %3859 = vmatmul.msk.bf16.vlgmr.msrb.gmra.mxu3 %vm1195_vm6, %v1237_v30 }
 0x302   : > { %1717 = vmatpush.bf16.msrb.mxu3 %v4209_v5  ;;  %v4211_v5 = vld [vmem:[%s4586_s19 + $0x18] sm:$0xff] }
 0x304   : > { %v1219_v32 = vpop.f32.mrf.mxu0 }
 0x305   : > { %v1231_v34 = vmax.f32 %v1219_v32, 0.0 }
 0x306   : > { %1718 = vmatpush.bf16.msrb.mxu3 %v4208_v8 }
 0x30c   : > { %v1221_v33 = vpop.f32.mrf.mxu0 }
 0x30d   : > { %v1232_v35 = vmax.f32 %v1221_v33, 0.0 }
 0x30f   : > { %v1238_v36 = vpack.c.bf16 %v1232_v35, %v1231_v34 }
 0x311   : > { %3860 = vmatmul.msk.bf16.gmra.mxu3 %vm1195_vm6, %v1238_v36  ;;  %v4292_v36 = vld [vmem:[%s4601_s6] ss:$0 sm:$0xff] }
 0x314   : > { %v1224_v37 = vpop.f32.mrf.mxu0 }
 0x315   : > { %v1233_v39 = vmax.f32 %v1224_v37, 0.0 }
 0x31c   : > { %v1226_v38 = vpop.f32.mrf.mxu0 }
 0x31d   : > { %v1234_v40 = vmax.f32 %v1226_v38, 0.0 }
 0x31f   : > { %v1239_v41 = vpack.c.bf16 %v1234_v40, %v1233_v39 }
 0x321   : > { %3861 = vmatmul.msk.bf16.gmra.mxu3 %vm1195_vm6, %v1239_v41 }
 0x384   : > { %v1264_v42 = vpop.f32.mrf.mxu3 }
 0x385   : > { %v1279_v44 = vmax.f32 %v1264_v42, 0.0 }
 0x38c   : > { %v1266_v43 = vpop.f32.mrf.mxu3 }
 0x38d   : > { %v1280_v45 = vmax.f32 %v1266_v43, 0.0 }
 0x38f   : > { %v1287_v46 = vpack.c.bf16 %v1280_v45, %v1279_v44 }
 0x391   : > { %3866 = vmatmul.msk.bf16.vlgmr.msrb.gmra.mxu1 %vm1195_vm6, %v1287_v46 }
 0x394   : > { %v1269_v48 = vpop.f32.mrf.mxu3 }
 0x395   : > { %v1281_v50 = vmax.f32 %v1269_v48, 0.0 }
 0x39c   : > { %v1271_v49 = vpop.f32.mrf.mxu3 }
 0x39d   : > { %v1282_v51 = vmax.f32 %v1271_v49, 0.0 }
 0x39f   : > { %v1288_v52 = vpack.c.bf16 %v1282_v51, %v1281_v50 }
 0x3a1   : > { %3867 = vmatmul.msk.bf16.gmra.mxu1 %vm1195_vm6, %v1288_v52 }
 0x3a4   : > { %v1274_v53 = vpop.f32.mrf.mxu3 }
 0x3a5   : > { %v1283_v55 = vmax.f32 %v1274_v53, 0.0 }
 0x3ac   : > { %v1276_v54 = vpop.f32.mrf.mxu3 }
 0x3ad   : > { %v1284_v56 = vmax.f32 %v1276_v54, 0.0 }
 0x3af   : > { %v1289_v57 = vpack.c.bf16 %v1284_v56, %v1283_v55  ;;  %v4291_v55 = vld [vmem:[%s4591_s24] ss:$0 sm:$0xff] }
 0x3b1   : > { %3868 = vmatmul.msk.bf16.gmra.mxu1 %vm1195_vm6, %v1289_v57 }
 0x40e   : > { %v4736_v63 = vpop.f32.mrf.mxu1 }
 0x40f   : > { %v1329_v1 = vmax.f32 %v4736_v63, 0.0 }
 0x416   : > { %v4738_v0 = vpop.f32.mrf.mxu1 }
 0x417   : > { %v1330_v2 = vmax.f32 %v4738_v0, 0.0 }
 0x419   : > { %v4746_v3 = vpack.c.bf16 %v1330_v2, %v1329_v1 }
 0x41b   : > { %3877 = vmatmul.msk.bf16.vlgmr.msrb.gmra.mxu2 %vm927_vm0, %v4746_v3  ;;  %3888 = vmatmul.msk.bf16.vlgmr.msra.gmra.mxu0 %vm927_vm0, %v4746_v3 }
 0x41c   : > { %3899 = vmatmul.msk.bf16.vlgmr.msra.gmra.mxu3 %vm927_vm0, %v4746_v3 }
 0x41e   : > { %v4756_v6 = vpop.f32.mrf.mxu1 }
 0x41f   : > { %v1331_v10 = vmax.f32 %v4756_v6, 0.0 }
 0x426   : > { %v4760_v9 = vpop.f32.mrf.mxu1 }
 0x427   : > { %v1332_v11 = vmax.f32 %v4760_v9, 0.0 }
 0x429   : > { %v4768_v12 = vpack.c.bf16 %v1332_v11, %v1331_v10 }
 0x42b   : > { %3878 = vmatmul.msk.bf16.gmra.mxu2 %vm927_vm0, %v4768_v12  ;;  %3889 = vmatmul.msk.bf16.gmra.mxu0 %vm927_vm0, %v4768_v12 }
 0x42c   : > { %3900 = vmatmul.msk.bf16.gmra.mxu3 %vm927_vm0, %v4768_v12 }
 0x42e   : > { %v4776_v13 = vpop.f32.mrf.mxu1 }
 0x42f   : > { %v1333_v15 = vmax.f32 %v4776_v13, 0.0 }
 0x436   : > { %v4778_v14 = vpop.f32.mrf.mxu1 }
 0x437   : > { %v1334_v16 = vmax.f32 %v4778_v14, 0.0 }
 0x439   : > { %v4786_v17 = vpack.c.bf16 %v1334_v16, %v1333_v15 }
 0x43b   : > { %3879 = vmatmul.msk.bf16.gmra.mxu2 %vm927_vm0, %v4786_v17  ;;  %3890 = vmatmul.msk.bf16.gmra.mxu0 %vm927_vm0, %v4786_v17 }
 0x43c   : > { %3901 = vmatmul.msk.bf16.gmra.mxu3 %vm927_vm0, %v4786_v17 }
 0x44b   : > { %3921 = vmatmul.msk.bf16.vlgmr.msrb.gmra.mxu0 %vm927_vm0, %v4746_v3 }
 0x44c   : > { %3937 = vmatmul.msk.bf16.vlgmr.msrb.gmra.mxu3 %vm927_vm0, %v4746_v3 }
 0x45b   : > { %3922 = vmatmul.msk.bf16.gmra.mxu0 %vm927_vm0, %v4768_v12 }
 0x45c   : > { %3938 = vmatmul.msk.bf16.gmra.mxu3 %vm927_vm0, %v4768_v12 }
 0x46b   : > { %3923 = vmatmul.msk.bf16.gmra.mxu0 %vm927_vm0, %v4786_v17 }
 0x46c   : > { %3939 = vmatmul.msk.bf16.gmra.mxu3 %vm927_vm0, %v4786_v17 }
 0x498   : > { %v1420_v18 = vpop.f32.mrf.mxu0 }
 0x499   : > { %v1421_v50 = vadd.f32 %v4290_v27, %v1420_v18  ;;  %v4210_v18 = vld [vmem:[%s4586_s19 + $0x10] sm:$0xff] }
 0x49e   : > { %v1376_v32 = vpop.f32.mrf.mxu2 }
 0x49f   : > { %v1464_v19 = vpop.f32.mrf.mxu3  ;;  %v1377_v60 = vadd.f32 %v4291_v55, %v1376_v32 }
 0x4a0   : > { %v1422_v20 = vpop.f32.mrf.mxu0  ;;  %v1465_v52 = vadd.f32 %v4292_v36, %v1464_v19 }
 0x4a1   : > { %v1423_v46 = vadd.f32 %v4290_v27, %v1422_v20 }
 0x4a3   : > { %v1482_v53 = vpack.c.bf16 %v1423_v46, %v1421_v50 }
 0x4a5   : > { %v1496_v56 = vsel %vm1485_vm7, %v1482_v53, 0 }
 0x4a6   : > { %v1378_v44 = vpop.f32.mrf.mxu2 }
 0x4a7   : > { %v1466_v21 = vpop.f32.mrf.mxu3  ;;  %v1379_v58 = vadd.f32 %v4291_v55, %v1378_v44 }
 0x4a8   : > { %v1425_v22 = vpop.f32.mrf.mxu0  ;;  %v1467_v48 = vadd.f32 %v4292_v36, %v1466_v21 }
 0x4a9   : > { %v1426_v37 = vadd.f32 %v4290_v27, %v1425_v22  ;;  %v1479_v61 = vpack.c.bf16 %v1379_v58, %v1377_v60 }
 0x4aa   : > { %v1603_v54 = vpack.c.bf16 %v1467_v48, %v1465_v52 }
 0x4ae   : > { %v1381_v57 = vpop.f32.mrf.mxu2 }
 0x4af   : > { %v1469_v23 = vpop.f32.mrf.mxu3  ;;  %v1382_v19 = vadd.f32 %v4291_v55, %v1381_v57 }
 0x4b0   : > { %v1427_v24 = vpop.f32.mrf.mxu0  ;;  %v1470_v45 = vadd.f32 %v4292_v36, %v1469_v23 }
 0x4b1   : > { %v1428_v34 = vadd.f32 %v4290_v27, %v1427_v24  ;;  %v4294_v24 = vld [vmem:[%s4596_s30 + $0x1] ss:$0 sm:$0xff] }
 0x4b3   : > { %v1483_v41 = vpack.c.bf16 %v1428_v34, %v1426_v37 }
 0x4b5   : > { %v1499_v47 = vsel %vm1485_vm7, %v1483_v41, 0 }
 0x4b6   : > { %v1383_v4 = vpop.f32.mrf.mxu2 }
 0x4b7   : > { %v1471_v25 = vpop.f32.mrf.mxu3  ;;  %v1384_v7 = vadd.f32 %v4291_v55, %v1383_v4 }
 0x4b8   : > { %v1430_v26 = vpop.f32.mrf.mxu0  ;;  %v1472_v42 = vadd.f32 %v4292_v36, %v1471_v25 }
 0x4b9   : > { %v1431_v30 = vadd.f32 %v4290_v27, %v1430_v26  ;;  %v1480_v21 = vpack.c.bf16 %v1384_v7, %v1382_v19 }
 0x4ba   : > { %v1604_v49 = vpack.c.bf16 %v1472_v42, %v1470_v45 }
 0x4be   : > { %v1386_v20 = vpop.f32.mrf.mxu2 }
 0x4bf   : > { %v1474_v28 = vpop.f32.mrf.mxu3 }
 0x4c0   : > { %v1432_v29 = vpop.f32.mrf.mxu0  ;;  %v1475_v39 = vadd.f32 %v4292_v36, %v1474_v28 }
 0x4c1   : > { %v1433_v31 = vadd.f32 %v4290_v27, %v1432_v29  ;;  %v1387_v29 = vadd.f32 %v4291_v55, %v1386_v20 }
 0x4c3   : > { %v1484_v33 = vpack.c.bf16 %v1433_v31, %v1431_v30 }
 0x4c5   : > { %v1502_v35 = vsel %vm1485_vm7, %v1484_v33, 0 }
 0x4c6   : > { %1509 = vmatpush.bf16.xpose.msra.mxu1 %v1502_v35  ;;  %v1388_v23 = vpop.f32.mrf.mxu2 }
 0x4c7   : > { %v1476_v38 = vpop.f32.mrf.mxu3  ;;  %v1389_v25 = vadd.f32 %v4291_v55, %v1388_v23 }
 0x4c8   : > { %v1477_v40 = vadd.f32 %v4292_v36, %v1476_v38 }
 0x4c9   : > { %v1481_v31 = vpack.c.bf16 %v1389_v25, %v1387_v29 }
 0x4ca   : > { %v1605_v43 = vpack.c.bf16 %v1477_v40, %v1475_v39 }
 0x4cc   : > { %1620 = vmatpush.bf16.msra.mxu2 %v1605_v43 }
 0x4ce   : > { %1510 = vmatpush.bf16.xpose.msra.mxu1 %v1499_v47 }
 0x4cf   : > { %v1720_v51 = vpop.f32.mrf.mxu3 }
 0x4d0   : > { %1621 = vmatpush.bf16.msra.mxu2 %v1604_v49  ;;  %v1721_v38 = vadd.f32 %v4294_v24, %v1720_v51 }
 0x4d4   : > { %1622 = vmatpush.bf16.msra.mxu2 %v1603_v54 }
 0x4d6   : > { %1511 = vmatpush.bf16.xpose.msra.mxu1 %v1496_v56 }
 0x4d7   : > { %v1722_v59 = vpop.f32.mrf.mxu3 }
 0x4d8   : > { %v1723_v36 = vadd.f32 %v4294_v24, %v1722_v59 }
 0x4da   : > { %v1784_v39 = vpack.c.bf16 %v1723_v36, %v1721_v38 }
 0x4dc   : > { %v1797_v40 = vsel %vm1485_vm7, %v1784_v39, 0 }
 0x4dd   : > { %3902 = vmatmul.msk.bf16.vlgmr.msra.gmra.mxu1 %vm1485_vm7, %v1479_v61 }
 0x4de   : > { %1763 = vmatpush.bf16.msrb.mxu1 %v4211_v5  ;;  %v4295_v5 = vld [vmem:[%s4601_s6 + $0x1] ss:$0 sm:$0xff] }
 0x4df   : > { %v1725_v62 = vpop.f32.mrf.mxu3 }
 0x4e0   : > { %v1726_v34 = vadd.f32 %v4294_v24, %v1725_v62 }
 0x4e2   : > { %1764 = vmatpush.bf16.msrb.mxu1 %v4210_v18 }
 0x4e7   : > { %v1727_v8 = vpop.f32.mrf.mxu3 }
 0x4e8   : > { %v1728_v32 = vadd.f32 %v4294_v24, %v1727_v8 }
 0x4ea   : > { %v1785_v35 = vpack.c.bf16 %v1728_v32, %v1726_v34 }
 0x4ec   : > { %v1800_v37 = vsel %vm1485_vm7, %v1785_v35, 0 }
 0x4ed   : > { %3903 = vmatmul.msk.bf16.gmra.mxu1 %vm1485_vm7, %v1480_v21 }
 0x4ef   : > { %v1730_v22 = vpop.f32.mrf.mxu3 }
 0x4f0   : > { %v1731_v27 = vadd.f32 %v4294_v24, %v1730_v22 }
 0x4f7   : > { %v1732_v26 = vpop.f32.mrf.mxu3 }
 0x4f8   : > { %v1733_v28 = vadd.f32 %v4294_v24, %v1732_v26 }
 0x4fa   : > { %v1786_v30 = vpack.c.bf16 %v1733_v28, %v1731_v27 }
 0x4fc   : > { %v1803_v33 = vsel %vm1485_vm7, %v1786_v30, 0 }
 0x4fd   : > { %1810 = vmatpush.bf16.xpose.msrb.mxu2 %v1803_v33  ;;  %3904 = vmatmul.msk.bf16.gmra.mxu1 %vm1485_vm7, %v1481_v31 }
 0x505   : > { %1811 = vmatpush.bf16.xpose.msrb.mxu2 %v1800_v37 }
 0x50d   : > { %1812 = vmatpush.bf16.xpose.msrb.mxu2 %v1797_v40  ;;  %3953 = vmatmul.msk.bf16.vlgmr.msrb.gmra.mxu1 %vm927_vm0, %v4746_v3 }
 0x51d   : > { %3954 = vmatmul.msk.bf16.gmra.mxu1 %vm927_vm0, %v4768_v12 }
 0x52d   : > { %3955 = vmatmul.msk.bf16.gmra.mxu1 %vm927_vm0, %v4786_v17 }
 0x55a   : > { %v1513_v41 = vpop.f32.mrf.mxu1 }
 0x55b   : > { %v1528_v42 = vmul.f32 0.35355338, %v1513_v41 }
 0x55d   : > { %v1534_v43 = vsel %vm1144_vm5, %v1528_v42, -inf }
 0x55e   : > { %1535 = vmax.xlane.f32.xlu0 %v1534_v43 }
 0x562   : > { %v1515_v44 = vpop.f32.mrf.mxu1 }
 0x563   : > { %v1529_v45 = vmul.f32 0.35355338, %v1515_v44 }
 0x565   : > { %v1537_v46 = vsel %vm1144_vm5, %v1529_v45, -inf }
 0x566   : > { %1538 = vmax.xlane.f32.xlu0 %v1537_v46 }
 0x56a   : > { %v1518_v47 = vpop.f32.mrf.mxu1 }
 0x56b   : > { %v1530_v48 = vmul.f32 0.35355338, %v1518_v47 }
 0x56d   : > { %v1540_v49 = vsel %vm1144_vm5, %v1530_v48, -inf }
 0x56e   : > { %1541 = vmax.xlane.f32.xlu1 %v1540_v49 }
 0x572   : > { %v1520_v50 = vpop.f32.mrf.mxu1 }
 0x573   : > { %v1531_v51 = vmul.f32 0.35355338, %v1520_v50 }
 0x575   : > { %v1543_v52 = vsel %vm1144_vm5, %v1531_v51, -inf }
 0x576   : > { %1544 = vmax.xlane.f32.xlu1 %v1543_v52 }
 0x57a   : > { %v1523_v53 = vpop.f32.mrf.mxu1 }
 0x57b   : > { %v1532_v54 = vmul.f32 0.35355338, %v1523_v53 }
 0x57d   : > { %v1546_v55 = vsel %vm1144_vm5, %v1532_v54, -inf }
 0x57e   : > { %1547 = vmax.xlane.f32.xlu2 %v1546_v55 }
 0x582   : > { %v1525_v56 = vpop.f32.mrf.mxu1 }
 0x583   : > { %v1533_v57 = vmul.f32 0.35355338, %v1525_v56 }
 0x585   : > { %v1549_v58 = vsel %vm1144_vm5, %v1533_v57, -inf }
 0x586   : > { %1550 = vmax.xlane.f32.xlu2 %v1549_v58 }
 0x58a   : > { %v1766_v59 = vpop.f32.mrf.mxu1 }
 0x58b   : > { %v1767_v24 = vadd.f32 %v4295_v5, %v1766_v59 }
 0x592   : > { %v1768_v60 = vpop.f32.mrf.mxu1 }
 0x593   : > { %v1769_v22 = vadd.f32 %v4295_v5, %v1768_v60 }
 0x595   : > { %v1904_v25 = vpack.c.bf16 %v1769_v22, %v1767_v24 }
 0x59a   : > { %v1771_v61 = vpop.f32.mrf.mxu1 }
 0x59b   : > { %v1772_v21 = vadd.f32 %v4295_v5, %v1771_v61 }
 0x5a2   : > { %v1773_v62 = vpop.f32.mrf.mxu1 }
 0x5a3   : > { %v1774_v19 = vadd.f32 %v4295_v5, %v1773_v62 }
 0x5a5   : > { %v1905_v23 = vpack.c.bf16 %v1774_v19, %v1772_v21 }
 0x5aa   : > { %v1776_v4 = vpop.f32.mrf.mxu1 }
 0x5ab   : > { %v1777_v8 = vadd.f32 %v4295_v5, %v1776_v4 }
 0x5b2   : > { %v1778_v7 = vpop.f32.mrf.mxu1 }
 0x5b3   : > { %v1779_v18 = vadd.f32 %v4295_v5, %v1778_v7 }
 0x5b5   : > { %v1906_v20 = vpack.c.bf16 %v1779_v18, %v1777_v8 }
 0x5b7   : > { %1921 = vmatpush.bf16.msra.mxu0 %v1906_v20 }
 0x5bb   : > { %1922 = vmatpush.bf16.msra.mxu0 %v1905_v23  ;;  %v1674_v23 = vpop.f32.mrf.mxu0 }
 0x5bf   : > { %1923 = vmatpush.bf16.msra.mxu0 %v1904_v25 }
 0x5d1   : > { %v1536_v26 = vpop.xlane.xlu0 %1535 }
 0x5d2   : > { %v1552_v27 = vsub.f32 %v1528_v42, %v1536_v26 }
 0x5d4   : > { %v1558_v28 = vmul.f32 1.442695, %v1552_v27 }
 0x5d6   : > { %4310 = vpow2.f32 %v1558_v28 }
 0x5d9   : > { %v1539_v29 = vpop.xlane.xlu0 %1538 }
 0x5da   : > { %v1553_v30 = vsub.f32 %v1529_v45, %v1539_v29  ;;  %v1676_v29 = vpop.f32.mrf.mxu0 }
 0x5dc   : > { %v4311_v31 = vpop.eup %4310  ;;  %v1560_v32 = vmul.f32 1.442695, %v1553_v30  ;;  %v4293_v30 = vld [vmem:[%s4591_s24 + $0x1] ss:$0 sm:$0xff] }
 0x5dd   : > { %v1570_v33 = vsel %vm1144_vm5, %v4311_v31, 0.0 }
 0x5de   : > { %4312 = vpow2.f32 %v1560_v32  ;;  %1571 = vadd.xlane.f32.xlu0 %v1570_v33  ;;  %v1677_v32 = vadd.f32 %v4293_v30, %v1676_v29  ;;  %v1675_v33 = vadd.f32 %v4293_v30, %v1674_v23 }
 0x5e1   : > { %v1542_v34 = vpop.xlane.xlu1 %1541 }
 0x5e2   : > { %v1554_v35 = vsub.f32 %v1530_v48, %v1542_v34  ;;  %v1781_v34 = vpack.c.bf16 %v1677_v32, %v1675_v33 }
 0x5e4   : > { %v4313_v36 = vpop.eup %4312  ;;  %v1562_v37 = vmul.f32 1.442695, %v1554_v35  ;;  %v4213_v35 = vld [vmem:[%s4576_s8 + $0x28] sm:$0xff] }
 0x5e5   : > { %v1573_v38 = vsel %vm1144_vm5, %v4313_v36, 0.0 }
 0x5e6   : > { %4314 = vpow2.f32 %v1562_v37  ;;  %1574 = vadd.xlane.f32.xlu1 %v1573_v38 }
 0x5e9   : > { %v1545_v39 = vpop.xlane.xlu1 %1544 }
 0x5ea   : > { %v1555_v40 = vsub.f32 %v1531_v51, %v1545_v39 }
 0x5ec   : > { %v4315_v41 = vpop.eup %4314  ;;  %v1564_v42 = vmul.f32 1.442695, %v1555_v40 }
 0x5ed   : > { %v1576_v43 = vsel %vm1144_vm5, %v4315_v41, 0.0 }
 0x5ee   : > { %4316 = vpow2.f32 %v1564_v42  ;;  %1577 = vadd.xlane.f32.xlu2 %v1576_v43 }
 0x5f1   : > { %v1548_v44 = vpop.xlane.xlu2 %1547 }
 0x5f2   : > { %v1556_v45 = vsub.f32 %v1532_v54, %v1548_v44 }
 0x5f4   : > { %v4317_v46 = vpop.eup %4316  ;;  %v1566_v47 = vmul.f32 1.442695, %v1556_v45 }
 0x5f5   : > { %v1579_v48 = vsel %vm1144_vm5, %v4317_v46, 0.0 }
 0x5f6   : > { %4318 = vpow2.f32 %v1566_v47  ;;  %1580 = vadd.xlane.f32.xlu0 %v1579_v48 }
 0x5f9   : > { %v1551_v49 = vpop.xlane.xlu2 %1550 }
 0x5fa   : > { %v1557_v50 = vsub.f32 %v1533_v57, %v1551_v49 }
 0x5fc   : > { %v4319_v52 = vpop.eup %4318  ;;  %v1568_v53 = vmul.f32 1.442695, %v1557_v50 }
 0x5fd   : > { %v1582_v51 = vsel %vm1144_vm5, %v4319_v52, 0.0 }
 0x5fe   : > { %4320 = vpow2.f32 %v1568_v53  ;;  %1583 = vadd.xlane.f32.xlu1 %v1582_v51 }
 0x604   : > { %v4321_v55 = vpop.eup %4320 }
 0x605   : > { %v1585_v56 = vsel %vm1144_vm5, %v4321_v55, 0.0 }
 0x606   : > { %1586 = vadd.xlane.f32.xlu2 %v1585_v56 }
 0x651   : > { %v1572_v58 = vpop.xlane.xlu0 %1571 }
 0x652   : > { %4322 = vrcp.f32 %v1572_v58 }
 0x658   : > { %v4323_v59 = vpop.eup %4322 }
 0x659   : > { %v1575_v54 = vpop.xlane.xlu1 %1574  ;;  %v1594_v61 = vmul.f32 %v4323_v59, %v4311_v31  ;;  %v1679_v31 = vpop.f32.mrf.mxu0 }
 0x65a   : > { %4324 = vrcp.f32 %v1575_v54  ;;  %v1680_v39 = vadd.f32 %v4293_v30, %v1679_v31 }
 0x660   : > { %v4325_v60 = vpop.eup %4324 }
 0x661   : > { %v1595_v62 = vmul.f32 %v4325_v60, %v4313_v36  ;;  %v1578_v57 = vpop.xlane.xlu2 %1577  ;;  %v4212_v36 = vld [vmem:[%s4576_s8 + $0x20] sm:$0xff]  ;;  %v1681_v37 = vpop.f32.mrf.mxu0 }
 0x662   : > { %4326 = vrcp.f32 %v1578_v57  ;;  %v1682_v38 = vadd.f32 %v4293_v30, %v1681_v37 }
 0x663   : > { %v1600_v4 = vpack.c.bf16 %v1595_v62, %v1594_v61 }
 0x665   : > { %3905 = vmatmul.msk.bf16.vlgmr.msra.gmra.mxu2 %vm1144_vm5, %v1600_v4 }
 0x666   : > { %2045 = vmatpush.bf16.msra.mxu2 %v4213_v35 }
 0x668   : > { %v4327_v7 = vpop.eup %4326 }
 0x669   : > { %v1581_v5 = vpop.xlane.xlu0 %1580  ;;  %v1596_v18 = vmul.f32 %v4327_v7, %v4315_v41  ;;  %v1684_v40 = vpop.f32.mrf.mxu0  ;;  %v1782_v41 = vpack.c.bf16 %v1682_v38, %v1680_v39 }
 0x66a   : > { %4328 = vrcp.f32 %v1581_v5  ;;  %2046 = vmatpush.bf16.msra.mxu2 %v4212_v36  ;;  %v1685_v44 = vadd.f32 %v4293_v30, %v1684_v40 }
 0x670   : > { %v4329_v8 = vpop.eup %4328 }
 0x671   : > { %v1597_v19 = vmul.f32 %v4329_v8, %v4317_v46  ;;  %v1584_v21 = vpop.xlane.xlu1 %1583  ;;  %v1686_v42 = vpop.f32.mrf.mxu0  ;;  %v1642_v46 = vld [vmem:[%s5320_s15] sm:$0xf] }
 0x672   : > { %4330 = vrcp.f32 %v1584_v21  ;;  %v1687_v43 = vadd.f32 %v4293_v30, %v1686_v42  ;;  %v1991_v47 = vsel %vm1008_vm1, %v1642_v46, 0 }
 0x673   : > { %v1601_v20 = vpack.c.bf16 %v1597_v19, %v1596_v18  ;;  %2000 = vmatpush.bf16.msra.mxu1 %v1991_v47 }
 0x674   : > { %v1783_v45 = vpack.c.bf16 %v1687_v43, %v1685_v44 }
 0x675   : > { %3906 = vmatmul.msk.bf16.gmra.mxu2 %vm1144_vm5, %v1601_v20 }
 0x678   : > { %v4331_v24 = vpop.eup %4330 }
 0x679   : > { %v1587_v22 = vpop.xlane.xlu2 %1586  ;;  %v1598_v26 = vmul.f32 %v4331_v24, %v4319_v52 }
 0x67a   : > { %4332 = vrcp.f32 %v1587_v22 }
 0x680   : > { %v4333_v25 = vpop.eup %4332 }
 0x681   : > { %v1599_v27 = vmul.f32 %v4333_v25, %v4321_v55 }
 0x683   : > { %v1602_v28 = vpack.c.bf16 %v1599_v27, %v1598_v26 }
 0x685   : > { %3907 = vmatmul.msk.bf16.gmra.mxu2 %vm1144_vm5, %v1602_v28 }
 0x695   : > { %3956 = vmatmul.msk.bf16.vlgmr.msrb.gmra.mxu2 %vm1485_vm7, %v1781_v34 }
 0x6a5   : > { %3957 = vmatmul.msk.bf16.gmra.mxu2 %vm1485_vm7, %v1782_v41 }
 0x6b5   : > { %3958 = vmatmul.msk.bf16.gmra.mxu2 %vm1485_vm7, %v1783_v45 }
 0x6c5   : > { %3982 = vmatmul.msk.bf16.vlgmr.msra.gmra.mxu2 %vm927_vm0, %v4746_v3 }
 0x6d5   : > { %3983 = vmatmul.msk.bf16.gmra.mxu2 %vm927_vm0, %v4768_v12 }
 0x6e5   : > { %3984 = vmatmul.msk.bf16.gmra.mxu2 %vm927_vm0, %v4786_v17 }
 0x6e8   : > { %v1624_v48 = vpop.f32.mrf.mxu2 }
 0x6f0   : > { %v1626_v49 = vpop.f32.mrf.mxu2 }
 0x6f1   : > { %v1639_v50 = vpack.c.bf16 %v1626_v49, %v1624_v48 }
 0x6f3   : > { %3966 = vmatmul.msk.bf16.vlgmr.msra.gmra.mxu1 %vm1485_vm7, %v1639_v50 }
 0x6f8   : > { %v1629_v52 = vpop.f32.mrf.mxu2 }
 0x700   : > { %v1631_v53 = vpop.f32.mrf.mxu2 }
 0x701   : > { %v1640_v51 = vpack.c.bf16 %v1631_v53, %v1629_v52 }
 0x703   : > { %3967 = vmatmul.msk.bf16.gmra.mxu1 %vm1485_vm7, %v1640_v51 }
 0x708   : > { %v1634_v55 = vpop.f32.mrf.mxu2 }
 0x710   : > { %v1636_v56 = vpop.f32.mrf.mxu2 }
 0x711   : > { %v1641_v58 = vpack.c.bf16 %v1636_v56, %v1634_v55 }
 0x713   : > { %3968 = vmatmul.msk.bf16.gmra.mxu1 %vm1485_vm7, %v1641_v58 }
 0x718   : > { %v1814_v54 = vpop.f32.mrf.mxu2 }
 0x719   : > { %v1829_v59 = vmul.f32 0.35355338, %v1814_v54 }
 0x71b   : > { %v1835_v60 = vsel %vm1144_vm5, %v1829_v59, -inf }
 0x71c   : > { %1836 = vmax.xlane.f32.xlu0 %v1835_v60 }
 0x720   : > { %v1816_v61 = vpop.f32.mrf.mxu2 }
 0x721   : > { %v1830_v62 = vmul.f32 0.35355338, %v1816_v61 }
 0x723   : > { %v1838_v4 = vsel %vm1144_vm5, %v1830_v62, -inf }
 0x724   : > { %1839 = vmax.xlane.f32.xlu1 %v1838_v4  ;;  %v4215_v4 = vld [vmem:[%s4581_s14 + $0x28] sm:$0xff] }
 0x725   : > { %2091 = vmatpush.bf16.msrb.mxu0 %v4215_v4 }
 0x728   : > { %v1819_v57 = vpop.f32.mrf.mxu2 }
 0x729   : > { %v1831_v5 = vmul.f32 0.35355338, %v1819_v57 }
 0x72b   : > { %v1841_v7 = vsel %vm1144_vm5, %v1831_v5, -inf }
 0x72c   : > { %1842 = vmax.xlane.f32.xlu2 %v1841_v7  ;;  %v4214_v7 = vld [vmem:[%s4581_s14 + $0x20] sm:$0xff] }
 0x72d   : > { %2092 = vmatpush.bf16.msrb.mxu0 %v4214_v7  ;;  %v4296_v7 = vld [vmem:[%s4591_s24 + $0x2] ss:$0 sm:$0xff] }
 0x730   : > { %v1821_v8 = vpop.f32.mrf.mxu2 }
 0x731   : > { %v1832_v18 = vmul.f32 0.35355338, %v1821_v8 }
 0x733   : > { %v1844_v19 = vsel %vm1144_vm5, %v1832_v18, -inf }
 0x734   : > { %1845 = vmax.xlane.f32.xlu0 %v1844_v19 }
 0x738   : > { %v1824_v20 = vpop.f32.mrf.mxu2 }
 0x739   : > { %v1833_v21 = vmul.f32 0.35355338, %v1824_v20 }
 0x73b   : > { %v1847_v22 = vsel %vm1144_vm5, %v1833_v21, -inf }
 0x73c   : > { %1848 = vmax.xlane.f32.xlu1 %v1847_v22 }
 0x740   : > { %v1826_v23 = vpop.f32.mrf.mxu2 }
 0x741   : > { %v1834_v24 = vmul.f32 0.35355338, %v1826_v23 }
 0x743   : > { %v1850_v25 = vsel %vm1144_vm5, %v1834_v24, -inf }
 0x744   : > { %1851 = vmax.xlane.f32.xlu2 %v1850_v25 }
 0x78f   : > { %v1837_v26 = vpop.xlane.xlu0 %1836 }
 0x790   : > { %v1853_v27 = vsub.f32 %v1829_v59, %v1837_v26 }
 0x792   : > { %v1859_v28 = vmul.f32 1.442695, %v1853_v27 }
 0x794   : > { %4334 = vpow2.f32 %v1859_v28 }
 0x797   : > { %v1840_v29 = vpop.xlane.xlu1 %1839 }
 0x798   : > { %v1854_v30 = vsub.f32 %v1830_v62, %v1840_v29 }
 0x79a   : > { %v4335_v31 = vpop.eup %4334  ;;  %v1861_v32 = vmul.f32 1.442695, %v1854_v30  ;;  %v3962_v30 = vld [vmem:[%s5320_s15 + $0x4] sm:$0xf] }
 0x79b   : > { %v1871_v33 = vsel %vm1144_vm5, %v4335_v31, 0.0 }
 0x79c   : > { %4336 = vpow2.f32 %v1861_v32  ;;  %1872 = vadd.xlane.f32.xlu0 %v1871_v33 }
 0x79f   : > { %v1843_v34 = vpop.xlane.xlu2 %1842 }
 0x7a0   : > { %v1855_v35 = vsub.f32 %v1831_v5, %v1843_v34 }
 0x7a2   : > { %v4337_v36 = vpop.eup %4336  ;;  %v1863_v37 = vmul.f32 1.442695, %v1855_v35 }
 0x7a3   : > { %v1874_v38 = vsel %vm1144_vm5, %v4337_v36, 0.0 }
 0x7a4   : > { %4338 = vpow2.f32 %v1863_v37  ;;  %1875 = vadd.xlane.f32.xlu1 %v1874_v38  ;;  %v4216_v37 = vld [vmem:[%s4586_s19 + $0x20] sm:$0xff] }
 0x7a7   : > { %v1846_v39 = vpop.xlane.xlu0 %1845 }
 0x7a8   : > { %v1856_v40 = vsub.f32 %v1832_v18, %v1846_v39 }
 0x7aa   : > { %v4339_v41 = vpop.eup %4338  ;;  %v1865_v42 = vmul.f32 1.442695, %v1856_v40 }
 0x7ab   : > { %v1877_v43 = vsel %vm1144_vm5, %v4339_v41, 0.0 }
 0x7ac   : > { %4340 = vpow2.f32 %v1865_v42  ;;  %1878 = vadd.xlane.f32.xlu2 %v1877_v43 }
 0x7af   : > { %v1849_v44 = vpop.xlane.xlu1 %1848 }
 0x7b0   : > { %v1857_v45 = vsub.f32 %v1833_v21, %v1849_v44 }
 0x7b2   : > { %v4341_v46 = vpop.eup %4340  ;;  %v1867_v47 = vmul.f32 1.442695, %v1857_v45  ;;  %v4219_v45 = vld [vmem:[%s4576_s8 + $0x38] sm:$0xff] }
 0x7b3   : > { %v1880_v48 = vsel %vm1144_vm5, %v4341_v46, 0.0 }
 0x7b4   : > { %4342 = vpow2.f32 %v1867_v47  ;;  %1881 = vadd.xlane.f32.xlu0 %v1880_v48  ;;  %v4218_v47 = vld [vmem:[%s4576_s8 + $0x30] sm:$0xff] }
 0x7b7   : > { %v1852_v49 = vpop.xlane.xlu2 %1851 }
 0x7b8   : > { %v1858_v50 = vsub.f32 %v1834_v24, %v1852_v49 }
 0x7ba   : > { %v4343_v52 = vpop.eup %4342  ;;  %v1869_v53 = vmul.f32 1.442695, %v1858_v50  ;;  %v4297_v50 = vld [vmem:[%s4596_s30 + $0x2] ss:$0 sm:$0xff] }
 0x7bb   : > { %v1883_v51 = vsel %vm1144_vm5, %v4343_v52, 0.0 }
 0x7bc   : > { %4344 = vpow2.f32 %v1869_v53  ;;  %1884 = vadd.xlane.f32.xlu1 %v1883_v51 }
 0x7c2   : > { %v4345_v55 = vpop.eup %4344 }
 0x7c3   : > { %v1886_v56 = vsel %vm1144_vm5, %v4345_v55, 0.0 }
 0x7c4   : > { %1887 = vadd.xlane.f32.xlu2 %v1886_v56 }
 0x80f   : > { %v1873_v58 = vpop.xlane.xlu0 %1872 }
 0x810   : > { %4346 = vrcp.f32 %v1873_v58 }
 0x816   : > { %v4347_v59 = vpop.eup %4346 }
 0x817   : > { %v1876_v54 = vpop.xlane.xlu1 %1875  ;;  %v1895_v61 = vmul.f32 %v4347_v59, %v4335_v31  ;;  %v1955_v31 = vsel %vm1008_vm1, %v3962_v30, 0 }
 0x818   : > { %4348 = vrcp.f32 %v1876_v54  ;;  %1964 = vmatpush.bf16.msra.mxu3 %v1955_v31 }
 0x81e   : > { %v4349_v60 = vpop.eup %4348 }
 0x81f   : > { %v1896_v62 = vmul.f32 %v4349_v60, %v4337_v36  ;;  %v1879_v5 = vpop.xlane.xlu2 %1878  ;;  %v4217_v36 = vld [vmem:[%s4586_s19 + $0x28] sm:$0xff] }
 0x820   : > { %4350 = vrcp.f32 %v1879_v5  ;;  %2137 = vmatpush.bf16.msrb.mxu3 %v4217_v36 }
 0x821   : > { %v1901_v57 = vpack.c.bf16 %v1896_v62, %v1895_v61 }
 0x823   : > { %3959 = vmatmul.msk.bf16.vlgmr.msra.gmra.mxu0 %vm1144_vm5, %v1901_v57 }
 0x824   : > { %2138 = vmatpush.bf16.msrb.mxu3 %v4216_v37 }
 0x826   : > { %v4351_v18 = vpop.eup %4350 }
 0x827   : > { %v1882_v8 = vpop.xlane.xlu0 %1881  ;;  %v1897_v20 = vmul.f32 %v4351_v18, %v4339_v41 }
 0x828   : > { %4352 = vrcp.f32 %v1882_v8 }
 0x82e   : > { %v4353_v19 = vpop.eup %4352 }
 0x82f   : > { %v1898_v21 = vmul.f32 %v4353_v19, %v4341_v46  ;;  %v1885_v23 = vpop.xlane.xlu1 %1884 }
 0x830   : > { %4354 = vrcp.f32 %v1885_v23  ;;  %v4221_v23 = vld [vmem:[%s4581_s14 + $0x38] sm:$0xff] }
 0x831   : > { %v1902_v22 = vpack.c.bf16 %v1898_v21, %v1897_v20 }
 0x833   : > { %3960 = vmatmul.msk.bf16.gmra.mxu0 %vm1144_vm5, %v1902_v22 }
 0x836   : > { %v4355_v25 = vpop.eup %4354 }
 0x837   : > { %v1888_v24 = vpop.xlane.xlu2 %1887  ;;  %v1899_v27 = vmul.f32 %v4355_v25, %v4343_v52  ;;  %v4220_v25 = vld [vmem:[%s4581_s14 + $0x30] sm:$0xff] }
 0x838   : > { %4356 = vrcp.f32 %v1888_v24 }
 0x83e   : > { %v4357_v26 = vpop.eup %4356 }
 0x83f   : > { %v1900_v28 = vmul.f32 %v4357_v26, %v4345_v55  ;;  %v2048_v55 = vpop.f32.mrf.mxu2 }
 0x840   : > { %v2049_v20 = vadd.f32 %v4296_v7, %v2048_v55 }
 0x841   : > { %v1903_v29 = vpack.c.bf16 %v1900_v28, %v1899_v27 }
 0x843   : > { %3961 = vmatmul.msk.bf16.gmra.mxu0 %vm1144_vm5, %v1903_v29 }
 0x847   : > { %v2050_v61 = vpop.f32.mrf.mxu2 }
 0x848   : > { %v2051_v19 = vadd.f32 %v4296_v7, %v2050_v61 }
 0x84a   : > { %v2155_v21 = vpack.c.bf16 %v2051_v19, %v2049_v20 }
 0x84f   : > { %v2053_v18 = vpop.f32.mrf.mxu2 }
 0x850   : > { %v2054_v26 = vadd.f32 %v4296_v7, %v2053_v18 }
 0x853   : > { %3998 = vmatmul.msk.bf16.vlgmr.msrb.gmra.mxu0 %vm927_vm0, %v4746_v3 }
 0x857   : > { %v2055_v22 = vpop.f32.mrf.mxu2 }
 0x858   : > { %v2056_v24 = vadd.f32 %v4296_v7, %v2055_v22 }
 0x85a   : > { %v2156_v28 = vpack.c.bf16 %v2056_v24, %v2054_v26 }
 0x85f   : > { %v2058_v27 = vpop.f32.mrf.mxu2 }
 0x863   : > { %3999 = vmatmul.msk.bf16.gmra.mxu0 %vm927_vm0, %v4768_v12 }
 0x867   : > { %v2060_v29 = vpop.f32.mrf.mxu2 }
 0x868   : > { %v2061_v31 = vadd.f32 %v4296_v7, %v2060_v29 }
 0x873   : > { %4000 = vmatmul.msk.bf16.gmra.mxu0 %vm927_vm0, %v4786_v17 }
 0x8a0   : > { %v1925_v32 = vpop.f32.mrf.mxu0 }
 0x8a8   : > { %v1927_v33 = vpop.f32.mrf.mxu0 }
 0x8a9   : > { %v1940_v34 = vpack.c.bf16 %v1927_v33, %v1925_v32  ;;  %v2059_v32 = vadd.f32 %v4296_v7, %v2058_v27 }
 0x8ab   : > { %3963 = vmatmul.msk.bf16.vlgmr.msra.gmra.mxu3 %vm1485_vm7, %v1940_v34  ;;  %v2157_v33 = vpack.c.bf16 %v2061_v31, %v2059_v32 }
 0x8ac   : > { %2389 = vmatpush.bf16.msra.mxu3 %v4219_v45 }
 0x8b0   : > { %v1930_v35 = vpop.f32.mrf.mxu0  ;;  %2390 = vmatpush.bf16.msra.mxu3 %v4218_v47 }
 0x8b8   : > { %v1932_v38 = vpop.f32.mrf.mxu0 }
 0x8b9   : > { %v1941_v39 = vpack.c.bf16 %v1932_v38, %v1930_v35 }
 0x8bb   : > { %3964 = vmatmul.msk.bf16.gmra.mxu3 %vm1485_vm7, %v1941_v39  ;;  %v4930_v39 = vpop.f32.mrf.mxu1 }
 0x8c0   : > { %v1935_v40 = vpop.f32.mrf.mxu0 }
 0x8c8   : > { %v1937_v41 = vpop.f32.mrf.mxu0 }
 0x8c9   : > { %v1942_v42 = vpack.c.bf16 %v1937_v41, %v1935_v40  ;;  %v4932_v41 = vpop.f32.mrf.mxu1 }
 0x8cb   : > { %3965 = vmatmul.msk.bf16.gmra.mxu3 %vm1485_vm7, %v1942_v42 }
 0x8d0   : > { %v2094_v43 = vpop.f32.mrf.mxu0 }
 0x8d1   : > { %v2095_v57 = vadd.f32 %v4297_v50, %v2094_v43  ;;  %v4936_v43 = vpop.f32.mrf.mxu1 }
 0x8d8   : > { %v2096_v44 = vpop.f32.mrf.mxu0 }
 0x8d9   : > { %v2097_v62 = vadd.f32 %v4297_v50, %v2096_v44  ;;  %v4938_v45 = vpop.f32.mrf.mxu1 }
 0x8db   : > { %4014 = vmatmul.msk.bf16.vlgmr.msrb.gmra.mxu3 %vm927_vm0, %v4746_v3  ;;  %v2158_v5 = vpack.c.bf16 %v2097_v62, %v2095_v57 }
 0x8dd   : > { %v2171_v8 = vsel %vm1485_vm7, %v2158_v5, 0 }
 0x8e0   : > { %v2099_v46 = vpop.f32.mrf.mxu0 }
 0x8e1   : > { %v2100_v59 = vadd.f32 %v4297_v50, %v2099_v46 }
 0x8e8   : > { %v2101_v48 = vpop.f32.mrf.mxu0 }
 0x8e9   : > { %v2102_v58 = vadd.f32 %v4297_v50, %v2101_v48  ;;  %v4940_v48 = vpop.f32.mrf.mxu1 }
 0x8eb   : > { %4015 = vmatmul.msk.bf16.gmra.mxu3 %vm927_vm0, %v4768_v12  ;;  %v2159_v60 = vpack.c.bf16 %v2102_v58, %v2100_v59 }
 0x8ed   : > { %v2174_v4 = vsel %vm1485_vm7, %v2159_v60, 0 }
 0x8f0   : > { %v2104_v49 = vpop.f32.mrf.mxu0 }
 0x8f1   : > { %v2105_v53 = vadd.f32 %v4297_v50, %v2104_v49  ;;  %v4298_v49 = vld [vmem:[%s4601_s6 + $0x2] ss:$0 sm:$0xff] }
 0x8f8   : > { %v2106_v52 = vpop.f32.mrf.mxu0 }
 0x8f9   : > { %v2107_v51 = vadd.f32 %v4297_v50, %v2106_v52 }
 0x8fb   : > { %v2160_v56 = vpack.c.bf16 %v2107_v51, %v2105_v53  ;;  %4016 = vmatmul.msk.bf16.gmra.mxu3 %vm927_vm0, %v4786_v17 }
 0x8fd   : > { %v2177_v54 = vsel %vm1485_vm7, %v2160_v56, 0  ;;  %v4943_v56 = vpop.f32.mrf.mxu1 }
 0x8fe   : > { %2184 = vmatpush.bf16.xpose.msrb.mxu1 %v2177_v54 }
 0x906   : > { %2185 = vmatpush.bf16.xpose.msrb.mxu1 %v2174_v4 }
 0x90b   : > { %4040 = vmatmul.msk.bf16.vlgmr.msra.gmra.mxu3 %vm927_vm0, %v4746_v3 }
 0x90e   : > { %2186 = vmatpush.bf16.xpose.msrb.mxu1 %v2171_v8 }
 0x915   : > { %4017 = vmatmul.msk.bf16.vlgmr.msrb.gmra.mxu1 %vm1485_vm7, %v2155_v21 }
 0x916   : > { %2435 = vmatpush.bf16.msra.mxu1 %v4221_v23 }
 0x91a   : > { %2436 = vmatpush.bf16.msra.mxu1 %v4220_v25 }
 0x91b   : > { %4041 = vmatmul.msk.bf16.gmra.mxu3 %vm927_vm0, %v4768_v12 }
 0x925   : > { %4018 = vmatmul.msk.bf16.gmra.mxu1 %vm1485_vm7, %v2156_v28 }
 0x92b   : > { %4042 = vmatmul.msk.bf16.gmra.mxu3 %vm927_vm0, %v4786_v17 }
 0x92e   : > { %v4913_v30 = vpop.f32.mrf.mxu3 }
 0x935   : > { %4019 = vmatmul.msk.bf16.gmra.mxu1 %vm1485_vm7, %v2157_v33  ;;  %v4023_v33 = vld [vmem:[%s5320_s15 + $0x8] sm:$0xf] }
 0x936   : > { %v4916_v34 = vpop.f32.mrf.mxu3 }
 0x93e   : > { %v4918_v35 = vpop.f32.mrf.mxu3 }
 0x945   : > { %4056 = vmatmul.msk.bf16.vlgmr.msra.gmra.mxu1 %vm927_vm0, %v4746_v3 }
 0x946   : > { %v4922_v36 = vpop.f32.mrf.mxu3 }
 0x947   : > { %v2010_v63 = vadd.f32 %v4938_v45, %v4922_v36 }
 0x94e   : > { %v4924_v37 = vpop.f32.mrf.mxu3 }
 0x955   : > { %4057 = vmatmul.msk.bf16.gmra.mxu1 %vm927_vm0, %v4768_v12 }
 0x956   : > { %v4928_v38 = vpop.f32.mrf.mxu3 }
 0x957   : > { %v2015_v6 = vadd.f32 %v4943_v56, %v4928_v38 }
 0x95e   : > { %v2140_v40 = vpop.f32.mrf.mxu3 }
 0x95f   : > { %v2141_v60 = vadd.f32 %v4298_v49, %v2140_v40  ;;  %v2329_v40 = vsel %vm1008_vm1, %v4023_v33, 0 }
 0x960   : > { %2338 = vmatpush.bf16.msra.mxu0 %v2329_v40 }
 0x965   : > { %4058 = vmatmul.msk.bf16.gmra.mxu1 %vm927_vm0, %v4786_v17 }
 0x966   : > { %v2142_v42 = vpop.f32.mrf.mxu3 }
 0x967   : > { %v2143_v54 = vadd.f32 %v4298_v49, %v2142_v42 }
 0x969   : > { %v2278_v61 = vpack.c.bf16 %v2143_v54, %v2141_v60 }
 0x96e   : > { %v2145_v44 = vpop.f32.mrf.mxu3 }
 0x96f   : > { %v2146_v58 = vadd.f32 %v4298_v49, %v2145_v44 }
 0x976   : > { %v2147_v46 = vpop.f32.mrf.mxu3 }
 0x977   : > { %v2148_v51 = vadd.f32 %v4298_v49, %v2147_v46 }
 0x979   : > { %v2279_v59 = vpack.c.bf16 %v2148_v51, %v2146_v58 }
 0x97e   : > { %v2150_v47 = vpop.f32.mrf.mxu3 }
 0x97f   : > { %v2151_v52 = vadd.f32 %v4298_v49, %v2150_v47  ;;  %v4300_v47 = vld [vmem:[%s4596_s30 + $0x3] ss:$0 sm:$0xff] }
 0x986   : > { %v2152_v50 = vpop.f32.mrf.mxu3 }
 0x987   : > { %v2153_v53 = vadd.f32 %v4298_v49, %v2152_v50 }
 0x989   : > { %v2280_v55 = vpack.c.bf16 %v2153_v53, %v2151_v52 }
 0x98b   : > { %2295 = vmatpush.bf16.msrb.mxu2 %v2280_v55 }
 0x98f   : > { %2296 = vmatpush.bf16.msrb.mxu2 %v2279_v59 }
 0x992   : > { %v2188_v62 = vpop.f32.mrf.mxu1 }
 0x993   : > { %v2203_v4 = vmul.f32 0.35355338, %v2188_v62  ;;  %2297 = vmatpush.bf16.msrb.mxu2 %v2278_v61 }
 0x995   : > { %v2209_v57 = vsel %vm1144_vm5, %v2203_v4, -inf }
 0x996   : > { %2210 = vmax.xlane.f32.xlu0 %v2209_v57 }
 0x99a   : > { %v2190_v5 = vpop.f32.mrf.mxu1 }
 0x99b   : > { %v2204_v7 = vmul.f32 0.35355338, %v2190_v5 }
 0x99d   : > { %v2212_v8 = vsel %vm1144_vm5, %v2204_v7, -inf }
 0x99e   : > { %2213 = vmax.xlane.f32.xlu1 %v2212_v8 }
 0x9a2   : > { %v2193_v18 = vpop.f32.mrf.mxu1 }
 0x9a3   : > { %v2205_v19 = vmul.f32 0.35355338, %v2193_v18 }
 0x9a5   : > { %v2215_v20 = vsel %vm1144_vm5, %v2205_v19, -inf }
 0x9a6   : > { %2216 = vmax.xlane.f32.xlu2 %v2215_v20 }
 0x9aa   : > { %v2195_v21 = vpop.f32.mrf.mxu1 }
 0x9ab   : > { %v2206_v22 = vmul.f32 0.35355338, %v2195_v21 }
 0x9ad   : > { %v2218_v23 = vsel %vm1144_vm5, %v2206_v22, -inf }
 0x9ae   : > { %2219 = vmax.xlane.f32.xlu0 %v2218_v23 }
 0x9b2   : > { %v2198_v24 = vpop.f32.mrf.mxu1 }
 0x9b3   : > { %v2207_v25 = vmul.f32 0.35355338, %v2198_v24 }
 0x9b5   : > { %v2221_v26 = vsel %vm1144_vm5, %v2207_v25, -inf }
 0x9b6   : > { %2222 = vmax.xlane.f32.xlu1 %v2221_v26 }
 0x9ba   : > { %v2200_v27 = vpop.f32.mrf.mxu1 }
 0x9bb   : > { %v4950_v28 = vmul.f32 0.35355338, %v2200_v27 }
 0x9bd   : > { %v2224_v29 = vsel %vm1144_vm5, %v4950_v28, -inf }
 0x9be   : > { %2225 = vmax.xlane.f32.xlu2 %v2224_v29 }
 0x9c2   : > { %v2438_v31 = vpop.f32.mrf.mxu1 }
 0x9c3   : > { %v2439_v61 = vadd.f32 %v4300_v47, %v2438_v31 }
 0x9ca   : > { %v2440_v32 = vpop.f32.mrf.mxu1 }
 0x9cb   : > { %v2441_v59 = vadd.f32 %v4300_v47, %v2440_v32 }
 0x9cd   : > { %v2502_v62 = vpack.c.bf16 %v2441_v59, %v2439_v61 }
 0x9cf   : > { %v2515_v57 = vsel %vm1485_vm7, %v2502_v62, 0 }
 0x9d2   : > { %v2443_v42 = vpop.f32.mrf.mxu1 }
 0x9d3   : > { %v2444_v58 = vadd.f32 %v4300_v47, %v2443_v42 }
 0x9da   : > { %v2445_v44 = vpop.f32.mrf.mxu1 }
 0x9db   : > { %v2446_v51 = vadd.f32 %v4300_v47, %v2445_v44 }
 0x9dd   : > { %v2503_v54 = vpack.c.bf16 %v2446_v51, %v2444_v58 }
 0x9df   : > { %v2518_v60 = vsel %vm1485_vm7, %v2503_v54, 0 }
 0x9e2   : > { %v2448_v46 = vpop.f32.mrf.mxu1 }
 0x9e3   : > { %v2449_v50 = vadd.f32 %v4300_v47, %v2448_v46 }
 0x9ea   : > { %v2450_v49 = vpop.f32.mrf.mxu1 }
 0x9eb   : > { %v2451_v52 = vadd.f32 %v4300_v47, %v2450_v49 }
 0x9ed   : > { %v2504_v53 = vpack.c.bf16 %v2451_v52, %v2449_v50 }
 0x9ef   : > { %v2521_v55 = vsel %vm1485_vm7, %v2504_v53, 0 }
 0x9f0   : > { %2528 = vmatpush.bf16.xpose.msrb.mxu0 %v2521_v55 }
 0x9f8   : > { %2529 = vmatpush.bf16.xpose.msrb.mxu0 %v2518_v60 }
 0xa00   : > { %2530 = vmatpush.bf16.xpose.msrb.mxu0 %v2515_v57 }
 0xa09   : > { %v2211_v5 = vpop.xlane.xlu0 %2210 }
 0xa0a   : > { %v2227_v8 = vsub.f32 %v2203_v4, %v2211_v5 }
 0xa0c   : > { %v2233_v18 = vmul.f32 1.442695, %v2227_v8  ;;  %v4223_v8 = vld [vmem:[%s4586_s19 + $0x38] sm:$0xff] }
 0xa0d   : > { %2481 = vmatpush.bf16.msra.mxu2 %v4223_v8 }
 0xa0e   : > { %4358 = vpow2.f32 %v2233_v18  ;;  %v4222_v18 = vld [vmem:[%s4586_s19 + $0x30] sm:$0xff] }
 0xa11   : > { %v2214_v20 = vpop.xlane.xlu1 %2213  ;;  %2482 = vmatpush.bf16.msra.mxu2 %v4222_v18 }
 0xa12   : > { %v2228_v21 = vsub.f32 %v2204_v7, %v2214_v20 }
 0xa14   : > { %v4359_v23 = vpop.eup %4358  ;;  %v2235_v24 = vmul.f32 1.442695, %v2228_v21 }
 0xa15   : > { %v2245_v26 = vsel %vm1144_vm5, %v4359_v23, 0.0 }
 0xa16   : > { %4360 = vpow2.f32 %v2235_v24  ;;  %2246 = vadd.xlane.f32.xlu0 %v2245_v26 }
 0xa19   : > { %v2217_v27 = vpop.xlane.xlu2 %2216 }
 0xa1a   : > { %v2229_v29 = vsub.f32 %v2205_v19, %v2217_v27 }
 0xa1c   : > { %v4361_v32 = vpop.eup %4360  ;;  %v2237_v31 = vmul.f32 1.442695, %v2229_v29 }
 0xa1d   : > { %v2248_v33 = vsel %vm1144_vm5, %v4361_v32, 0.0 }
 0xa1e   : > { %4362 = vpow2.f32 %v2237_v31  ;;  %2249 = vadd.xlane.f32.xlu1 %v2248_v33 }
 0xa21   : > { %v2220_v40 = vpop.xlane.xlu0 %2219 }
 0xa22   : > { %v2230_v4 = vsub.f32 %v2206_v22, %v2220_v40 }
 0xa24   : > { %v4363_v42 = vpop.eup %4362  ;;  %v2239_v44 = vmul.f32 1.442695, %v2230_v4 }
 0xa25   : > { %v2251_v7 = vsel %vm1144_vm5, %v4363_v42, 0.0 }
 0xa26   : > { %4364 = vpow2.f32 %v2239_v44  ;;  %2252 = vadd.xlane.f32.xlu2 %v2251_v7 }
 0xa29   : > { %v2223_v46 = vpop.xlane.xlu1 %2222 }
 0xa2a   : > { %v2231_v47 = vsub.f32 %v2207_v25, %v2223_v46 }
 0xa2c   : > { %v4365_v49 = vpop.eup %4364  ;;  %v2241_v50 = vmul.f32 1.442695, %v2231_v47 }
 0xa2d   : > { %v2254_v19 = vsel %vm1144_vm5, %v4365_v49, 0.0 }
 0xa2e   : > { %4366 = vpow2.f32 %v2241_v50  ;;  %2255 = vadd.xlane.f32.xlu0 %v2254_v19  ;;  %v2392_v19 = vpop.f32.mrf.mxu3 }
 0xa31   : > { %v2226_v52 = vpop.xlane.xlu2 %2225 }
 0xa32   : > { %v2232_v53 = vsub.f32 %v4950_v28, %v2226_v52 }
 0xa34   : > { %v4367_v51 = vpop.eup %4366  ;;  %v2243_v55 = vmul.f32 1.442695, %v2232_v53 }
 0xa35   : > { %v2257_v22 = vsel %vm1144_vm5, %v4367_v51, 0.0 }
 0xa36   : > { %4368 = vpow2.f32 %v2243_v55  ;;  %2258 = vadd.xlane.f32.xlu1 %v2257_v22  ;;  %v2394_v55 = vpop.f32.mrf.mxu3 }
 0xa3c   : > { %v4369_v58 = vpop.eup %4368 }
 0xa3d   : > { %v2260_v25 = vsel %vm1144_vm5, %v4369_v58, 0.0 }
 0xa3e   : > { %2261 = vadd.xlane.f32.xlu2 %v2260_v25  ;;  %v2397_v25 = vpop.f32.mrf.mxu3 }
 0xa89   : > { %v2247_v54 = vpop.xlane.xlu0 %2246 }
 0xa8a   : > { %4370 = vrcp.f32 %v2247_v54 }
 0xa90   : > { %v4371_v60 = vpop.eup %4370 }
 0xa91   : > { %v2250_v59 = vpop.xlane.xlu1 %2249  ;;  %v2269_v62 = vmul.f32 %v4371_v60, %v4359_v23 }
 0xa92   : > { %4372 = vrcp.f32 %v2250_v59 }
 0xa98   : > { %v4373_v61 = vpop.eup %4372 }
 0xa99   : > { %v2270_v28 = vmul.f32 %v4373_v61, %v4361_v32  ;;  %v2253_v5 = vpop.xlane.xlu2 %2252 }
 0xa9a   : > { %4374 = vrcp.f32 %v2253_v5 }
 0xa9b   : > { %v2275_v57 = vpack.c.bf16 %v2270_v28, %v2269_v62  ;;  %v2399_v62 = vpop.f32.mrf.mxu3 }
 0xa9d   : > { %4020 = vmatmul.msk.bf16.vlgmr.msrb.gmra.mxu2 %vm1144_vm5, %v2275_v57 }
 0xaa0   : > { %v4375_v21 = vpop.eup %4374 }
 0xaa1   : > { %v2256_v20 = vpop.xlane.xlu0 %2255  ;;  %v2271_v26 = vmul.f32 %v4375_v21, %v4363_v42 }
 0xaa2   : > { %4376 = vrcp.f32 %v2256_v20 }
 0xaa3   : > { %v2402_v8 = vpop.f32.mrf.mxu3 }
 0xaa8   : > { %v4377_v24 = vpop.eup %4376 }
 0xaa9   : > { %v2272_v27 = vmul.f32 %v4377_v24, %v4365_v49  ;;  %v2259_v31 = vpop.xlane.xlu1 %2258 }
 0xaaa   : > { %4378 = vrcp.f32 %v2259_v31 }
 0xaab   : > { %v2276_v29 = vpack.c.bf16 %v2272_v27, %v2271_v26  ;;  %v2404_v24 = vpop.f32.mrf.mxu3 }
 0xaad   : > { %4021 = vmatmul.msk.bf16.gmra.mxu2 %vm1144_vm5, %v2276_v29  ;;  %v4301_v29 = vld [vmem:[%s4601_s6 + $0x3] ss:$0 sm:$0xff] }
 0xab0   : > { %v4379_v32 = vpop.eup %4378 }
 0xab1   : > { %v2262_v23 = vpop.xlane.xlu2 %2261  ;;  %v2273_v40 = vmul.f32 %v4379_v32, %v4367_v51 }
 0xab2   : > { %4380 = vrcp.f32 %v2262_v23 }
 0xab8   : > { %v4381_v33 = vpop.eup %4380 }
 0xab9   : > { %v2274_v4 = vmul.f32 %v4381_v33, %v4369_v58  ;;  %v4299_v58 = vld [vmem:[%s4591_s24 + $0x3] ss:$0 sm:$0xff] }
 0xaba   : > { %v2395_v54 = vadd.f32 %v4299_v58, %v2394_v55  ;;  %v2393_v59 = vadd.f32 %v4299_v58, %v2392_v19  ;;  %v2400_v57 = vadd.f32 %v4299_v58, %v2399_v62  ;;  %v2398_v5 = vadd.f32 %v4299_v58, %v2397_v25 }
 0xabb   : > { %v2277_v44 = vpack.c.bf16 %v2274_v4, %v2273_v40  ;;  %v2405_v26 = vadd.f32 %v4299_v58, %v2404_v24  ;;  %v2403_v27 = vadd.f32 %v4299_v58, %v2402_v8 }
 0xabc   : > { %v2499_v61 = vpack.c.bf16 %v2395_v54, %v2393_v59  ;;  %v2500_v20 = vpack.c.bf16 %v2400_v57, %v2398_v5 }
 0xabd   : > { %4022 = vmatmul.msk.bf16.gmra.mxu2 %vm1144_vm5, %v2277_v44  ;;  %v2501_v23 = vpack.c.bf16 %v2405_v26, %v2403_v27 }
 0xacd   : > { %4072 = vmatmul.msk.bf16.vlgmr.msra.gmra.mxu2 %vm927_vm0, %v4746_v3 }
 0xadd   : > { %4073 = vmatmul.msk.bf16.gmra.mxu2 %vm927_vm0, %v4768_v12 }
 0xaed   : > { %4074 = vmatmul.msk.bf16.gmra.mxu2 %vm927_vm0, %v4786_v17 }
 0xb20   : > { %v2299_v42 = vpop.f32.mrf.mxu2 }
 0xb28   : > { %v2301_v7 = vpop.f32.mrf.mxu2 }
 0xb29   : > { %v2314_v46 = vpack.c.bf16 %v2301_v7, %v2299_v42 }
 0xb2b   : > { %4024 = vmatmul.msk.bf16.vlgmr.msra.gmra.mxu0 %vm1485_vm7, %v2314_v46 }
 0xb30   : > { %v2304_v47 = vpop.f32.mrf.mxu2 }
 0xb38   : > { %v2306_v49 = vpop.f32.mrf.mxu2 }
 0xb39   : > { %v2315_v50 = vpack.c.bf16 %v2306_v49, %v2304_v47  ;;  %v2003_v49 = vadd.f32 %v4930_v39, %v4913_v30 }
 0xb3b   : > { %4025 = vmatmul.msk.bf16.gmra.mxu0 %vm1485_vm7, %v2315_v50 }
 0xb40   : > { %v2309_v52 = vpop.f32.mrf.mxu2 }
 0xb48   : > { %v2311_v53 = vpop.f32.mrf.mxu2 }
 0xb49   : > { %v2316_v51 = vpack.c.bf16 %v2311_v53, %v2309_v52  ;;  %v2008_v53 = vadd.f32 %v4936_v43, %v4918_v35 }
 0xb4b   : > { %4026 = vmatmul.msk.bf16.gmra.mxu0 %vm1485_vm7, %v2316_v51 }
 0xb50   : > { %v2484_v22 = vpop.f32.mrf.mxu2 }
 0xb51   : > { %v2485_v46 = vadd.f32 %v4301_v29, %v2484_v22  ;;  %v2013_v22 = vadd.f32 %v4940_v48, %v4924_v37 }
 0xb58   : > { %v2486_v60 = vpop.f32.mrf.mxu2 }
 0xb59   : > { %v2487_v42 = vadd.f32 %v4301_v29, %v2486_v60 }
 0xb5b   : > { %4075 = vmatmul.msk.bf16.vlgmr.msrb.gmra.mxu0 %vm1485_vm7, %v2499_v61  ;;  %v2622_v47 = vpack.c.bf16 %v2487_v42, %v2485_v46 }
 0xb60   : > { %v2489_v28 = vpop.f32.mrf.mxu2 }
 0xb61   : > { %v2490_v44 = vadd.f32 %v4301_v29, %v2489_v28 }
 0xb68   : > { %v2491_v18 = vpop.f32.mrf.mxu2 }
 0xb69   : > { %v2492_v40 = vadd.f32 %v4301_v29, %v2491_v18 }
 0xb6b   : > { %4076 = vmatmul.msk.bf16.gmra.mxu0 %vm1485_vm7, %v2500_v20  ;;  %v2623_v7 = vpack.c.bf16 %v2492_v40, %v2490_v44 }
 0xb70   : > { %v2494_v21 = vpop.f32.mrf.mxu2 }
 0xb71   : > { %v2495_v32 = vadd.f32 %v4301_v29, %v2494_v21 }
 0xb78   : > { %v2496_v31 = vpop.f32.mrf.mxu2 }
 0xb79   : > { %v2497_v33 = vadd.f32 %v4301_v29, %v2496_v31 }
 0xb7b   : > { %v2624_v4 = vpack.c.bf16 %v2497_v33, %v2495_v32  ;;  %4077 = vmatmul.msk.bf16.gmra.mxu0 %vm1485_vm7, %v2501_v23 }
 0xb7d   : > { %2639 = vmatpush.bf16.msrb.mxu3 %v2624_v4 }
 0xb81   : > { %2640 = vmatpush.bf16.msrb.mxu3 %v2623_v7 }
 0xb85   : > { %2641 = vmatpush.bf16.msrb.mxu3 %v2622_v47 }
 0xba8   : > { %v2340_v50 = vpop.f32.mrf.mxu0 }
 0xba9   : > { %v4988_v19 = vadd.f32 %v2340_v50, %v2003_v49 }
 0xbb0   : > { %v4990_v52 = vpop.f32.mrf.mxu0 }
 0xbb8   : > { %v2345_v51 = vpop.f32.mrf.mxu0 }
 0xbb9   : > { %v4994_v55 = vadd.f32 %v2345_v51, %v2008_v53 }
 0xbc0   : > { %v4996_v58 = vpop.f32.mrf.mxu0 }
 0xbc8   : > { %v2350_v25 = vpop.f32.mrf.mxu0 }
 0xbc9   : > { %v5000_v54 = vadd.f32 %v2350_v25, %v2013_v22 }
 0xbd0   : > { %v5002_v30 = vpop.f32.mrf.mxu0 }
 0xbd8   : > { %v2532_v39 = vpop.f32.mrf.mxu0 }
 0xbd9   : > { %v2547_v59 = vmul.f32 0.35355338, %v2532_v39 }
 0xbdb   : > { %v2553_v60 = vsel %vm1144_vm5, %v2547_v59, -inf }
 0xbdc   : > { %2554 = vmax.xlane.f32.xlu0 %v2553_v60 }
 0xbe0   : > { %v2534_v61 = vpop.f32.mrf.mxu0 }
 0xbe1   : > { %v2548_v35 = vmul.f32 0.35355338, %v2534_v61 }
 0xbe3   : > { %v2556_v43 = vsel %vm1144_vm5, %v2548_v35, -inf }
 0xbe4   : > { %2557 = vmax.xlane.f32.xlu1 %v2556_v43 }
 0xbe8   : > { %v2537_v62 = vpop.f32.mrf.mxu0 }
 0xbe9   : > { %v2549_v28 = vmul.f32 0.35355338, %v2537_v62 }
 0xbeb   : > { %v2559_v57 = vsel %vm1144_vm5, %v2549_v28, -inf }
 0xbec   : > { %2560 = vmax.xlane.f32.xlu2 %v2559_v57 }
 0xbf0   : > { %v2539_v37 = vpop.f32.mrf.mxu0 }
 0xbf1   : > { %v2550_v48 = vmul.f32 0.35355338, %v2539_v37 }
 0xbf3   : > { %v2562_v5 = vsel %vm1144_vm5, %v2550_v48, -inf }
 0xbf4   : > { %2563 = vmax.xlane.f32.xlu0 %v2562_v5 }
 0xbf8   : > { %v2542_v8 = vpop.f32.mrf.mxu0 }
 0xbf9   : > { %v2551_v18 = vmul.f32 0.35355338, %v2542_v8 }
 0xbfb   : > { %v2565_v20 = vsel %vm1144_vm5, %v2551_v18, -inf }
 0xbfc   : > { %2566 = vmax.xlane.f32.xlu1 %v2565_v20 }
 0xc00   : > { %v2544_v21 = vpop.f32.mrf.mxu0 }
 0xc01   : > { %v2552_v24 = vmul.f32 0.35355338, %v2544_v21 }
 0xc03   : > { %v2568_v26 = vsel %vm1144_vm5, %v2552_v24, -inf }
 0xc04   : > { %2569 = vmax.xlane.f32.xlu2 %v2568_v26 }
 0xc4f   : > { %v2555_v27 = vpop.xlane.xlu0 %2554 }
 0xc50   : > { %v2571_v29 = vsub.f32 %v2547_v59, %v2555_v27 }
 0xc52   : > { %v2577_v31 = vmul.f32 1.442695, %v2571_v29  ;;  %v4081_v29 = vld [vmem:[%s5320_s15 + $0xc] sm:$0xf] }
 0xc54   : > { %4382 = vpow2.f32 %v2577_v31  ;;  %v2673_v31 = vsel %vm1008_vm1, %v4081_v29, 0 }
 0xc55   : > { %2682 = vmatpush.bf16.msrb.mxu1 %v2673_v31 }
 0xc57   : > { %v2558_v23 = vpop.xlane.xlu1 %2557 }
 0xc58   : > { %v2572_v32 = vsub.f32 %v2548_v35, %v2558_v23 }
 0xc5a   : > { %v4383_v33 = vpop.eup %4382  ;;  %v2579_v40 = vmul.f32 1.442695, %v2572_v32 }
 0xc5b   : > { %v2589_v4 = vsel %vm1144_vm5, %v4383_v33, 0.0 }
 0xc5c   : > { %4384 = vpow2.f32 %v2579_v40  ;;  %2590 = vadd.xlane.f32.xlu0 %v2589_v4 }
 0xc5f   : > { %v2561_v44 = vpop.xlane.xlu2 %2560 }
 0xc60   : > { %v2573_v42 = vsub.f32 %v2549_v28, %v2561_v44 }
 0xc62   : > { %v4385_v7 = vpop.eup %4384  ;;  %v2581_v46 = vmul.f32 1.442695, %v2573_v42 }
 0xc63   : > { %v2592_v47 = vsel %vm1144_vm5, %v4385_v7, 0.0 }
 0xc64   : > { %4386 = vpow2.f32 %v2581_v46  ;;  %2593 = vadd.xlane.f32.xlu1 %v2592_v47 }
 0xc67   : > { %v2564_v49 = vpop.xlane.xlu0 %2563 }
 0xc68   : > { %v2574_v50 = vsub.f32 %v2550_v48, %v2564_v49 }
 0xc6a   : > { %v4387_v53 = vpop.eup %4386  ;;  %v2583_v51 = vmul.f32 1.442695, %v2574_v50 }
 0xc6b   : > { %v2595_v22 = vsel %vm1144_vm5, %v4387_v53, 0.0 }
 0xc6c   : > { %4388 = vpow2.f32 %v2583_v51  ;;  %2596 = vadd.xlane.f32.xlu2 %v2595_v22 }
 0xc6f   : > { %v2567_v25 = vpop.xlane.xlu1 %2566 }
 0xc70   : > { %v2575_v39 = vsub.f32 %v2551_v18, %v2567_v25 }
 0xc72   : > { %v4389_v59 = vpop.eup %4388  ;;  %v2585_v60 = vmul.f32 1.442695, %v2575_v39  ;;  %v4235_v39 = vld [vmem:[%s5321_s16 + $0x8] sm:$0xff] }
 0xc73   : > { %v2598_v61 = vsel %vm1144_vm5, %v4389_v59, 0.0  ;;  %3269 = vmatpush.bf16.msra.mxu1 %v4235_v39 }
 0xc74   : > { %4390 = vpow2.f32 %v2585_v60  ;;  %2599 = vadd.xlane.f32.xlu0 %v2598_v61 }
 0xc77   : > { %v2570_v35 = vpop.xlane.xlu2 %2569 }
 0xc78   : > { %v2576_v43 = vsub.f32 %v2552_v24, %v2570_v35 }
 0xc7a   : > { %v4391_v62 = vpop.eup %4390  ;;  %v2587_v28 = vmul.f32 1.442695, %v2576_v43 }
 0xc7b   : > { %v2601_v57 = vsel %vm1144_vm5, %v4391_v62, 0.0 }
 0xc7c   : > { %4392 = vpow2.f32 %v2587_v28  ;;  %2602 = vadd.xlane.f32.xlu1 %v2601_v57  ;;  %v4302_v57 = vld [vmem:[%s5322_s18] ss:$0 sm:$0xff]  ;;  %s5331_s18 = sld [smem:[#allocation11_spill]] }
 0xc82   : > { %v4393_v37 = vpop.eup %4392 }
 0xc83   : > { %v2604_v48 = vsel %vm1144_vm5, %v4393_v37, 0.0 }
 0xc84   : > { %2605 = vadd.xlane.f32.xlu2 %v2604_v48 }
 0xccf   : > { %v2591_v5 = vpop.xlane.xlu0 %2590 }
 0xcd0   : > { %4394 = vrcp.f32 %v2591_v5 }
 0xcd6   : > { %v4395_v18 = vpop.eup %4394 }
 0xcd7   : > { %v2594_v8 = vpop.xlane.xlu1 %2593  ;;  %v2613_v21 = vmul.f32 %v4395_v18, %v4383_v33 }
 0xcd8   : > { %4396 = vrcp.f32 %v2594_v8  ;;  %v2005_v8 = vadd.f32 %v4932_v41, %v4916_v34 }
 0xcde   : > { %v4397_v20 = vpop.eup %4396 }
 0xcdf   : > { %v2614_v26 = vmul.f32 %v4397_v20, %v4385_v7  ;;  %v2597_v27 = vpop.xlane.xlu2 %2596  ;;  %v2356_v20 = vadd.f32 %v4990_v52, %v2005_v8  ;;  %v2358_v52 = vadd.f32 %v4996_v58, %v2010_v63  ;;  %v2360_v58 = vadd.f32 %v5002_v30, %v2015_v6 }
 0xce0   : > { %4398 = vrcp.f32 %v2597_v27 }
 0xce1   : > { %v2619_v24 = vpack.c.bf16 %v2614_v26, %v2613_v21 }
 0xce3   : > { %4078 = vmatmul.msk.bf16.vlgmr.msrb.gmra.mxu3 %vm1144_vm5, %v2619_v24 }
 0xce6   : > { %v4399_v32 = vpop.eup %4398 }
 0xce7   : > { %v2600_v23 = vpop.xlane.xlu0 %2599  ;;  %v2615_v4 = vmul.f32 %v4399_v32, %v4387_v53 }
 0xce8   : > { %4400 = vrcp.f32 %v2600_v23 }
 0xcee   : > { %v4401_v40 = vpop.eup %4400 }
 0xcef   : > { %v2616_v44 = vmul.f32 %v4401_v40, %v4389_v59  ;;  %v2603_v46 = vpop.xlane.xlu1 %2602  ;;  %v4234_v59 = vld [vmem:[%s5321_s16] sm:$0xff] }
 0xcf0   : > { %4402 = vrcp.f32 %v2603_v46  ;;  %3270 = vmatpush.bf16.msra.mxu1 %v4234_v59 }
 0xcf1   : > { %v2620_v42 = vpack.c.bf16 %v2616_v44, %v2615_v4  ;;  %v4525_v44 = vmov 32.0  }
 0xcf3   : > { %4079 = vmatmul.msk.bf16.gmra.mxu3 %vm1144_vm5, %v2620_v42 }
 0xcf6   : > { %v4403_v7 = vpop.eup %4402 }
 0xcf7   : > { %v2606_v33 = vpop.xlane.xlu2 %2605  ;;  %v2617_v49 = vmul.f32 %v4403_v7, %v4391_v62 }
 0xcf8   : > { %4404 = vrcp.f32 %v2606_v33 }
 0xcf9   : > { %4406 = vrcp.f32 %v4525_v44 }
 0xcfe   : > { %v4405_v47 = vpop.eup %4404 }
 0xcff   : > { %v2618_v50 = vmul.f32 %v4405_v47, %v4393_v37  ;;  %v4407_v38 = vpop.eup %4406 }
 0xd00   : > { %v2742_v56 = vmul.f32 32.0, %v4407_v38  ;;  %vm2746_vm8 = vweird.f32 %v4407_v38 }
 0xd01   : > { %v2621_v51 = vpack.c.bf16 %v2618_v50, %v2617_v49 }
 0xd02   : > { %v2743_v13 = vsub.f32 1.0, %v2742_v56 }
 0xd03   : > { %4080 = vmatmul.msk.bf16.gmra.mxu3 %vm1144_vm5, %v2621_v51 }
 0xd66   : > { %v2643_v22 = vpop.f32.mrf.mxu3 }
 0xd6e   : > { %v2645_v25 = vpop.f32.mrf.mxu3 }
 0xd6f   : > { %v2658_v53 = vpack.c.bf16 %v2645_v25, %v2643_v22 }
 0xd71   : > { %4082 = vmatmul.msk.bf16.vlgmr.msrb.gmra.mxu1 %vm1485_vm7, %v2658_v53 }
 0xd76   : > { %v2648_v60 = vpop.f32.mrf.mxu3 }
 0xd7e   : > { %v2650_v61 = vpop.f32.mrf.mxu3 }
 0xd7f   : > { %v2659_v35 = vpack.c.bf16 %v2650_v61, %v2648_v60 }
 0xd81   : > { %4083 = vmatmul.msk.bf16.gmra.mxu1 %vm1485_vm7, %v2659_v35 }
 0xd86   : > { %v2653_v43 = vpop.f32.mrf.mxu3 }
 0xd8e   : > { %v2655_v62 = vpop.f32.mrf.mxu3 }
 0xd8f   : > { %v2660_v28 = vpack.c.bf16 %v2655_v62, %v2653_v43 }
 0xd91   : > { %4084 = vmatmul.msk.bf16.gmra.mxu1 %vm1485_vm7, %v2660_v28 }
 0xda1   : > { %4147 = vmatmul.msk.bf16.vlgmr.msra.gmra.mxu1 %vm927_vm0, %v4746_v3 }
 0xdb1   : > { %4148 = vmatmul.msk.bf16.gmra.mxu1 %vm927_vm0, %v4768_v12 }
 0xdc1   : > { %4149 = vmatmul.msk.bf16.gmra.mxu1 %vm927_vm0, %v4786_v17 }
 0xdee   : > { %v2684_v37 = vpop.f32.mrf.mxu1 }
 0xdef   : > { %v2699_v48 = vadd.f32 %v2684_v37, %v4988_v19 }
 0xdf1   : > { %v2709_v5 = vadd.f32 %v4302_v57, %v2699_v48 }
 0xdf3   : > { %v2715_v18 = vadd.f32 %v2709_v5, %v1329_v1 }
 0xdf5   : > { %v2723_v3 = vsel %vm927_vm0, %v2715_v18, 0.0 }
 0xdf6   : > { %2724 = vadd.xlane.f32.xlu0 %v2723_v3  ;;  %v2686_v12 = vpop.f32.mrf.mxu1 }
 0xdf7   : > { %v2700_v21 = vadd.f32 %v2686_v12, %v2356_v20 }
 0xdf9   : > { %v2710_v26 = vadd.f32 %v4302_v57, %v2700_v21 }
 0xdfb   : > { %v2716_v17 = vadd.f32 %v2710_v26, %v1330_v2  ;;  %v4225_v26 = vld [vmem:[%s5323_s22 + $0x8] sm:$0xff] }
 0xdfc   : > { %2918 = vmatpush.bf16.msrb.mxu2 %v4225_v26 }
 0xdfd   : > { %v2726_v19 = vsel %vm927_vm0, %v2716_v17, 0.0 }
 0xdfe   : > { %2727 = vadd.xlane.f32.xlu1 %v2726_v19  ;;  %v2689_v24 = vpop.f32.mrf.mxu1 }
 0xdff   : > { %v2701_v34 = vadd.f32 %v2689_v24, %v4994_v55 }
 0xe01   : > { %v2711_v41 = vadd.f32 %v4302_v57, %v2701_v34  ;;  %v4224_v34 = vld [vmem:[%s5323_s22] sm:$0xff] }
 0xe02   : > { %2919 = vmatpush.bf16.msrb.mxu2 %v4224_v34 }
 0xe03   : > { %v2717_v1 = vadd.f32 %v2711_v41, %v1331_v10 }
 0xe05   : > { %v2729_v27 = vsel %vm927_vm0, %v2717_v1, 0.0 }
 0xe06   : > { %2730 = vadd.xlane.f32.xlu2 %v2729_v27  ;;  %v2691_v0 = vpop.f32.mrf.mxu1 }
 0xe07   : > { %v2702_v2 = vadd.f32 %v2691_v0, %v2358_v52 }
 0xe09   : > { %v2712_v29 = vadd.f32 %v4302_v57, %v2702_v2 }
 0xe0b   : > { %v2718_v31 = vadd.f32 %v2712_v29, %v1332_v11 }
 0xe0d   : > { %v2732_v55 = vsel %vm927_vm0, %v2718_v31, 0.0 }
 0xe0e   : > { %2733 = vadd.xlane.f32.xlu0 %v2732_v55  ;;  %v2694_v23 = vpop.f32.mrf.mxu1 }
 0xe0f   : > { %v2703_v36 = vadd.f32 %v2694_v23, %v5000_v54 }
 0xe11   : > { %v2713_v45 = vadd.f32 %v4302_v57, %v2703_v36 }
 0xe13   : > { %v2719_v10 = vadd.f32 %v2713_v45, %v1333_v15  ;;  %v2744_v15 = vmul.f32 %v4407_v38, %v2743_v13 }
 0xe15   : > { %v2735_v32 = vsel %vm927_vm0, %v2719_v10, 0.0  ;;  %v2745_v42 = vadd.f32 %v4407_v38, %v2744_v15 }
 0xe16   : > { %v2696_v40 = vpop.f32.mrf.mxu1  ;;  %2736 = vadd.xlane.f32.xlu1 %v2735_v32 }
 0xe17   : > { %v2704_v9 = vadd.f32 %v2696_v40, %v2360_v58  ;;  %v5063_v30 = vsel %vm2746_vm8, %v4407_v38, %v2745_v42 }
 0xe19   : > { %v2714_v11 = vadd.f32 %v4302_v57, %v2704_v9 }
 0xe1b   : > { %v2720_v4 = vadd.f32 %v2714_v11, %v1334_v16 }
 0xe1d   : > { %v2738_v54 = vsel %vm927_vm0, %v2720_v4, 0.0 }
 0xe1e   : > { %2739 = vadd.xlane.f32.xlu2 %v2738_v54  ;;  %v5108_v54 = vld [vmem:[%s5324_s23] ss:$0 sm:$0xff]  ;;  %s3791_s23 = sshll.u32 %s5333_s10, 3 }
 0xe69   : > { %v2725_v46 = vpop.xlane.xlu0 %2724 }
 0xe6a   : > { %v2748_v33 = vmul.f32 %v5063_v30, %v2725_v46  ;;  %v5112_v46 = vld [vmem:[%s5325_s26] ss:$0 sm:$0xff]  ;;  %s900_s26 = scalar_lea.vmem %s4681_s4, %s3791_s23 }
 0xe6c   : > { %v5066_v7 = vsub.f32 %v2715_v18, %v2748_v33 }
 0xe6e   : > { %v2760_v14 = vmul.f32 %v5066_v7, %v5066_v7 }
 0xe70   : > { %v2766_v16 = vsel %vm927_vm0, %v2760_v14, 0.0 }
 0xe71   : > { %v2728_v47 = vpop.xlane.xlu1 %2727  ;;  %2767 = vadd.xlane.f32.xlu0 %v2766_v16 }
 0xe72   : > { %v2749_v49 = vmul.f32 %v5063_v30, %v2728_v47 }
 0xe74   : > { %v5072_v50 = vsub.f32 %v2716_v17, %v2749_v49 }
 0xe76   : > { %v2761_v51 = vmul.f32 %v5072_v50, %v5072_v50 }
 0xe78   : > { %v2769_v22 = vsel %vm927_vm0, %v2761_v51, 0.0 }
 0xe79   : > { %v2731_v25 = vpop.xlane.xlu2 %2730  ;;  %2770 = vadd.xlane.f32.xlu1 %v2769_v22 }
 0xe7a   : > { %v2750_v53 = vmul.f32 %v5063_v30, %v2731_v25 }
 0xe7c   : > { %v5078_v39 = vsub.f32 %v2717_v1, %v2750_v53 }
 0xe7e   : > { %v2762_v59 = vmul.f32 %v5078_v39, %v5078_v39 }
 0xe80   : > { %v2772_v60 = vsel %vm927_vm0, %v2762_v59, 0.0 }
 0xe81   : > { %v2734_v61 = vpop.xlane.xlu0 %2733  ;;  %2773 = vadd.xlane.f32.xlu2 %v2772_v60 }
 0xe82   : > { %v2751_v35 = vmul.f32 %v5063_v30, %v2734_v61 }
 0xe84   : > { %v5084_v43 = vsub.f32 %v2718_v31, %v2751_v35 }
 0xe86   : > { %v2763_v62 = vmul.f32 %v5084_v43, %v5084_v43 }
 0xe88   : > { %v2775_v28 = vsel %vm927_vm0, %v2763_v62, 0.0  ;;  %v4233_v62 = vld [vmem:[%s5326_s28 + $0x38] sm:$0xff] }
 0xe89   : > { %2776 = vadd.xlane.f32.xlu0 %v2775_v28  ;;  %v2737_v57 = vpop.xlane.xlu1 %2736  ;;  %3013 = vmatpush.bf16.msra.mxu0 %v4233_v62 }
 0xe8a   : > { %v2752_v37 = vmul.f32 %v5063_v30, %v2737_v57 }
 0xe8c   : > { %v5090_v48 = vsub.f32 %v2719_v10, %v2752_v37 }
 0xe8e   : > { %v2764_v5 = vmul.f32 %v5090_v48, %v5090_v48 }
 0xe90   : > { %v2778_v8 = vsel %vm927_vm0, %v2764_v5, 0.0 }
 0xe91   : > { %v2740_v18 = vpop.xlane.xlu2 %2739  ;;  %2779 = vadd.xlane.f32.xlu1 %v2778_v8  ;;  %v4232_v8 = vld [vmem:[%s5326_s28 + $0x30] sm:$0xff] }
 0xe92   : > { %v2753_v20 = vmul.f32 %v5063_v30, %v2740_v18  ;;  %3014 = vmatpush.bf16.msra.mxu0 %v4232_v8  ;;  %v4306_v8 = vld [vmem:[%s5328_s2] ss:$0 sm:$0xff] }
 0xe94   : > { %v5096_v3 = vsub.f32 %v2720_v4, %v2753_v20 }
 0xe96   : > { %v2765_v12 = vmul.f32 %v5096_v3, %v5096_v3 }
 0xe98   : > { %v2781_v21 = vsel %vm927_vm0, %v2765_v12, 0.0 }
 0xe99   : > { %2782 = vadd.xlane.f32.xlu2 %v2781_v21 }
 0xee4   : > { %v2768_v17 = vpop.xlane.xlu0 %2767 }
 0xee5   : > { %v2784_v19 = vmul.f32 %v2768_v17, %v5063_v30 }
 0xee7   : > { %v2790_v24 = vadd.f32 1e-05, %v2784_v19  ;;  %v4231_v19 = vld [vmem:[%s5326_s28 + $0x28] sm:$0xff] }
 0xee8   : > { %3015 = vmatpush.bf16.msra.mxu0 %v4231_v19 }
 0xee9   : > { %4408 = vrsqrt.f32 %v2790_v24  ;;  %vm2802_vm10 = vweird.f32 %v2790_v24 }
 0xeec   : > { %v2771_v41 = vpop.xlane.xlu1 %2770 }
 0xeed   : > { %v2785_v63 = vmul.f32 %v2771_v41, %v5063_v30 }
 0xeef   : > { %v4409_v1 = vpop.eup %4408  ;;  %v2791_v52 = vadd.f32 1e-05, %v2785_v63 }
 0xef0   : > { %v2797_v27 = vmul.f32 %v4409_v1, %v2790_v24  ;;  %vm2803_vm9 = vweird.f32 %v4409_v1 }
 0xef1   : > { %4410 = vrsqrt.f32 %v2791_v52  ;;  %vm2804_vm11 = vmor %vm2802_vm10, %vm2803_vm9  ;;  %vm2812_vm13 = vweird.f32 %v2791_v52 }
 0xef2   : > { %v2798_v0 = vmul.f32 %v4409_v1, %v2797_v27 }
 0xef4   : > { %v2799_v2 = vmul.f32 0.5, %v2798_v0  ;;  %v2774_v29 = vpop.xlane.xlu2 %2773 }
 0xef5   : > { %v2786_v31 = vmul.f32 %v2774_v29, %v5063_v30 }
 0xef6   : > { %v2800_v55 = vsub.f32 1.5, %v2799_v2 }
 0xef7   : > { %v4411_v23 = vpop.eup %4410  ;;  %v2792_v36 = vadd.f32 1e-05, %v2786_v31 }
 0xef8   : > { %v2801_v45 = vmul.f32 %v4409_v1, %v2800_v55  ;;  %v2807_v6 = vmul.f32 %v4411_v23, %v2791_v52  ;;  %vm2813_vm12 = vweird.f32 %v4411_v23 }
 0xef9   : > { %4412 = vrsqrt.f32 %v2792_v36  ;;  %vm2814_vm14 = vmor %vm2812_vm13, %vm2813_vm12  ;;  %vm2822_vm1 = vweird.f32 %v2792_v36 }
 0xefa   : > { %v2808_v10 = vmul.f32 %v4411_v23, %v2807_v6  ;;  %v2805_v58 = vsel %vm2804_vm11, %v4409_v1, %v2801_v45 }
 0xefb   : > { %v2856_v44 = vmul.f32 %v2805_v58, %v5066_v7 }
 0xefc   : > { %v2809_v32 = vmul.f32 0.5, %v2808_v10  ;;  %v2777_v40 = vpop.xlane.xlu0 %2776 }
 0xefd   : > { %v2787_v9 = vmul.f32 %v2777_v40, %v5063_v30  ;;  %v2865_v33 = vmul.f32 %v5108_v54, %v2856_v44 }
 0xefe   : > { %v2810_v11 = vsub.f32 1.5, %v2809_v32 }
 0xeff   : > { %v4413_v4 = vpop.eup %4412  ;;  %v2793_v38 = vadd.f32 1e-05, %v2787_v9  ;;  %v5119_v25 = vadd.f32 %v5112_v46, %v2865_v33 }
 0xf00   : > { %v2811_v56 = vmul.f32 %v4411_v23, %v2810_v11  ;;  %v2817_v13 = vmul.f32 %v4413_v4, %v2792_v36  ;;  %vm2823_vm15 = vweird.f32 %v4413_v4 }
 0xf01   : > { %4414 = vrsqrt.f32 %v2793_v38  ;;  %vm2824_vm2 = vmor %vm2822_vm1, %vm2823_vm15  ;;  %vm2832_vm4 = vweird.f32 %v2793_v38 }
 0xf02   : > { %v2815_v15 = vsel %vm2814_vm14, %v4411_v23, %v2811_v56  ;;  %v2818_v42 = vmul.f32 %v4413_v4, %v2817_v13  ;;  %v4228_v56 = vld [vmem:[%s5326_s28 + $0x10] sm:$0xff]  ;;  %v4227_v13 = vld [vmem:[%s5326_s28 + $0x8] sm:$0xff] }
 0xf03   : > { %v2857_v14 = vmul.f32 %v2815_v15, %v5072_v50 }
 0xf04   : > { %v2819_v16 = vmul.f32 0.5, %v2818_v42  ;;  %v2780_v47 = vpop.xlane.xlu1 %2779  ;;  %v4305_v42 = vld [vmem:[%s5327_s1] ss:$0 sm:$0xff] }
 0xf05   : > { %v2866_v49 = vmul.f32 %v5108_v54, %v2857_v14  ;;  %v2788_v7 = vmul.f32 %v2780_v47, %v5063_v30 }
 0xf06   : > { %v2820_v51 = vsub.f32 1.5, %v2819_v16 }
 0xf07   : > { %v4415_v22 = vpop.eup %4414  ;;  %v5122_v53 = vadd.f32 %v5112_v46, %v2866_v49  ;;  %v2794_v59 = vadd.f32 1e-05, %v2788_v7 }
 0xf08   : > { %v2821_v60 = vmul.f32 %v4413_v4, %v2820_v51  ;;  %v2827_v50 = vmul.f32 %v4415_v22, %v2793_v38  ;;  %vm2833_vm3 = vweird.f32 %v4415_v22  ;;  %v4229_v38 = vld [vmem:[%s5326_s28 + $0x18] sm:$0xff] }
 0xf09   : > { %v2885_v61 = vpack.c.bf16 %v5122_v53, %v5119_v25  ;;  %4416 = vrsqrt.f32 %v2794_v59  ;;  %vm2834_vm6 = vmor %vm2832_vm4, %vm2833_vm3  ;;  %vm2842_vm9 = vweird.f32 %v2794_v59 }
 0xf0a   : > { %v2828_v35 = vmul.f32 %v4415_v22, %v2827_v50  ;;  %v2825_v28 = vsel %vm2824_vm2, %v4413_v4, %v2821_v60 }
 0xf0b   : > { %4093 = vmatmul.msk.bf16.vlgmr.msrb.gmra.mxu2 %vm927_vm0, %v2885_v61  ;;  %v2858_v12 = vmul.f32 %v2825_v28, %v5078_v39  ;;  %v4230_v39 = vld [vmem:[%s5326_s28 + $0x20] sm:$0xff] }
 0xf0c   : > { %v2829_v57 = vmul.f32 0.5, %v2828_v35  ;;  %v2783_v37 = vpop.xlane.xlu2 %2782  ;;  %3016 = vmatpush.bf16.msra.mxu0 %v4230_v39 }
 0xf0d   : > { %v2789_v5 = vmul.f32 %v2783_v37, %v5063_v30  ;;  %v2867_v63 = vmul.f32 %v5108_v54, %v2858_v12 }
 0xf0e   : > { %v2830_v18 = vsub.f32 1.5, %v2829_v57 }
 0xf0f   : > { %v4417_v20 = vpop.eup %4416  ;;  %v2795_v21 = vadd.f32 1e-05, %v2789_v5  ;;  %v5137_v2 = vadd.f32 %v5112_v46, %v2867_v63 }
 0xf10   : > { %v2831_v26 = vmul.f32 %v4415_v22, %v2830_v18  ;;  %v2837_v17 = vmul.f32 %v4417_v20, %v2794_v59  ;;  %vm2843_vm8 = vweird.f32 %v4417_v20  ;;  %3017 = vmatpush.bf16.msra.mxu0 %v4229_v38 }
 0xf11   : > { %4418 = vrsqrt.f32 %v2795_v21  ;;  %vm2844_vm10 = vmor %vm2842_vm9, %vm2843_vm8  ;;  %vm2852_vm12 = vweird.f32 %v2795_v21 }
 0xf12   : > { %v2835_v24 = vsel %vm2834_vm6, %v4415_v22, %v2831_v26  ;;  %v2838_v34 = vmul.f32 %v4417_v20, %v2837_v17 }
 0xf13   : > { %v2859_v41 = vmul.f32 %v2835_v24, %v5084_v43 }
 0xf14   : > { %v2839_v1 = vmul.f32 0.5, %v2838_v34  ;;  %3018 = vmatpush.bf16.msra.mxu0 %v4228_v56 }
 0xf15   : > { %v2868_v52 = vmul.f32 %v5108_v54, %v2859_v41 }
 0xf16   : > { %v2840_v27 = vsub.f32 1.5, %v2839_v1 }
 0xf17   : > { %v4419_v0 = vpop.eup %4418  ;;  %v5140_v29 = vadd.f32 %v5112_v46, %v2868_v52 }
 0xf18   : > { %v2841_v31 = vmul.f32 %v4417_v20, %v2840_v27  ;;  %v2847_v55 = vmul.f32 %v4419_v0, %v2795_v21  ;;  %vm2853_vm11 = vweird.f32 %v4419_v0  ;;  %3019 = vmatpush.bf16.msra.mxu0 %v4227_v13 }
 0xf19   : > { %v2886_v43 = vpack.c.bf16 %v5140_v29, %v5137_v2  ;;  %vm2854_vm13 = vmor %vm2852_vm12, %vm2853_vm11 }
 0xf1a   : > { %v2848_v23 = vmul.f32 %v4419_v0, %v2847_v55  ;;  %v2845_v36 = vsel %vm2844_vm10, %v4417_v20, %v2841_v31 }
 0xf1b   : > { %4094 = vmatmul.msk.bf16.gmra.mxu2 %vm927_vm0, %v2886_v43  ;;  %v2860_v10 = vmul.f32 %v2845_v36, %v5090_v48 }
 0xf1c   : > { %v2849_v45 = vmul.f32 0.5, %v2848_v23 }
 0xf1d   : > { %v2869_v9 = vmul.f32 %v5108_v54, %v2860_v10 }
 0xf1e   : > { %v2850_v6 = vsub.f32 1.5, %v2849_v45 }
 0xf1f   : > { %v2878_v4 = vadd.f32 %v5112_v46, %v2869_v9 }
 0xf20   : > { %v2851_v58 = vmul.f32 %v4419_v0, %v2850_v6 }
 0xf22   : > { %v2855_v32 = vsel %vm2854_vm13, %v4419_v0, %v2851_v58 }
 0xf23   : > { %v2861_v40 = vmul.f32 %v2855_v32, %v5096_v3  ;;  %v4226_v3 = vld [vmem:[%s5326_s28] sm:$0xff] }
 0xf24   : > { %3020 = vmatpush.bf16.msra.mxu0 %v4226_v3 }
 0xf25   : > { %v2870_v11 = vmul.f32 %v5108_v54, %v2861_v40 }
 0xf27   : > { %v5151_v44 = vadd.f32 %v5112_v46, %v2870_v11 }
 0xf29   : > { %v2887_v48 = vpack.c.bf16 %v5151_v44, %v2878_v4 }
 0xf2b   : > { %4095 = vmatmul.msk.bf16.gmra.mxu2 %vm927_vm0, %v2887_v48 }
 0xf8e   : > { %v2921_v15 = vpop.f32.mrf.mxu2 }
 0xf8f   : > { %v2922_v54 = vadd.f32 %v4305_v42, %v2921_v15 }
 0xf91   : > { %v2936_v16 = vmax.f32 %v2922_v54, 0.0 }
 0xf96   : > { %v2923_v33 = vpop.f32.mrf.mxu2 }
 0xf97   : > { %v2924_v14 = vadd.f32 %v4305_v42, %v2923_v33 }
 0xf99   : > { %v2937_v46 = vmax.f32 %v2924_v14, 0.0 }
 0xf9b   : > { %v2959_v47 = vpack.c.bf16 %v2937_v46, %v2936_v16 }
 0xf9d   : > { %3021 = vmatmul.bf16.vlgmr.msra.gmra.mxu0 %v2959_v47 }
 0xf9e   : > { %v2926_v49 = vpop.f32.mrf.mxu2 }
 0xf9f   : > { %v2927_v7 = vadd.f32 %v4305_v42, %v2926_v49 }
 0xfa1   : > { %v2938_v59 = vmax.f32 %v2927_v7, 0.0 }
 0xfa6   : > { %v2928_v51 = vpop.f32.mrf.mxu2 }
 0xfa7   : > { %v2929_v22 = vadd.f32 %v4305_v42, %v2928_v51 }
 0xfa9   : > { %v2939_v60 = vmax.f32 %v2929_v22, 0.0 }
 0xfab   : > { %v2960_v50 = vpack.c.bf16 %v2939_v60, %v2938_v59 }
 0xfad   : > { %3026 = vmatmul.bf16.gmra.mxu0 %v2960_v50  ;;  %v4237_v50 = vld [vmem:[%s5329_s0 + $0x8] sm:$0xff] }
 0xfae   : > { %v2931_v61 = vpop.f32.mrf.mxu2  ;;  %3233 = vmatpush.bf16.msra.mxu3 %v4237_v50 }
 0xfaf   : > { %v2932_v35 = vadd.f32 %v4305_v42, %v2931_v61 }
 0xfb1   : > { %v2940_v57 = vmax.f32 %v2932_v35, 0.0 }
 0xfb6   : > { %v2933_v62 = vpop.f32.mrf.mxu2 }
 0xfb7   : > { %v2934_v28 = vadd.f32 %v4305_v42, %v2933_v62 }
 0xfb9   : > { %v2941_v37 = vmax.f32 %v2934_v28, 0.0  ;;  %v4236_v28 = vld [vmem:[%s5329_s0] sm:$0xff] }
 0xfba   : > { %3234 = vmatpush.bf16.msra.mxu3 %v4236_v28 }
 0xfbb   : > { %v2961_v5 = vpack.c.bf16 %v2941_v37, %v2940_v57 }
 0xfbd   : > { %3031 = vmatmul.bf16.gmra.mxu0 %v2961_v5 }
0x101a   : > { %v3022_v18 = vpop.f32.mrf.mxu0 }
0x101b   : > { %v3023_v20 = vadd.f32 %v4306_v8, %v3022_v18 }
0x101d   : > { %v3037_v12 = vadd.f32 %v3023_v20, %v5119_v25 }
0x101f   : > { %v3045_v21 = vsel %vm927_vm0, %v3037_v12, 0.0 }
0x1020   : > { %3046 = vadd.xlane.f32.xlu0 %v3045_v21 }
0x1022   : > { %v3024_v26 = vpop.f32.mrf.mxu0 }
0x1023   : > { %v3025_v17 = vadd.f32 %v4306_v8, %v3024_v26 }
0x1025   : > { %v3038_v19 = vadd.f32 %v3025_v17, %v5122_v53 }
0x1027   : > { %v3048_v24 = vsel %vm927_vm0, %v3038_v19, 0.0 }
0x1028   : > { %3049 = vadd.xlane.f32.xlu1 %v3048_v24 }
0x102a   : > { %v3027_v34 = vpop.f32.mrf.mxu0 }
0x102b   : > { %v3028_v41 = vadd.f32 %v4306_v8, %v3027_v34 }
0x102d   : > { %v3039_v63 = vadd.f32 %v3028_v41, %v5137_v2 }
0x102f   : > { %v3051_v1 = vsel %vm927_vm0, %v3039_v63, 0.0 }
0x1030   : > { %3052 = vadd.xlane.f32.xlu2 %v3051_v1 }
0x1032   : > { %v3029_v52 = vpop.f32.mrf.mxu0 }
0x1033   : > { %v3030_v39 = vadd.f32 %v4306_v8, %v3029_v52 }
0x1035   : > { %v3040_v25 = vadd.f32 %v3030_v39, %v5140_v29 }
0x1037   : > { %v3054_v27 = vsel %vm927_vm0, %v3040_v25, 0.0 }
0x1038   : > { %3055 = vadd.xlane.f32.xlu0 %v3054_v27 }
0x103a   : > { %v3032_v0 = vpop.f32.mrf.mxu0 }
0x103b   : > { %v3033_v31 = vadd.f32 %v4306_v8, %v3032_v0 }
0x103d   : > { %v3041_v53 = vadd.f32 %v3033_v31, %v2878_v4  ;;  %v5215_v31 = vld [vmem:[%s5330_s11] ss:$0 sm:$0xff] }
0x103f   : > { %v3057_v55 = vsel %vm927_vm0, %v3041_v53, 0.0 }
0x1040   : > { %3058 = vadd.xlane.f32.xlu1 %v3057_v55 }
0x1042   : > { %v3034_v43 = vpop.f32.mrf.mxu0 }
0x1043   : > { %v3035_v23 = vadd.f32 %v4306_v8, %v3034_v43 }
0x1045   : > { %v3042_v2 = vadd.f32 %v3035_v23, %v5151_v44 }
0x1047   : > { %v3060_v36 = vsel %vm927_vm0, %v3042_v2, 0.0 }
0x1048   : > { %3061 = vadd.xlane.f32.xlu2 %v3060_v36 }
0x1093   : > { %v3047_v45 = vpop.xlane.xlu0 %3046 }
0x1094   : > { %v3063_v6 = vmul.f32 %v3047_v45, %v5063_v30  ;;  %v5219_v45 = vld [vmem:[%s5331_s18] ss:$0 sm:$0xff] }
0x1096   : > { %v5173_v29 = vsub.f32 %v3037_v12, %v3063_v6 }
0x1098   : > { %v3075_v10 = vmul.f32 %v5173_v29, %v5173_v29 }
0x109a   : > { %v3081_v58 = vsel %vm927_vm0, %v3075_v10, 0.0 }
0x109b   : > { %3082 = vadd.xlane.f32.xlu0 %v3081_v58  ;;  %v3050_v32 = vpop.xlane.xlu1 %3049 }
0x109c   : > { %v3064_v40 = vmul.f32 %v3050_v32, %v5063_v30 }
0x109e   : > { %v5179_v9 = vsub.f32 %v3038_v19, %v3064_v40 }
0x10a0   : > { %v3076_v11 = vmul.f32 %v5179_v9, %v5179_v9 }
0x10a2   : > { %v3084_v4 = vsel %vm927_vm0, %v3076_v11, 0.0 }
0x10a3   : > { %v3053_v44 = vpop.xlane.xlu2 %3052  ;;  %3085 = vadd.xlane.f32.xlu1 %v3084_v4 }
0x10a4   : > { %v3065_v48 = vmul.f32 %v3053_v44, %v5063_v30 }
0x10a6   : > { %v5185_v38 = vsub.f32 %v3039_v63, %v3065_v48 }
0x10a8   : > { %v3077_v56 = vmul.f32 %v5185_v38, %v5185_v38 }
0x10aa   : > { %v3087_v13 = vsel %vm927_vm0, %v3077_v56, 0.0 }
0x10ab   : > { %v3056_v3 = vpop.xlane.xlu0 %3055  ;;  %3088 = vadd.xlane.f32.xlu2 %v3087_v13 }
0x10ac   : > { %v3066_v15 = vmul.f32 %v3056_v3, %v5063_v30 }
0x10ae   : > { %v5191_v42 = vsub.f32 %v3040_v25, %v3066_v15 }
0x10b0   : > { %v3078_v54 = vmul.f32 %v5191_v42, %v5191_v42 }
0x10b2   : > { %v3090_v33 = vsel %vm927_vm0, %v3078_v54, 0.0 }
0x10b3   : > { %3091 = vadd.xlane.f32.xlu0 %v3090_v33  ;;  %v3059_v14 = vpop.xlane.xlu1 %3058 }
0x10b4   : > { %v3067_v16 = vmul.f32 %v3059_v14, %v5063_v30 }
0x10b6   : > { %v5197_v46 = vsub.f32 %v3041_v53, %v3067_v16 }
0x10b8   : > { %v3079_v47 = vmul.f32 %v5197_v46, %v5197_v46 }
0x10ba   : > { %v3093_v49 = vsel %vm927_vm0, %v3079_v47, 0.0 }
0x10bb   : > { %v3062_v7 = vpop.xlane.xlu2 %3061  ;;  %3094 = vadd.xlane.f32.xlu1 %v3093_v49 }
0x10bc   : > { %v3068_v51 = vmul.f32 %v3062_v7, %v5063_v30 }
0x10be   : > { %v5203_v22 = vsub.f32 %v3042_v2, %v3068_v51 }
0x10c0   : > { %v3080_v59 = vmul.f32 %v5203_v22, %v5203_v22 }
0x10c2   : > { %v3096_v60 = vsel %vm927_vm0, %v3080_v59, 0.0 }
0x10c3   : > { %3097 = vadd.xlane.f32.xlu2 %v3096_v60 }
0x110e   : > { %v3083_v61 = vpop.xlane.xlu0 %3082 }
0x110f   : > { %v3099_v35 = vmul.f32 %v3083_v61, %v5063_v30 }
0x1111   : > { %v3105_v62 = vadd.f32 1e-05, %v3099_v35 }
0x1113   : > { %4420 = vrsqrt.f32 %v3105_v62  ;;  %vm3117_vm15 = vweird.f32 %v3105_v62 }
0x1116   : > { %v3086_v57 = vpop.xlane.xlu1 %3085 }
0x1117   : > { %v3100_v37 = vmul.f32 %v3086_v57, %v5063_v30 }
0x1119   : > { %v4421_v5 = vpop.eup %4420  ;;  %v3106_v8 = vadd.f32 1e-05, %v3100_v37 }
0x111a   : > { %v3112_v18 = vmul.f32 %v4421_v5, %v3105_v62  ;;  %vm3118_vm14 = vweird.f32 %v4421_v5 }
0x111b   : > { %4422 = vrsqrt.f32 %v3106_v8  ;;  %vm3119_vm1 = vmor %vm3117_vm15, %vm3118_vm14  ;;  %vm3127_vm3 = vweird.f32 %v3106_v8 }
0x111c   : > { %v3113_v20 = vmul.f32 %v4421_v5, %v3112_v18 }
0x111e   : > { %v3114_v12 = vmul.f32 0.5, %v3113_v20  ;;  %v3089_v21 = vpop.xlane.xlu2 %3088 }
0x111f   : > { %v3101_v26 = vmul.f32 %v3089_v21, %v5063_v30 }
0x1120   : > { %v3115_v17 = vsub.f32 1.5, %v3114_v12 }
0x1121   : > { %v4423_v19 = vpop.eup %4422  ;;  %v3107_v24 = vadd.f32 1e-05, %v3101_v26 }
0x1122   : > { %v3116_v34 = vmul.f32 %v4421_v5, %v3115_v17  ;;  %v3122_v41 = vmul.f32 %v4423_v19, %v3106_v8  ;;  %vm3128_vm2 = vweird.f32 %v4423_v19 }
0x1123   : > { %4424 = vrsqrt.f32 %v3107_v24  ;;  %vm3129_vm4 = vmor %vm3127_vm3, %vm3128_vm2  ;;  %vm3137_vm8 = vweird.f32 %v3107_v24 }
0x1124   : > { %v3123_v63 = vmul.f32 %v4423_v19, %v3122_v41  ;;  %v3120_v1 = vsel %vm3119_vm1, %v4421_v5, %v3116_v34 }
0x1125   : > { %v3171_v53 = vmul.f32 %v3120_v1, %v5173_v29 }
0x1126   : > { %v3124_v52 = vmul.f32 0.5, %v3123_v63  ;;  %v3092_v39 = vpop.xlane.xlu0 %3091 }
0x1127   : > { %v3102_v25 = vmul.f32 %v3092_v39, %v5063_v30  ;;  %v3180_v6 = vmul.f32 %v5215_v31, %v3171_v53 }
0x1128   : > { %v3125_v27 = vsub.f32 1.5, %v3124_v52 }
0x1129   : > { %v4425_v0 = vpop.eup %4424  ;;  %v3108_v55 = vadd.f32 1e-05, %v3102_v25  ;;  %v3189_v44 = vadd.f32 %v5219_v45, %v3180_v6  ;;  %v3272_v25 = vpop.f32.mrf.mxu1 }
0x112a   : > { %v3126_v43 = vmul.f32 %v4423_v19, %v3125_v27  ;;  %v3132_v23 = vmul.f32 %v4425_v0, %v3107_v24  ;;  %vm3138_vm6 = vweird.f32 %v4425_v0 }
0x112b   : > { %4426 = vrsqrt.f32 %v3108_v55  ;;  %vm3139_vm9 = vmor %vm3137_vm8, %vm3138_vm6  ;;  %vm3147_vm11 = vweird.f32 %v3108_v55 }
0x112c   : > { %v3130_v2 = vsel %vm3129_vm4, %v4423_v19, %v3126_v43  ;;  %v3133_v36 = vmul.f32 %v4425_v0, %v3132_v23 }
0x112d   : > { %v3172_v10 = vmul.f32 %v3130_v2, %v5179_v9 }
0x112e   : > { %v3134_v58 = vmul.f32 0.5, %v3133_v36  ;;  %v3095_v32 = vpop.xlane.xlu1 %3094 }
0x112f   : > { %v3181_v40 = vmul.f32 %v5215_v31, %v3172_v10  ;;  %v3103_v29 = vmul.f32 %v3095_v32, %v5063_v30 }
0x1130   : > { %v3135_v11 = vsub.f32 1.5, %v3134_v58 }
0x1131   : > { %v4427_v4 = vpop.eup %4426  ;;  %v3190_v48 = vadd.f32 %v5219_v45, %v3181_v40  ;;  %v3109_v56 = vadd.f32 1e-05, %v3103_v29  ;;  %v3274_v27 = vpop.f32.mrf.mxu1 }
0x1132   : > { %v3136_v13 = vmul.f32 %v4425_v0, %v3135_v11  ;;  %v3142_v3 = vmul.f32 %v4427_v4, %v3108_v55  ;;  %vm3148_vm10 = vweird.f32 %v4427_v4 }
0x1133   : > { %v3203_v15 = vpack.c.bf16 %v3190_v48, %v3189_v44  ;;  %4428 = vrsqrt.f32 %v3109_v56  ;;  %vm3149_vm12 = vmor %vm3147_vm11, %vm3148_vm10  ;;  %vm3157_vm14 = vweird.f32 %v3109_v56 }
0x1134   : > { %v3143_v9 = vmul.f32 %v4427_v4, %v3142_v3  ;;  %v3140_v54 = vsel %vm3139_vm9, %v4425_v0, %v3136_v13 }
0x1135   : > { %4136 = vmatmul.msk.bf16.vlgmr.msra.gmra.mxu3 %vm927_vm0, %v3203_v15  ;;  %v3173_v7 = vmul.f32 %v3140_v54, %v5185_v38 }
0x1136   : > { %v3144_v33 = vmul.f32 0.5, %v3143_v9  ;;  %v3098_v14 = vpop.xlane.xlu2 %3097 }
0x1137   : > { %v3104_v16 = vmul.f32 %v3098_v14, %v5063_v30  ;;  %v3182_v62 = vmul.f32 %v5215_v31, %v3173_v7  ;;  %v4245_v14 = vld [vmem:[%s4666_s12 + $0x38] sm:$0xff] }
0x1138   : > { %v3145_v47 = vsub.f32 1.5, %v3144_v33  ;;  %3472 = vmatpush.bf16.msra.mxu2 %v4245_v14  ;;  %v4241_v7 = vld [vmem:[%s4666_s12 + $0x18] sm:$0xff] }
0x1139   : > { %v4429_v49 = vpop.eup %4428  ;;  %v3110_v51 = vadd.f32 1e-05, %v3104_v16  ;;  %v3191_v5 = vadd.f32 %v5219_v45, %v3182_v62  ;;  %v4244_v16 = vld [vmem:[%s4666_s12 + $0x30] sm:$0xff] }
0x113a   : > { %v3146_v59 = vmul.f32 %v4427_v4, %v3145_v47  ;;  %v3152_v60 = vmul.f32 %v4429_v49, %v3109_v56  ;;  %vm3158_vm13 = vweird.f32 %v4429_v49  ;;  %v4243_v47 = vld [vmem:[%s4666_s12 + $0x28] sm:$0xff] }
0x113b   : > { %4430 = vrsqrt.f32 %v3110_v51  ;;  %vm3159_vm15 = vmor %vm3157_vm14, %vm3158_vm13  ;;  %vm3167_vm2 = vweird.f32 %v3110_v51 }
0x113c   : > { %v3150_v50 = vsel %vm3149_vm12, %v4427_v4, %v3146_v59  ;;  %v3153_v61 = vmul.f32 %v4429_v49, %v3152_v60  ;;  %3473 = vmatpush.bf16.msra.mxu2 %v4244_v16  ;;  %v4239_v60 = vld [vmem:[%s4666_s12 + $0x8] sm:$0xff] }
0x113d   : > { %v3174_v35 = vmul.f32 %v3150_v50, %v5191_v42 }
0x113e   : > { %v3154_v28 = vmul.f32 0.5, %v3153_v61  ;;  %v4238_v61 = vld [vmem:[%s4666_s12] sm:$0xff] }
0x113f   : > { %v3183_v30 = vmul.f32 %v5215_v31, %v3174_v35 }
0x1140   : > { %v3155_v57 = vsub.f32 1.5, %v3154_v28  ;;  %3474 = vmatpush.bf16.msra.mxu2 %v4243_v47 }
0x1141   : > { %v4431_v37 = vpop.eup %4430  ;;  %v3192_v38 = vadd.f32 %v5219_v45, %v3183_v30 }
0x1142   : > { %v3156_v8 = vmul.f32 %v4429_v49, %v3155_v57  ;;  %v3162_v18 = vmul.f32 %v4431_v37, %v3110_v51  ;;  %vm3168_vm1 = vweird.f32 %v4431_v37  ;;  %v4240_v51 = vld [vmem:[%s4666_s12 + $0x10] sm:$0xff] }
0x1143   : > { %v3204_v20 = vpack.c.bf16 %v3192_v38, %v3191_v5  ;;  %vm3169_vm3 = vmor %vm3167_vm2, %vm3168_vm1 }
0x1144   : > { %v3163_v12 = vmul.f32 %v4431_v37, %v3162_v18  ;;  %v3160_v42 = vsel %vm3159_vm15, %v4429_v49, %v3156_v8  ;;  %v4242_v49 = vld [vmem:[%s4666_s12 + $0x20] sm:$0xff] }
0x1145   : > { %4137 = vmatmul.msk.bf16.gmra.mxu3 %vm927_vm0, %v3204_v20  ;;  %v3175_v17 = vmul.f32 %v3160_v42, %v5197_v46  ;;  %3475 = vmatpush.bf16.msra.mxu2 %v4242_v49 }
0x1146   : > { %v3164_v21 = vmul.f32 0.5, %v3163_v12 }
0x1147   : > { %v3184_v41 = vmul.f32 %v5215_v31, %v3175_v17 }
0x1148   : > { %v3165_v26 = vsub.f32 1.5, %v3164_v21 }
0x1149   : > { %v3193_v1 = vadd.f32 %v5219_v45, %v3184_v41  ;;  %3476 = vmatpush.bf16.msra.mxu2 %v4241_v7 }
0x114a   : > { %v3166_v19 = vmul.f32 %v4431_v37, %v3165_v26 }
0x114c   : > { %v3170_v24 = vsel %vm3169_vm3, %v4431_v37, %v3166_v19 }
0x114d   : > { %v3176_v34 = vmul.f32 %v3170_v24, %v5203_v22  ;;  %3477 = vmatpush.bf16.msra.mxu2 %v4240_v51 }
0x114f   : > { %v3185_v63 = vmul.f32 %v5215_v31, %v3176_v34  ;;  %v3277_v31 = vpop.f32.mrf.mxu1 }
0x1151   : > { %v3194_v52 = vadd.f32 %v5219_v45, %v3185_v63  ;;  %3478 = vmatpush.bf16.msra.mxu2 %v4239_v60 }
0x1153   : > { %v3205_v39 = vpack.c.bf16 %v3194_v52, %v3193_v1 }
0x1155   : > { %4138 = vmatmul.msk.bf16.gmra.mxu3 %vm927_vm0, %v3205_v39  ;;  %3479 = vmatpush.bf16.msra.mxu2 %v4238_v61 }
0x1157   : > { %v3279_v10 = vpop.f32.mrf.mxu1 }
0x115f   : > { %v3282_v4 = vpop.f32.mrf.mxu1 }
0x1167   : > { %v3284_v3 = vpop.f32.mrf.mxu1 }
0x11b8   : > { %v3236_v46 = vpop.f32.mrf.mxu3 }
0x11b9   : > { %v3273_v0 = vadd.f32 %v3272_v25, %v3236_v46 }
0x11bb   : > { %v5243_v53 = vmax.f32 %v3273_v0, 0.0 }
0x11bd   : > { %v3293_v22 = vmul.f32 %v5243_v53, %v5243_v53 }
0x11bf   : > { %3299 = vadd.xlane.f32.xlu0 %v3293_v22 }
0x11c0   : > { %v3238_v55 = vpop.f32.mrf.mxu3 }
0x11c1   : > { %v3275_v43 = vadd.f32 %v3274_v27, %v3238_v55 }
0x11c3   : > { %v5247_v23 = vmax.f32 %v3275_v43, 0.0 }
0x11c5   : > { %v3294_v2 = vmul.f32 %v5247_v23, %v5247_v23 }
0x11c7   : > { %3301 = vadd.xlane.f32.xlu1 %v3294_v2 }
0x11c8   : > { %v3241_v36 = vpop.f32.mrf.mxu3 }
0x11c9   : > { %v3278_v45 = vadd.f32 %v3277_v31, %v3241_v36 }
0x11cb   : > { %v5251_v6 = vmax.f32 %v3278_v45, 0.0 }
0x11cd   : > { %v3295_v58 = vmul.f32 %v5251_v6, %v5251_v6 }
0x11cf   : > { %3303 = vadd.xlane.f32.xlu2 %v3295_v58 }
0x11d0   : > { %v3243_v32 = vpop.f32.mrf.mxu3 }
0x11d1   : > { %v3280_v40 = vadd.f32 %v3279_v10, %v3243_v32 }
0x11d3   : > { %v5255_v29 = vmax.f32 %v3280_v40, 0.0 }
0x11d5   : > { %v3296_v11 = vmul.f32 %v5255_v29, %v5255_v29 }
0x11d7   : > { %3305 = vadd.xlane.f32.xlu0 %v3296_v11 }
0x11d8   : > { %v3246_v44 = vpop.f32.mrf.mxu3 }
0x11d9   : > { %v3283_v48 = vadd.f32 %v3282_v4, %v3246_v44 }
0x11db   : > { %v5259_v56 = vmax.f32 %v3283_v48, 0.0 }
0x11dd   : > { %v3297_v13 = vmul.f32 %v5259_v56, %v5259_v56 }
0x11df   : > { %3307 = vadd.xlane.f32.xlu1 %v3297_v13 }
0x11e0   : > { %v3248_v15 = vpop.f32.mrf.mxu3 }
0x11e1   : > { %v3285_v9 = vadd.f32 %v3284_v3, %v3248_v15 }
0x11e3   : > { %v5263_v54 = vmax.f32 %v3285_v9, 0.0 }
0x11e5   : > { %v3298_v33 = vmul.f32 %v5263_v54, %v5263_v54 }
0x11e7   : > { %3309 = vadd.xlane.f32.xlu2 %v3298_v33 }
0x1232   : > { %v3300_v59 = vpop.xlane.xlu0 %3299 }
0x1233   : > { %4432 = vrsqrt.f32 %v3300_v59  ;;  %vm3318_vm0 = vcmp.eq.f32.partialorder %v3300_v59, inf  ;;  %v3321_v21 = vand.u32 2147483648, %v3300_v59  ;;  %vm3320_vm4 = vcmp.eq.f32.partialorder %v3300_v59, 0.0 }
0x1239   : > { %v4433_v50 = vpop.eup %4432 }
0x123a   : > { %v3312_v35 = vmul.f32 %v4433_v50, %v3300_v59  ;;  %v3302_v62 = vpop.xlane.xlu1 %3301 }
0x123b   : > { %4434 = vrsqrt.f32 %v3302_v62  ;;  %vm3330_vm6 = vcmp.eq.f32.partialorder %v3302_v62, inf  ;;  %v3333_v39 = vand.u32 2147483648, %v3302_v62  ;;  %vm3332_vm8 = vcmp.eq.f32.partialorder %v3302_v62, 0.0 }
0x123c   : > { %v3313_v28 = vmul.f32 %v4433_v50, %v3312_v35 }
0x123e   : > { %v3314_v30 = vmul.f32 0.5, %v3313_v28 }
0x1240   : > { %v3315_v57 = vsub.f32 1.5, %v3314_v30 }
0x1241   : > { %v4435_v37 = vpop.eup %4434 }
0x1242   : > { %v3316_v5 = vmul.f32 %v4433_v50, %v3315_v57  ;;  %v3324_v38 = vmul.f32 %v4435_v37, %v3302_v62  ;;  %v3304_v8 = vpop.xlane.xlu2 %3303 }
0x1243   : > { %4436 = vrsqrt.f32 %v3304_v8  ;;  %vm3342_vm9 = vcmp.eq.f32.partialorder %v3304_v8, inf  ;;  %v3345_v40 = vand.u32 2147483648, %v3304_v8  ;;  %vm3344_vm10 = vcmp.eq.f32.partialorder %v3304_v8, 0.0 }
0x1244   : > { %v3317_v18 = vmul.f32 %v3316_v5, %v3300_v59  ;;  %v3325_v20 = vmul.f32 %v4435_v37, %v3324_v38 }
0x1246   : > { %v3326_v12 = vmul.f32 0.5, %v3325_v20  ;;  %v3319_v42 = vsel %vm3318_vm0, %v3300_v59, %v3317_v18 }
0x1247   : > { %v3322_v19 = vsel %vm3320_vm4, %v3321_v21, %v3319_v42 }
0x1248   : > { %v3327_v26 = vsub.f32 1.5, %v3326_v12  ;;  %v3383_v52 = vmax.f32 %v3322_v19, 1e-12 }
0x1249   : > { %v4437_v17 = vpop.eup %4436 }
0x124a   : > { %v3328_v24 = vmul.f32 %v4435_v37, %v3327_v26  ;;  %v3336_v34 = vmul.f32 %v4437_v17, %v3304_v8  ;;  %v3306_v41 = vpop.xlane.xlu0 %3305 }
0x124b   : > { %4438 = vrsqrt.f32 %v3306_v41  ;;  %vm3354_vm11 = vcmp.eq.f32.partialorder %v3306_v41, inf  ;;  %v3357_v7 = vand.u32 2147483648, %v3306_v41  ;;  %vm3356_vm12 = vcmp.eq.f32.partialorder %v3306_v41, 0.0 }
0x124c   : > { %v3329_v63 = vmul.f32 %v3328_v24, %v3302_v62  ;;  %v3337_v1 = vmul.f32 %v4437_v17, %v3336_v34  ;;  %4440 = vrcp.f32 %v3383_v52 }
0x124e   : > { %v3331_v25 = vsel %vm3330_vm6, %v3302_v62, %v3329_v63  ;;  %v3338_v27 = vmul.f32 0.5, %v3337_v1 }
0x124f   : > { %v3334_v46 = vsel %vm3332_vm8, %v3333_v39, %v3331_v25  ;;  %v4309_v39 = vld [vmem:[%s4671_s20] ss:$0 sm:$0xff] }
0x1250   : > { %v3384_v0 = vmax.f32 %v3334_v46, 1e-12  ;;  %v3339_v22 = vsub.f32 1.5, %v3338_v27 }
0x1251   : > { %v4439_v55 = vpop.eup %4438 }
0x1252   : > { %4442 = vrcp.f32 %v3384_v0  ;;  %v3340_v43 = vmul.f32 %v4437_v17, %v3339_v22  ;;  %v3348_v31 = vmul.f32 %v4439_v55, %v3306_v41  ;;  %v3308_v2 = vpop.xlane.xlu1 %3307  ;;  %v4441_v32 = vpop.eup %4440 }
0x1253   : > { %4444 = vrsqrt.f32 %v3308_v2  ;;  %v3395_v33 = vmul.f32 %v4441_v32, %v5243_v53  ;;  %vm3366_vm13 = vcmp.eq.f32.partialorder %v3308_v2, inf  ;;  %v3369_v5 = vand.u32 2147483648, %v3308_v2 }
0x1254   : > { %v3341_v36 = vmul.f32 %v3340_v43, %v3304_v8  ;;  %v3349_v45 = vmul.f32 %v4439_v55, %v3348_v31  ;;  %vm3368_vm14 = vcmp.eq.f32.partialorder %v3308_v2, 0.0 }
0x1256   : > { %v3343_v10 = vsel %vm3342_vm9, %v3304_v8, %v3341_v36  ;;  %v3350_v58 = vmul.f32 0.5, %v3349_v45 }
0x1257   : > { %v3346_v13 = vsel %vm3344_vm10, %v3345_v40, %v3343_v10 }
0x1258   : > { %v4443_v11 = vpop.eup %4442  ;;  %v3351_v4 = vsub.f32 1.5, %v3350_v58  ;;  %v3385_v49 = vmax.f32 %v3346_v13, 1e-12 }
0x1259   : > { %v4445_v44 = vpop.eup %4444  ;;  %v3396_v48 = vmul.f32 %v4443_v11, %v5247_v23 }
0x125a   : > { %v3352_v3 = vmul.f32 %v4439_v55, %v3351_v4  ;;  %v3360_v15 = vmul.f32 %v4445_v44, %v3308_v2  ;;  %v3310_v9 = vpop.xlane.xlu2 %3309 }
0x125b   : > { %4446 = vrsqrt.f32 %v3310_v9  ;;  %v3418_v47 = vpack.c.bf16 %v3396_v48, %v3395_v33  ;;  %vm3378_vm15 = vcmp.eq.f32.partialorder %v3310_v9, inf  ;;  %v3381_v19 = vand.u32 2147483648, %v3310_v9 }
0x125c   : > { %v3353_v14 = vmul.f32 %v3352_v3, %v3306_v41  ;;  %v3361_v16 = vmul.f32 %v4445_v44, %v3360_v15  ;;  %4448 = vrcp.f32 %v3385_v49  ;;  %vm3380_vm1 = vcmp.eq.f32.partialorder %v3310_v9, 0.0 }
0x125d   : > { %3480 = vmatmul.bf16.vlgmr.msra.gmra.mxu2 %v3418_v47 }
0x125e   : > { %v3355_v51 = vsel %vm3354_vm11, %v3306_v41, %v3353_v14  ;;  %v3362_v59 = vmul.f32 0.5, %v3361_v16 }
0x125f   : > { %v3358_v60 = vsel %vm3356_vm12, %v3357_v7, %v3355_v51 }
0x1260   : > { %v3363_v50 = vsub.f32 1.5, %v3362_v59  ;;  %v3386_v23 = vmax.f32 %v3358_v60, 1e-12 }
0x1261   : > { %v4447_v61 = vpop.eup %4446 }
0x1262   : > { %v3364_v35 = vmul.f32 %v4445_v44, %v3363_v50  ;;  %v3372_v62 = vmul.f32 %v4447_v61, %v3310_v9  ;;  %4450 = vrcp.f32 %v3386_v23  ;;  %v4449_v30 = vpop.eup %4448 }
0x1263   : > { %v3397_v18 = vmul.f32 %v4449_v30, %v5251_v6 }
0x1264   : > { %v3365_v53 = vmul.f32 %v3364_v35, %v3308_v2  ;;  %v3373_v28 = vmul.f32 %v4447_v61, %v3372_v62 }
0x1266   : > { %v3367_v57 = vsel %vm3366_vm13, %v3308_v2, %v3365_v53  ;;  %v3374_v37 = vmul.f32 0.5, %v3373_v28 }
0x1267   : > { %v3370_v12 = vsel %vm3368_vm14, %v3369_v5, %v3367_v57 }
0x1268   : > { %v4451_v38 = vpop.eup %4450  ;;  %v3375_v8 = vsub.f32 1.5, %v3374_v37  ;;  %v3387_v17 = vmax.f32 %v3370_v12, 1e-12 }
0x1269   : > { %v3398_v20 = vmul.f32 %v4451_v38, %v5255_v29 }
0x126a   : > { %v3376_v42 = vmul.f32 %v4447_v61, %v3375_v8  ;;  %4452 = vrcp.f32 %v3387_v17 }
0x126b   : > { %v3419_v21 = vpack.c.bf16 %v3398_v20, %v3397_v18 }
0x126c   : > { %v3377_v26 = vmul.f32 %v3376_v42, %v3310_v9 }
0x126d   : > { %3485 = vmatmul.bf16.gmra.mxu2 %v3419_v21 }
0x126e   : > { %v3379_v24 = vsel %vm3378_vm15, %v3310_v9, %v3377_v26 }
0x126f   : > { %v3382_v34 = vsel %vm3380_vm1, %v3381_v19, %v3379_v24 }
0x1270   : > { %v3388_v41 = vmax.f32 %v3382_v34, 1e-12  ;;  %v4453_v63 = vpop.eup %4452  ;;  %v4526_v34 = vmov 1.0  }
0x1271   : > { %v3399_v6 = vmul.f32 %v4453_v63, %v5259_v56  ;;  %3607 = vmatpush.msrb.mxu0 %v4526_v34 }
0x1272   : > { %4454 = vrcp.f32 %v3388_v41 }
0x1273   : > { %3608 = vmatpush.msrb.mxu0 %v4526_v34 }
0x1275   : > { %3609 = vmatpush.msrb.mxu0 %v4526_v34 }
0x1277   : > { %3610 = vmatpush.msrb.mxu0 %v4526_v34 }
0x1278   : > { %v4455_v1 = vpop.eup %4454 }
0x1279   : > { %v3400_v29 = vmul.f32 %v4455_v1, %v5263_v54  ;;  %3611 = vmatpush.msrb.mxu0 %v4526_v34 }
0x127b   : > { %v3420_v52 = vpack.c.bf16 %v3400_v29, %v3399_v6  ;;  %3612 = vmatpush.msrb.mxu0 %v4526_v34 }
0x127d   : > { %3644 = vmatpush.bf16.msrb.mxu3 %v3420_v52  ;;  %3490 = vmatmul.bf16.gmra.mxu2 %v3420_v52 }
0x1281   : > { %3645 = vmatpush.bf16.msrb.mxu3 %v3419_v21 }
0x1285   : > { %3646 = vmatpush.bf16.msrb.mxu3 %v3418_v47 }
0x12e0   : > { %v3481_v25 = vpop.f32.mrf.mxu2 }
0x12e1   : > { %v3482_v27 = vadd.f32 %v4309_v39, %v3481_v25 }
0x12e3   : > { %v3496_v46 = vsel %vm1485_vm7, %v3482_v27, -inf }
0x12e4   : > { %3497 = vmax.xlane.f32.xlu0 %v3496_v46 }
0x12e8   : > { %v3483_v0 = vpop.f32.mrf.mxu2 }
0x12e9   : > { %v3484_v22 = vadd.f32 %v4309_v39, %v3483_v0 }
0x12eb   : > { %v3499_v55 = vsel %vm1485_vm7, %v3484_v22, -inf }
0x12ec   : > { %3500 = vmax.xlane.f32.xlu1 %v3499_v55 }
0x12f0   : > { %v3486_v43 = vpop.f32.mrf.mxu2 }
0x12f1   : > { %v3487_v56 = vadd.f32 %v4309_v39, %v3486_v43  ;;  %v4527_v43 = vmov 0  }
0x12f2   : > { %4288 = vset.pattern.permute.xlu2 %v4527_v43 }
0x12f3   : > { %v3502_v54 = vsel %vm1485_vm7, %v3487_v56, -inf }
0x12f4   : > { %3503 = vmax.xlane.f32.xlu2 %v3502_v54 }
0x12f8   : > { %v3488_v31 = vpop.f32.mrf.mxu2 }
0x12f9   : > { %v3489_v2 = vadd.f32 %v4309_v39, %v3488_v31 }
0x12fb   : > { %v3505_v36 = vsel %vm1485_vm7, %v3489_v2, -inf }
0x12fc   : > { %3506 = vmax.xlane.f32.xlu0 %v3505_v36 }
0x1300   : > { %v3491_v45 = vpop.f32.mrf.mxu2 }
0x1301   : > { %v3492_v10 = vadd.f32 %v4309_v39, %v3491_v45  ;;  %v3652_v45 = vld [vmem:[%s4676_s27] sm:$0xff] }
0x1303   : > { %v3508_v58 = vsel %vm1485_vm7, %v3492_v10, -inf }
0x1304   : > { %3509 = vmax.xlane.f32.xlu1 %v3508_v58 }
0x1308   : > { %v3493_v32 = vpop.f32.mrf.mxu2 }
0x1309   : > { %v3494_v40 = vadd.f32 %v4309_v39, %v3493_v32 }
0x130b   : > { %v3511_v11 = vsel %vm1485_vm7, %v3494_v40, -inf }
0x130c   : > { %3512 = vmax.xlane.f32.xlu2 %v3511_v11 }
0x1357   : > { %v3498_v4 = vpop.xlane.xlu0 %3497 }
0x1358   : > { %v3514_v44 = vsub.f32 %v3482_v27, %v3498_v4 }
0x135a   : > { %v3520_v48 = vmul.f32 1.442695, %v3514_v44 }
0x135c   : > { %4456 = vpow2.f32 %v3520_v48 }
0x135f   : > { %v3501_v13 = vpop.xlane.xlu1 %3500 }
0x1360   : > { %v3515_v3 = vsub.f32 %v3484_v22, %v3501_v13 }
0x1362   : > { %v4457_v15 = vpop.eup %4456  ;;  %v3522_v9 = vmul.f32 1.442695, %v3515_v3 }
0x1363   : > { %v3532_v33 = vsel %vm1485_vm7, %v4457_v15, 0.0 }
0x1364   : > { %4458 = vpow2.f32 %v3522_v9  ;;  %3533 = vadd.xlane.f32.xlu0 %v3532_v33 }
0x1367   : > { %v3504_v14 = vpop.xlane.xlu2 %3503 }
0x1368   : > { %v3516_v16 = vsub.f32 %v3487_v56, %v3504_v14 }
0x136a   : > { %v4459_v47 = vpop.eup %4458  ;;  %v3524_v49 = vmul.f32 1.442695, %v3516_v16 }
0x136b   : > { %v3535_v7 = vsel %vm1485_vm7, %v4459_v47, 0.0 }
0x136c   : > { %4460 = vpow2.f32 %v3524_v49  ;;  %3536 = vadd.xlane.f32.xlu1 %v3535_v7 }
0x136f   : > { %v3507_v51 = vpop.xlane.xlu0 %3506 }
0x1370   : > { %v3517_v59 = vsub.f32 %v3489_v2, %v3507_v51 }
0x1372   : > { %v4461_v60 = vpop.eup %4460  ;;  %v3526_v50 = vmul.f32 1.442695, %v3517_v59 }
0x1373   : > { %v3538_v23 = vsel %vm1485_vm7, %v4461_v60, 0.0 }
0x1374   : > { %4462 = vpow2.f32 %v3526_v50  ;;  %3539 = vadd.xlane.f32.xlu2 %v3538_v23 }
0x1377   : > { %v3510_v61 = vpop.xlane.xlu1 %3509 }
0x1378   : > { %v3518_v35 = vsub.f32 %v3492_v10, %v3510_v61 }
0x137a   : > { %v4463_v62 = vpop.eup %4462  ;;  %v3528_v53 = vmul.f32 1.442695, %v3518_v35 }
0x137b   : > { %v3541_v28 = vsel %vm1485_vm7, %v4463_v62, 0.0 }
0x137c   : > { %4464 = vpow2.f32 %v3528_v53  ;;  %3542 = vadd.xlane.f32.xlu0 %v3541_v28 }
0x137f   : > { %v3513_v30 = vpop.xlane.xlu2 %3512 }
0x1380   : > { %v3519_v57 = vsub.f32 %v3494_v40, %v3513_v30 }
0x1382   : > { %v4465_v37 = vpop.eup %4464  ;;  %v3530_v5 = vmul.f32 1.442695, %v3519_v57 }
0x1383   : > { %v3544_v38 = vsel %vm1485_vm7, %v4465_v37, 0.0 }
0x1384   : > { %4466 = vpow2.f32 %v3530_v5  ;;  %3545 = vadd.xlane.f32.xlu1 %v3544_v38 }
0x138a   : > { %v4467_v8 = vpop.eup %4466 }
0x138b   : > { %v3547_v18 = vsel %vm1485_vm7, %v4467_v8, 0.0 }
0x138c   : > { %3548 = vadd.xlane.f32.xlu2 %v3547_v18 }
0x13d7   : > { %v3534_v20 = vpop.xlane.xlu0 %3533 }
0x13d8   : > { %4468 = vrcp.f32 %v3534_v20 }
0x13de   : > { %v4469_v12 = vpop.eup %4468 }
0x13df   : > { %v3537_v42 = vpop.xlane.xlu1 %3536  ;;  %v3556_v21 = vmul.f32 %v4469_v12, %v4457_v15 }
0x13e0   : > { %4470 = vrcp.f32 %v3537_v42 }
0x13e1   : > { %3562 = vxpose.xlu0.b32.start [1/6] (short) (narrow) %v3556_v21, 8 }
0x13e6   : > { %v4471_v26 = vpop.eup %4470 }
0x13e7   : > { %v3540_v17 = vpop.xlane.xlu2 %3539  ;;  %v3557_v19 = vmul.f32 %v4471_v26, %v4459_v47 }
0x13e8   : > { %4472 = vrcp.f32 %v3540_v17 }
0x13e9   : > { %3563 = vxpose.xlu0.b32.cont [2/6] (short) (narrow) %v3557_v19, 8  ;;  %v3617_v24 = vpack.c.bf16 %v3557_v19, %v3556_v21 }
0x13eb   : > { %3620 = vxpose.xlu1.c.b16.start [1/3] (short) (narrow) %v3617_v24, 16 }
0x13ee   : > { %v4473_v41 = vpop.eup %4472 }
0x13ef   : > { %v3543_v63 = vpop.xlane.xlu0 %3542  ;;  %v3558_v1 = vmul.f32 %v4473_v41, %v4461_v60 }
0x13f0   : > { %4474 = vrcp.f32 %v3543_v63 }
0x13f1   : > { %3564 = vxpose.xlu0.b32.cont [3/6] (short) (narrow) %v3558_v1, 8 }
0x13f6   : > { %v4475_v6 = vpop.eup %4474 }
0x13f7   : > { %v3546_v29 = vpop.xlane.xlu1 %3545  ;;  %v3559_v52 = vmul.f32 %v4475_v6, %v4463_v62 }
0x13f8   : > { %4476 = vrcp.f32 %v3546_v29 }
0x13f9   : > { %3565 = vxpose.xlu0.b32.cont [4/6] (short) (narrow) %v3559_v52, 8  ;;  %v3618_v39 = vpack.c.bf16 %v3559_v52, %v3558_v1 }
0x13fb   : > { %3621 = vxpose.xlu1.c.b16.cont [2/3] (short) (narrow) %v3618_v39, 16 }
0x13fe   : > { %v4477_v25 = vpop.eup %4476 }
0x13ff   : > { %v3549_v27 = vpop.xlane.xlu2 %3548  ;;  %v3560_v46 = vmul.f32 %v4477_v25, %v4465_v37 }
0x1400   : > { %4478 = vrcp.f32 %v3549_v27 }
0x1401   : > { %3566 = vxpose.xlu0.b32.cont [5/6] (short) (narrow) %v3560_v46, 8 }
0x1406   : > { %v4479_v0 = vpop.eup %4478 }
0x1407   : > { %v3561_v22 = vmul.f32 %v4479_v0, %v4467_v8 }
0x1409   : > { %3567 = vxpose.xlu0.b32.end [6/6] (short) (narrow) %v3561_v22, 8  ;;  %v3619_v55 = vpack.c.bf16 %v3561_v22, %v3560_v46 }
0x140b   : > { %3622 = vxpose.xlu1.c.b16.end [3/3] (short) (narrow) %v3619_v55, 16 }
0x1470   : > { %4289 = vset.pattern.permute.xlu0 %v4527_v43 }
0x1485   : > { %v3578_v56 = vpop.trf.xlu0 }
0x1486   : > { %4182 = vmatmul.msk.f32.vlgmr.msrb.gmra.mxu0 %vm1144_vm5, %v3578_v56 }
0x1497   : > { %v3628_v54 = vpop.trf.xlu1 }
0x1498   : > { %4183 = vmatmul.msk.bf16.vlgmr.msrb.gmra.mxu3 %vm1144_vm5, %v3628_v54 }
0x1503   : > { %v3614_v31 = vpop.f32.mrf.mxu0 }
0x1504   : > { %3655 = vperm.xlu2 %4288, %v3614_v31  }
0x151b   : > { %v3648_v2 = vpop.f32.mrf.mxu3 }
0x1523   : > { %v3650_v36 = vpop.f32.mrf.mxu3 }
0x155e   : > { %v3656_v10 = vpop.permute.xlu2 %3655 }
0x155f   : > { %v3658_v58 = vmul.f32 %v3656_v10, %v3652_v45 }
0x1561   : > { %v3659_v32 = vsub.f32 %v3648_v2, %v3658_v58 }
0x1563   : > { %v3660_v40 = vmul.f32 %v3659_v32, %v3659_v32 }
0x1565   : > { %3661 = vadd.xlane.f32.xlu2 %v3660_v40 }
0x15d8   : > { %v3662_v11 = vpop.xlane.xlu2 %3661 }
0x15d9   : > { %4480 = vrsqrt.f32 %v3662_v11  ;;  %vm3670_vm5 = vcmp.eq.f32.partialorder %v3662_v11, inf  ;;  %v3673_v33 = vand.u32 2147483648, %v3662_v11  ;;  %vm3672_vm7 = vcmp.eq.f32.partialorder %v3662_v11, 0.0 }
0x15df   : > { %v4481_v4 = vpop.eup %4480 }
0x15e0   : > { %v3664_v44 = vmul.f32 %v4481_v4, %v3662_v11 }
0x15e2   : > { %v3665_v48 = vmul.f32 %v4481_v4, %v3664_v44 }
0x15e4   : > { %v3666_v13 = vmul.f32 0.5, %v3665_v48 }
0x15e6   : > { %v3667_v3 = vsub.f32 1.5, %v3666_v13 }
0x15e8   : > { %v3668_v15 = vmul.f32 %v4481_v4, %v3667_v3 }
0x15ea   : > { %v3669_v9 = vmul.f32 %v3668_v15, %v3662_v11 }
0x15ec   : > { %v3671_v14 = vsel %vm3670_vm5, %v3662_v11, %v3669_v9 }
0x15ed   : > { %v3674_v16 = vsel %vm3672_vm7, %v3673_v33, %v3671_v14 }
0x15ee   : > { %v3675_v47 = vmax.f32 %v3674_v16, 1e-12 }
0x15f0   : > { %4482 = vrcp.f32 %v3675_v47 }
0x15f6   : > { %v4483_v49 = vpop.eup %4482 }
0x15f7   : > { %v3677_v7 = vmul.f32 %v4483_v49, %v3659_v32 }
0x15f9   : > { %v3678_v51 = vmul.f32 %v3677_v7, %v3677_v7 }
0x15fb   : > { %3679 = vadd.xlane.f32.xlu2 %v3678_v51 }
0x166e   : > { %v3680_v59 = vpop.xlane.xlu2 %3679 }
0x166f   : > { %v3681_v60 = vrot.slane %v3680_v59, 4 }
0x1671   : > { %v3682_v50 = vadd.f32 %v3681_v60, %v3680_v59 }
0x1673   : > { %v3683_v23 = vrot.slane %v3682_v50, 2 }
0x1675   : > { %v3684_v61 = vadd.f32 %v3683_v23, %v3682_v50 }
0x1677   : > { %v3685_v35 = vrot.slane %v3684_v61, 1 }
0x1679   : > { %v3686_v62 = vadd.f32 %v3685_v35, %v3684_v61 }
0x167b   : > { %4484 = vrsqrt.f32 %v3686_v62  ;;  %vm3694_vm2 = vcmp.eq.f32.partialorder %v3686_v62, inf  ;;  %v3697_v8 = vand.u32 2147483648, %v3686_v62  ;;  %vm3696_vm3 = vcmp.eq.f32.partialorder %v3686_v62, 0.0 }
0x1681   : > { %v4485_v53 = vpop.eup %4484 }
0x1682   : > { %v3688_v28 = vmul.f32 %v4485_v53, %v3686_v62 }
0x1684   : > { %v3689_v30 = vmul.f32 %v4485_v53, %v3688_v28 }
0x1686   : > { %v3690_v57 = vmul.f32 0.5, %v3689_v30 }
0x1688   : > { %v3691_v37 = vsub.f32 1.5, %v3690_v57 }
0x168a   : > { %v3692_v5 = vmul.f32 %v4485_v53, %v3691_v37 }
0x168c   : > { %v3693_v38 = vmul.f32 %v3692_v5, %v3686_v62 }
0x168e   : > { %v3695_v18 = vsel %vm3694_vm2, %v3686_v62, %v3693_v38 }
0x168f   : > { %v3698_v20 = vsel %vm3696_vm3, %v3697_v8, %v3695_v18 }
0x1690   : > { %v3699_v12 = vmax.f32 %v3698_v20, 1e-12 }
0x1692   : > { %4486 = vrcp.f32 %v3699_v12 }
0x1698   : > { %v4487_v42 = vpop.eup %4486 }
0x1699   : > { %v3701_v21 = vmul.f32 %v4487_v42, %v3677_v7 }
0x169b   : > { %3702 = vst [vmem:[%s900_s26] sm:$0xff] %v3701_v21 }
0x169c PF: > { %s69_s7 = sadd.s32 1, %s4494_s7  }
0x169d   : > { %p66_p4 = scmp.ge.s32.totalorder %s69_s7, 4  }
0x169f   :  { %68 = sbr.rel (!%p66_p4) target bundleno = 49 (0x31), region = 216 }

</bundles_post_ra>
